<compile_context>
chip_gen: v7x
topology: tpu7x:2x2x1
jax: 0.10.0
libtpu: 0.0.40
codegen_flags: <defaults>
</compile_context>

<pallas_src>
import math
import functools

import numpy as np
import jax
import jax.numpy as jnp
from jax.experimental import pallas as pl
from jax.experimental.pallas import tpu as pltpu

EPS = 1e-6
NEG_INF = -1000000000.0

_CPARAMS = pltpu.CompilerParams(
    dimension_semantics=("parallel", "arbitrary"),
    vmem_limit_bytes=32 * 1024 * 1024,
)


# ----------------------------------------------------------------------------
# In-kernel helpers (values already resident in VMEM / vregs)
# ----------------------------------------------------------------------------

def _norm_v(x, alpha, bias):
    """alpha * (x - mean) / (std + eps) + bias; Bessel std (N-1) like torch.std."""
    H = x.shape[-1]
    mean = jnp.mean(x, axis=-1, keepdims=True)
    d = x - mean
    var = jnp.sum(d * d, axis=-1, keepdims=True) * (1.0 / (H - 1))
    std = jnp.sqrt(var)
    return alpha * d / (std + EPS) + bias


def _attend(q, k, v, mask_add, wo, bo, n_heads):
    """q:(Sq,H) f32, k/v:(Sk,H) f32, mask_add:(1|Sq,Sk) additive f32, wo bf16 (H,H)."""
    Sq, H = q.shape
    dk = H // n_heads
    heads = []
    for h in range(n_heads):
        sl = slice(h * dk, (h + 1) * dk)
        # q_h @ k_h^T without materializing a transpose (contract last dims of both).
        s = jax.lax.dot_general(q[:, sl].astype(jnp.bfloat16),
                                k[:, sl].astype(jnp.bfloat16),
                                (((1,), (1,)), ((), ())),
                                preferred_element_type=jnp.float32)
        s = s + mask_add                                   # additive mask, in-register bcast
        s = s - jnp.max(s, axis=-1, keepdims=True)
        p = jnp.exp(s)
        p = p * pl.reciprocal(jnp.sum(p, axis=-1, keepdims=True), approx=True)
        heads.append(jnp.dot(p.astype(jnp.bfloat16), v[:, sl].astype(jnp.bfloat16),
                             preferred_element_type=jnp.float32))
    ctx = jnp.concatenate(heads, axis=-1)                  # (Sq, H) single context buffer
    return jnp.dot(ctx.astype(jnp.bfloat16), wo, preferred_element_type=jnp.float32) + bo


def _mha_self(x2, mask_add, wqkv, bqkv, wo, bo, n_heads):
    H = x2.shape[-1]
    qkv = jnp.dot(x2.astype(jnp.bfloat16), wqkv, preferred_element_type=jnp.float32) + bqkv
    return _attend(qkv[:, :H], qkv[:, H:2 * H], qkv[:, 2 * H:], mask_add, wo, bo, n_heads)


def _mha_cross(x2, e, mask_add, wq, bq, wkv, bkv, wo, bo, n_heads):
    H = x2.shape[-1]
    q = jnp.dot(x2.astype(jnp.bfloat16), wq, preferred_element_type=jnp.float32) + bq
    kv = jnp.dot(e.astype(jnp.bfloat16), wkv, preferred_element_type=jnp.float32) + bkv
    return _attend(q, kv[:, :H], kv[:, H:], mask_add, wo, bo, n_heads)


def _ffn(x2, w1, b1, w2, b2):
    h = jnp.dot(x2.astype(jnp.bfloat16), w1, preferred_element_type=jnp.float32) + b1
    h = jnp.maximum(h, 0.0)
    return jnp.dot(h.astype(jnp.bfloat16), w2, preferred_element_type=jnp.float32) + b2


# ----------------------------------------------------------------------------
# Fused stack kernels (ONE pallas_call per stack, grid = (B, n_layers))
# ----------------------------------------------------------------------------

def _self_stack_kernel(x_ref, mask_ref, norms_ref,
                       wqkv_ref, bqkv_ref, wo_ref, bo_ref,
                       w1_ref, b1_ref, w2_ref, b2_ref,
                       fnorm_ref,
                       o_ref, x_acc, *, n_heads):
    l = pl.program_id(1)

    @pl.when(l == 0)
    def _():
        x_acc[...] = x_ref[0]

    x = x_acc[...]                 # residual stream, VMEM-resident across layers
    mask = mask_ref[0]             # (1|S, S) additive f32
    norms = norms_ref[0]           # (6, H)

    x2 = _norm_v(x, norms[0:1], norms[1:2])
    x = x + _mha_self(x2, mask, wqkv_ref[0], bqkv_ref[0], wo_ref[0], bo_ref[0], n_heads)
    x2 = _norm_v(x, norms[2:3], norms[3:4])
    x = x + _ffn(x2, w1_ref[0], b1_ref[0], w2_ref[0], b2_ref[0])
    x_acc[...] = x

    @pl.when(l == pl.num_programs(1) - 1)
    def _():
        fn = fnorm_ref[...]        # fused stack-final Norm
        o_ref[0] = _norm_v(x, fn[0:1], fn[1:2])


def _cross_stack_kernel(x_ref, e_ref, tmask_ref, smask_ref, norms_ref,
                        a1_wqkv_ref, a1_bqkv_ref, a1_wo_ref, a1_bo_ref,
                        a2_wq_ref, a2_bq_ref, a2_wkv_ref, a2_bkv_ref, a2_wo_ref, a2_bo_ref,
                        w1_ref, b1_ref, w2_ref, b2_ref,
                        fnorm_ref, wout_ref, bout_ref,
                        o_ref, x_acc, *, n_heads):
    l = pl.program_id(1)

    @pl.when(l == 0)
    def _():
        x_acc[...] = x_ref[0]

    x = x_acc[...]
    e = e_ref[0]                   # encoder output, resident across all layers
    tmask = tmask_ref[0]
    smask = smask_ref[0]
    norms = norms_ref[0]

    x2 = _norm_v(x, norms[0:1], norms[1:2])
    x = x + _mha_self(x2, tmask, a1_wqkv_ref[0], a1_bqkv_ref[0],
                      a1_wo_ref[0], a1_bo_ref[0], n_heads)
    x2 = _norm_v(x, norms[2:3], norms[3:4])
    x = x + _mha_cross(x2, e, smask, a2_wq_ref[0], a2_bq_ref[0],
                       a2_wkv_ref[0], a2_bkv_ref[0], a2_wo_ref[0], a2_bo_ref[0], n_heads)
    x2 = _norm_v(x, norms[4:5], norms[5:6])
    x = x + _ffn(x2, w1_ref[0], b1_ref[0], w2_ref[0], b2_ref[0])
    x_acc[...] = x

    @pl.when(l == pl.num_programs(1) - 1)
    def _():
        fn = fnorm_ref[...]        # fused final Norm + output projection (lane-padded vocab)
        xn = _norm_v(x, fn[0:1], fn[1:2])
        o_ref[0] = jnp.dot(xn.astype(jnp.bfloat16), wout_ref[...],
                           preferred_element_type=jnp.float32) + bout_ref[...]


# ----------------------------------------------------------------------------
# pallas_call wrappers
# ----------------------------------------------------------------------------

def run_self_stack(x, mask_add, sp, n_heads):
    B, S, H = x.shape
    L = sp["norms"].shape[0]
    Mq = mask_add.shape[1]
    Fh = sp["ff_w1"].shape[2]
    kern = functools.partial(_self_stack_kernel, n_heads=n_heads)
    wspec = lambda shape: pl.BlockSpec(shape, lambda b, l: (l, 0, 0))
    return pl.pallas_call(
        kern,
        out_shape=jax.ShapeDtypeStruct((B, S, H), jnp.float32),
        grid=(B, L),
        in_specs=[
            pl.BlockSpec((1, S, H), lambda b, l: (b, 0, 0)),   # x (embedded)
            pl.BlockSpec((1, Mq, S), lambda b, l: (b, 0, 0)),  # additive mask
            wspec((1, 6, H)),                                  # norms
            wspec((1, H, 3 * H)),                              # wqkv (bf16)
            wspec((1, 1, 3 * H)),                              # bqkv
            wspec((1, H, H)),                                  # wo (bf16)
            wspec((1, 1, H)),                                  # bo
            wspec((1, H, Fh)),                                 # ff_w1 (bf16)
            wspec((1, 1, Fh)),                                 # ff_b1
            wspec((1, Fh, H)),                                 # ff_w2 (bf16)
            wspec((1, 1, H)),                                  # ff_b2
            pl.BlockSpec((2, H), lambda b, l: (0, 0)),         # final norm
        ],
        out_specs=pl.BlockSpec((1, S, H), lambda b, l: (b, 0, 0)),
        scratch_shapes=[pltpu.VMEM((S, H), jnp.float32)],
        compiler_params=_CPARAMS,
    )(x, mask_add, sp["norms"],
      sp["a1_wqkv"], sp["a1_bqkv"], sp["a1_wo"], sp["a1_bo"],
      sp["ff_w1"], sp["ff_b1"], sp["ff_w2"], sp["ff_b2"],
      sp["fnorm"])


def run_cross_stack(x, e, tmask_add, smask_add, sp, wout, bout, n_heads):
    B, S, H = x.shape
    Se = e.shape[1]
    L = sp["norms"].shape[0]
    Mq = tmask_add.shape[1]
    Ms = smask_add.shape[1]
    Fh = sp["ff_w1"].shape[2]
    Vp = wout.shape[1]
    kern = functools.partial(_cross_stack_kernel, n_heads=n_heads)
    wspec = lambda shape: pl.BlockSpec(shape, lambda b, l: (l, 0, 0))
    return pl.pallas_call(
        kern,
        out_shape=jax.ShapeDtypeStruct((B, S, Vp), jnp.float32),
        grid=(B, L),
        in_specs=[
            pl.BlockSpec((1, S, H), lambda b, l: (b, 0, 0)),    # x (embedded trg)
            pl.BlockSpec((1, Se, H), lambda b, l: (b, 0, 0)),   # encoder output
            pl.BlockSpec((1, Mq, S), lambda b, l: (b, 0, 0)),   # trg additive mask
            pl.BlockSpec((1, Ms, Se), lambda b, l: (b, 0, 0)),  # src additive mask
            wspec((1, 6, H)),                                   # norms
            wspec((1, H, 3 * H)),                               # a1 wqkv
            wspec((1, 1, 3 * H)),                               # a1 bqkv
            wspec((1, H, H)),                                   # a1 wo
            wspec((1, 1, H)),                                   # a1 bo
            wspec((1, H, H)),                                   # a2 wq
            wspec((1, 1, H)),                                   # a2 bq
            wspec((1, H, 2 * H)),                               # a2 wkv
            wspec((1, 1, 2 * H)),                               # a2 bkv
            wspec((1, H, H)),                                   # a2 wo
            wspec((1, 1, H)),                                   # a2 bo
            wspec((1, H, Fh)),                                  # ff_w1
            wspec((1, 1, Fh)),                                  # ff_b1
            wspec((1, Fh, H)),                                  # ff_w2
            wspec((1, 1, H)),                                   # ff_b2
            pl.BlockSpec((2, H), lambda b, l: (0, 0)),          # final norm
            pl.BlockSpec((H, Vp), lambda b, l: (0, 0)),         # out weight (bf16, padded)
            pl.BlockSpec((1, Vp), lambda b, l: (0, 0)),         # out bias (padded)
        ],
        out_specs=pl.BlockSpec((1, S, Vp), lambda b, l: (b, 0, 0)),
        scratch_shapes=[pltpu.VMEM((S, H), jnp.float32)],
        compiler_params=_CPARAMS,
    )(x, e, tmask_add, smask_add, sp["norms"],
      sp["a1_wqkv"], sp["a1_bqkv"], sp["a1_wo"], sp["a1_bo"],
      sp["a2_wq"], sp["a2_bq"], sp["a2_wkv"], sp["a2_bkv"], sp["a2_wo"], sp["a2_bo"],
      sp["ff_w1"], sp["ff_b1"], sp["ff_w2"], sp["ff_b2"],
      sp["fnorm"], wout, bout)


# ----------------------------------------------------------------------------
# Model glue (embedding gather, PE add, mask conversion, vocab slice)
# ----------------------------------------------------------------------------

def _to_additive(mask_int):
    return jnp.where(mask_int == 0, NEG_INF, 0.0).astype(jnp.float32)


def transformer_forward(packed, src, trg, src_mask, trg_mask, *,
                        n_heads, vocab_size, reverse=False):
    emb = packed["embed"]
    pe = packed["pe"]
    H = emb.shape[1]
    scale = math.sqrt(H)

    def embed(tok):
        S = tok.shape[1]
        return emb[tok] * scale + pe[:S][None, :, :]      # gather + PE (glue)

    smask_add = _to_additive(src_mask)
    tmask_add = _to_additive(trg_mask)

    if reverse:
        first, second = packed["decoder"], packed["encoder"]
        w_out, b_out = packed["out_rev_w"], packed["out_rev_b"]
    else:
        first, second = packed["encoder"], packed["decoder"]
        w_out, b_out = packed["out_w"], packed["out_b"]

    e_out = run_self_stack(embed(src), smask_add, first, n_heads)        # L layers + norm
    logits_pad = run_cross_stack(embed(trg), e_out, tmask_add, smask_add,
                                 second, w_out, b_out, n_heads)          # L layers + norm + proj
    return logits_pad[:, :, :vocab_size]                                  # strip lane padding


# ----------------------------------------------------------------------------
# Deterministic parameter init (shapes per the PyTorch __init__)
# ----------------------------------------------------------------------------

def init_linear(key, out_f, in_f):
    k1, k2 = jax.random.split(key)
    bound = 1.0 / math.sqrt(in_f)
    return {"w": jax.random.uniform(k1, (out_f, in_f), jnp.float32, -bound, bound),
            "b": jax.random.uniform(k2, (out_f,), jnp.float32, -bound, bound)}


def init_norm(n_hidden):
    return {"alpha": jnp.ones((n_hidden,), jnp.float32),
            "bias": jnp.zeros((n_hidden,), jnp.float32)}


def init_mha(key, n_hidden):
    ks = jax.random.split(key, 4)
    return {"q": init_linear(ks[0], n_hidden, n_hidden),
            "k": init_linear(ks[1], n_hidden, n_hidden),
            "v": init_linear(ks[2], n_hidden, n_hidden),
            "o": init_linear(ks[3], n_hidden, n_hidden)}


def init_decoder_layer(key, n_hidden, n_ff_hidden):
    ks = jax.random.split(key, 4)
    l1 = init_linear(ks[2], n_ff_hidden, n_hidden)
    l2 = init_linear(ks[3], n_hidden, n_ff_hidden)
    return {"norm_1": init_norm(n_hidden), "norm_2": init_norm(n_hidden),
            "norm_3": init_norm(n_hidden),
            "attn_1": init_mha(ks[0], n_hidden), "attn_2": init_mha(ks[1], n_hidden),
            "ff": {"w1": l1["w"], "b1": l1["b"], "w2": l2["w"], "b2": l2["b"]}}


def init_decoder(key, n_hidden, n_layers, n_ff_hidden):
    ks = jax.random.split(key, n_layers)
    return {"layers": [init_decoder_layer(ks[i], n_hidden, n_ff_hidden) for i in range(n_layers)],
            "norm": init_norm(n_hidden)}


def make_pe(max_length, n_hidden):
    pe = np.zeros((max_length, n_hidden), dtype=np.float32)
    for pos in range(max_length):
        for i in range(0, n_hidden, 2):
            pe[pos, i] = math.sin(pos / 10000 ** (2 * i / n_hidden))
            pe[pos, i + 1] = math.cos(pos / 10000 ** (2 * (i + 1) / n_hidden))
    return jnp.asarray(pe)


def init_transformer(key, vocab_size, n_hidden, n_layers, n_ff_hidden, max_length):
    ks = jax.random.split(key, 5)
    return {"embed": jax.random.normal(ks[0], (vocab_size, n_hidden), jnp.float32),
            "encoder": init_decoder(ks[1], n_hidden, n_layers, n_ff_hidden),
            "decoder": init_decoder(ks[2], n_hidden, n_layers, n_ff_hidden),
            "out": init_linear(ks[3], vocab_size, n_hidden),
            "out_rev": init_linear(ks[4], vocab_size, n_hidden),
            "pe": make_pe(max_length, n_hidden)}


# ----------------------------------------------------------------------------
# One-time packing: pre-transpose, fuse QKV, fold 1/sqrt(dk), bf16, stack layers
# ----------------------------------------------------------------------------

def _pack_mha_self(mha, n_heads):
    H = mha["q"]["w"].shape[0]
    dk = H // n_heads
    sc = 1.0 / math.sqrt(dk)
    wqkv = jnp.concatenate([mha["q"]["w"].T * sc, mha["k"]["w"].T, mha["v"]["w"].T], axis=1)
    bqkv = jnp.concatenate([mha["q"]["b"] * sc, mha["k"]["b"], mha["v"]["b"]]).reshape(1, -1)
    return (wqkv.astype(jnp.bfloat16), bqkv,
            mha["o"]["w"].T.astype(jnp.bfloat16), mha["o"]["b"].reshape(1, -1))


def _pack_mha_cross(mha, n_heads):
    H = mha["q"]["w"].shape[0]
    dk = H // n_heads
    sc = 1.0 / math.sqrt(dk)
    wq = (mha["q"]["w"].T * sc).astype(jnp.bfloat16)
    bq = (mha["q"]["b"] * sc).reshape(1, -1)
    wkv = jnp.concatenate([mha["k"]["w"].T, mha["v"]["w"].T], axis=1).astype(jnp.bfloat16)
    bkv = jnp.concatenate([mha["k"]["b"], mha["v"]["b"]]).reshape(1, -1)
    return (wq, bq, wkv, bkv,
            mha["o"]["w"].T.astype(jnp.bfloat16), mha["o"]["b"].reshape(1, -1))


def _pack_stack(stack_p, n_heads):
    Ls = stack_p["layers"]

    def norm_rows(lp):
        return jnp.stack([lp["norm_1"]["alpha"], lp["norm_1"]["bias"],
                          lp["norm_2"]["alpha"], lp["norm_2"]["bias"],
                          lp["norm_3"]["alpha"], lp["norm_3"]["bias"]], axis=0)

    a1 = [_pack_mha_self(lp["attn_1"], n_heads) for lp in Ls]
    a2 = [_pack_mha_cross(lp["attn_2"], n_heads) for lp in Ls]
    stk = lambda items, i: jnp.stack([it[i] for it in items], axis=0)

    return {
        "norms": jnp.stack([norm_rows(lp) for lp in Ls], axis=0),            # (L, 6, H)
        "a1_wqkv": stk(a1, 0), "a1_bqkv": stk(a1, 1), "a1_wo": stk(a1, 2), "a1_bo": stk(a1, 3),
        "a2_wq": stk(a2, 0), "a2_bq": stk(a2, 1), "a2_wkv": stk(a2, 2), "a2_bkv": stk(a2, 3),
        "a2_wo": stk(a2, 4), "a2_bo": stk(a2, 5),
        "ff_w1": jnp.stack([lp["ff"]["w1"].T.astype(jnp.bfloat16) for lp in Ls], 0),
        "ff_b1": jnp.stack([lp["ff"]["b1"].reshape(1, -1) for lp in Ls], 0),
        "ff_w2": jnp.stack([lp["ff"]["w2"].T.astype(jnp.bfloat16) for lp in Ls], 0),
        "ff_b2": jnp.stack([lp["ff"]["b2"].reshape(1, -1) for lp in Ls], 0),
        "fnorm": jnp.stack([stack_p["norm"]["alpha"], stack_p["norm"]["bias"]], 0),
    }


def _pack_out(lin, vocab_size):
    vp = ((vocab_size + 127) // 128) * 128                 # lane-dense padded vocab
    H = lin["w"].shape[1]
    w_pad = jnp.zeros((H, vp), jnp.float32).at[:, :vocab_size].set(lin["w"].T)
    b_pad = jnp.zeros((1, vp), jnp.float32).at[0, :vocab_size].set(lin["b"])
    return w_pad.astype(jnp.bfloat16), b_pad


def prepare_params(params, vocab_size, n_heads):
    out_w, out_b = _pack_out(params["out"], vocab_size)
    orev_w, orev_b = _pack_out(params["out_rev"], vocab_size)
    return {"embed": params["embed"], "pe": params["pe"],
            "encoder": _pack_stack(params["encoder"], n_heads),
            "decoder": _pack_stack(params["decoder"], n_heads),
            "out_w": out_w, "out_b": out_b,
            "out_rev_w": orev_w, "out_rev_b": orev_b}


# ----------------------------------------------------------------------------
# Main
# ----------------------------------------------------------------------------

if __name__ == "__main__":
    vocab_size = 50
    n_hidden = 32
    n_layers = 2
    n_heads = 4
    dropout_p = 0.0          # dropout is identity
    max_length = 16
    n_ff_hidden = 64

    B, S_src, S_trg = 2, 8, 8

    key = jax.random.PRNGKey(0)
    kp, ks, kt = jax.random.split(key, 3)

    raw_params = init_transformer(kp, vocab_size, n_hidden, n_layers, n_ff_hidden, max_length)
    params = prepare_params(raw_params, vocab_size, n_heads)   # one-time pack (bf16, stacked)

    src = jax.random.randint(ks, (B, S_src), 0, vocab_size, dtype=jnp.int32)
    trg = jax.random.randint(kt, (B, S_trg), 0, vocab_size, dtype=jnp.int32)
    src_mask = jnp.ones((B, 1, S_src), dtype=jnp.int32)                          # pad mask
    trg_mask = jnp.tril(jnp.ones((S_trg, S_trg), jnp.int32))[None].repeat(B, 0)  # causal mask

    fwd = jax.jit(functools.partial(transformer_forward, n_heads=n_heads,
                                    vocab_size=vocab_size, reverse=False))
    out = fwd(params, src, trg, src_mask, trg_mask)
    out = jax.block_until_ready(out)

    assert out.shape == (B, S_trg, vocab_size)
    assert bool(jnp.all(jnp.isfinite(out)))
    print("KERNEL_OK")
</pallas_src>

<mosaic_0001>
module attributes {stable_mosaic.version = 11 : i64} {
  func.func @_self_stack_kernel(%arg0: i32, %arg1: i32, %arg2: memref<1x8x32xf32, #tpu.memory_space<vmem>>, %arg3: memref<1x1x8xf32, #tpu.memory_space<vmem>>, %arg4: memref<1x6x32xf32, #tpu.memory_space<vmem>>, %arg5: memref<1x32x96xbf16, #tpu.memory_space<vmem>>, %arg6: memref<1x1x96xf32, #tpu.memory_space<vmem>>, %arg7: memref<1x32x32xbf16, #tpu.memory_space<vmem>>, %arg8: memref<1x1x32xf32, #tpu.memory_space<vmem>>, %arg9: memref<1x32x64xbf16, #tpu.memory_space<vmem>>, %arg10: memref<1x1x64xf32, #tpu.memory_space<vmem>>, %arg11: memref<1x64x32xbf16, #tpu.memory_space<vmem>>, %arg12: memref<1x1x32xf32, #tpu.memory_space<vmem>>, %arg13: memref<2x32xf32, #tpu.memory_space<vmem>>, %arg14: memref<1x8x32xf32, #tpu.memory_space<vmem>>, %arg15: memref<8x32xf32, #tpu.memory_space<vmem>>) attributes {dimension_semantics = [#tpu.dimension_semantics<parallel>, #tpu.dimension_semantics<arbitrary>], iteration_bounds = array<i64: 2, 2>, scalar_prefetch = 0 : i64, scratch_operands = 1 : i64, tpu.core_type = #tpu.core_type<tc>, window_params = [{transform_indices = @transform_0, window_bounds = array<i64: 1, 8, 32>}, {transform_indices = @transform_1, window_bounds = array<i64: 1, 1, 8>}, {transform_indices = @transform_2, window_bounds = array<i64: 1, 6, 32>}, {transform_indices = @transform_3, window_bounds = array<i64: 1, 32, 96>}, {transform_indices = @transform_4, window_bounds = array<i64: 1, 1, 96>}, {transform_indices = @transform_5, window_bounds = array<i64: 1, 32, 32>}, {transform_indices = @transform_6, window_bounds = array<i64: 1, 1, 32>}, {transform_indices = @transform_7, window_bounds = array<i64: 1, 32, 64>}, {transform_indices = @transform_8, window_bounds = array<i64: 1, 1, 64>}, {transform_indices = @transform_9, window_bounds = array<i64: 1, 64, 32>}, {transform_indices = @transform_10, window_bounds = array<i64: 1, 1, 32>}, {pipeline_mode = #tpu.pipeline_mode<synchronous>, transform_indices = @transform_11, window_bounds = array<i64: 2, 32>}, {transform_indices = @transform_12, window_bounds = array<i64: 1, 8, 32>}]} {
    %c0_i32 = arith.constant 0 : i32
    %0 = arith.cmpi eq, %arg1, %c0_i32 : i32
    %1 = arith.extui %0 : i1 to i32
    %c0_i32_0 = arith.constant 0 : i32
    %2 = arith.cmpi ne, %1, %c0_i32_0 : i32
    scf.if %2 {
      %c0_65 = arith.constant 0 : index
      %c0_66 = arith.constant 0 : index
      %c0_67 = arith.constant 0 : index
      %180 = vector.load %arg2[%c0_65, %c0_66, %c0_67] : memref<1x8x32xf32, #tpu.memory_space<vmem>>, vector<1x8x32xf32>
      %181 = vector.shape_cast %180 : vector<1x8x32xf32> to vector<8x32xf32>
      %c0_68 = arith.constant 0 : index
      %c0_69 = arith.constant 0 : index
      %182 = vector.load %arg15[%c0_68, %c0_69] : memref<8x32xf32, #tpu.memory_space<vmem>>, vector<8x32xf32>
      tpu.vector_store %arg15[%c0_68, %c0_69], %181 {strides = array<i32>} : memref<8x32xf32, #tpu.memory_space<vmem>>, vector<8x32xf32>,
    } else {
    }
    %c0 = arith.constant 0 : index
    %c0_1 = arith.constant 0 : index
    %3 = vector.load %arg15[%c0, %c0_1] : memref<8x32xf32, #tpu.memory_space<vmem>>, vector<8x32xf32>
    %c0_2 = arith.constant 0 : index
    %c0_3 = arith.constant 0 : index
    %c0_4 = arith.constant 0 : index
    %4 = vector.load %arg3[%c0_2, %c0_3, %c0_4] : memref<1x1x8xf32, #tpu.memory_space<vmem>>, vector<1x1x8xf32>
    %5 = vector.shape_cast %4 : vector<1x1x8xf32> to vector<1x8xf32>
    %c0_5 = arith.constant 0 : index
    %c0_6 = arith.constant 0 : index
    %c0_7 = arith.constant 0 : index
    %6 = vector.load %arg4[%c0_5, %c0_6, %c0_7] : memref<1x6x32xf32, #tpu.memory_space<vmem>>, vector<1x6x32xf32>
    %7 = vector.shape_cast %6 : vector<1x6x32xf32> to vector<6x32xf32>
    %8 = vector.extract_strided_slice %7 {offsets = [0, 0], sizes = [1, 32], strides = [1, 1]} : vector<6x32xf32> to vector<1x32xf32>
    %9 = vector.extract_strided_slice %7 {offsets = [1, 0], sizes = [1, 32], strides = [1, 1]} : vector<6x32xf32> to vector<1x32xf32>
    %cst = arith.constant dense<0.000000e+00> : vector<8xf32>
    %10 = vector.multi_reduction <add>, %3, %cst [1] : vector<8x32xf32> to vector<8xf32>
    %11 = vector.shape_cast %10 : vector<8xf32> to vector<8x1xf32>
    %cst_8 = arith.constant 3.200000e+01 : f32
    %12 = vector.broadcast %cst_8 : f32 to vector<8x1xf32>
    %13 = arith.divf %11, %12 : vector<8x1xf32>
    %14 = vector.broadcast %13 : vector<8x1xf32> to vector<8x32xf32>
    %15 = arith.subf %3, %14 : vector<8x32xf32>
    %16 = arith.mulf %15, %15 : vector<8x32xf32>
    %cst_9 = arith.constant dense<0.000000e+00> : vector<8xf32>
    %17 = vector.multi_reduction <add>, %16, %cst_9 [1] : vector<8x32xf32> to vector<8xf32>
    %18 = vector.shape_cast %17 : vector<8xf32> to vector<8x1xf32>
    %cst_10 = arith.constant 0.0322580636 : f32
    %19 = vector.broadcast %cst_10 : f32 to vector<8x1xf32>
    %20 = arith.mulf %18, %19 : vector<8x1xf32>
    %21 = math.sqrt %20 : vector<8x1xf32>
    %22 = vector.broadcast %8 : vector<1x32xf32> to vector<8x32xf32>
    %23 = arith.mulf %22, %15 : vector<8x32xf32>
    %cst_11 = arith.constant 9.99999997E-7 : f32
    %24 = vector.broadcast %cst_11 : f32 to vector<8x1xf32>
    %25 = arith.addf %21, %24 : vector<8x1xf32>
    %26 = vector.broadcast %25 : vector<8x1xf32> to vector<8x32xf32>
    %27 = arith.divf %23, %26 : vector<8x32xf32>
    %28 = vector.broadcast %9 : vector<1x32xf32> to vector<8x32xf32>
    %29 = arith.addf %27, %28 : vector<8x32xf32>
    %c0_12 = arith.constant 0 : index
    %c0_13 = arith.constant 0 : index
    %c0_14 = arith.constant 0 : index
    %30 = vector.load %arg5[%c0_12, %c0_13, %c0_14] : memref<1x32x96xbf16, #tpu.memory_space<vmem>>, vector<1x32x96xbf16>
    %31 = vector.shape_cast %30 : vector<1x32x96xbf16> to vector<32x96xbf16>
    %c0_15 = arith.constant 0 : index
    %c0_16 = arith.constant 0 : index
    %c0_17 = arith.constant 0 : index
    %32 = vector.load %arg6[%c0_15, %c0_16, %c0_17] : memref<1x1x96xf32, #tpu.memory_space<vmem>>, vector<1x1x96xf32>
    %33 = vector.shape_cast %32 : vector<1x1x96xf32> to vector<1x96xf32>
    %c0_18 = arith.constant 0 : index
    %c0_19 = arith.constant 0 : index
    %c0_20 = arith.constant 0 : index
    %34 = vector.load %arg7[%c0_18, %c0_19, %c0_20] : memref<1x32x32xbf16, #tpu.memory_space<vmem>>, vector<1x32x32xbf16>
    %35 = vector.shape_cast %34 : vector<1x32x32xbf16> to vector<32x32xbf16>
    %c0_21 = arith.constant 0 : index
    %c0_22 = arith.constant 0 : index
    %c0_23 = arith.constant 0 : index
    %36 = vector.load %arg8[%c0_21, %c0_22, %c0_23] : memref<1x1x32xf32, #tpu.memory_space<vmem>>, vector<1x1x32xf32>
    %37 = vector.shape_cast %36 : vector<1x1x32xf32> to vector<1x32xf32>
    %38 = arith.truncf %29 : vector<8x32xf32> to vector<8x32xbf16>
    %cst_24 = arith.constant dense<0.000000e+00> : vector<8x96xf32>
    %39 = tpu.matmul %38, %31, %cst_24 {dimension_numbers = #tpu.dot_dimension_numbers<[1], [0], [0], [1], [0, 0, 1, 1], [], []>} : vector<8x32xbf16>, vector<32x96xbf16>, vector<8x96xf32> -> vector<8x96xf32>
    %40 = vector.broadcast %33 : vector<1x96xf32> to vector<8x96xf32>
    %41 = arith.addf %39, %40 : vector<8x96xf32>
    %42 = vector.extract_strided_slice %41 {offsets = [0, 0], sizes = [8, 32], strides = [1, 1]} : vector<8x96xf32> to vector<8x32xf32>
    %43 = vector.extract_strided_slice %41 {offsets = [0, 32], sizes = [8, 32], strides = [1, 1]} : vector<8x96xf32> to vector<8x32xf32>
    %44 = vector.extract_strided_slice %41 {offsets = [0, 64], sizes = [8, 32], strides = [1, 1]} : vector<8x96xf32> to vector<8x32xf32>
    %45 = vector.extract_strided_slice %42 {offsets = [0, 0], sizes = [8, 8], strides = [1, 1]} : vector<8x32xf32> to vector<8x8xf32>
    %46 = arith.truncf %45 : vector<8x8xf32> to vector<8x8xbf16>
    %47 = vector.extract_strided_slice %43 {offsets = [0, 0], sizes = [8, 8], strides = [1, 1]} : vector<8x32xf32> to vector<8x8xf32>
    %48 = arith.truncf %47 : vector<8x8xf32> to vector<8x8xbf16>
    %cst_25 = arith.constant dense<0.000000e+00> : vector<8x8xf32>
    %49 = tpu.matmul %46, %48, %cst_25 {dimension_numbers = #tpu.dot_dimension_numbers<[1], [1], [0], [0], [0, 0, 1, 0], [], []>} : vector<8x8xbf16>, vector<8x8xbf16>, vector<8x8xf32> -> vector<8x8xf32>
    %50 = vector.broadcast %5 : vector<1x8xf32> to vector<8x8xf32>
    %51 = arith.addf %49, %50 : vector<8x8xf32>
    %cst_26 = arith.constant dense<0xFF800000> : vector<8xf32>
    %52 = vector.multi_reduction <maximumf>, %51, %cst_26 [1] : vector<8x8xf32> to vector<8xf32>
    %53 = vector.shape_cast %52 : vector<8xf32> to vector<8x1xf32>
    %54 = vector.broadcast %53 : vector<8x1xf32> to vector<8x8xf32>
    %55 = arith.subf %51, %54 : vector<8x8xf32>
    %56 = math.exp %55 : vector<8x8xf32>
    %cst_27 = arith.constant dense<0.000000e+00> : vector<8xf32>
    %57 = vector.multi_reduction <add>, %56, %cst_27 [1] : vector<8x8xf32> to vector<8xf32>
    %58 = vector.shape_cast %57 : vector<8xf32> to vector<8x1xf32>
    %59 = tpu.reciprocal %58 {approx = true} : vector<8x1xf32> -> vector<8x1xf32>
    %60 = vector.broadcast %59 : vector<8x1xf32> to vector<8x8xf32>
    %61 = arith.mulf %56, %60 : vector<8x8xf32>
    %62 = arith.truncf %61 : vector<8x8xf32> to vector<8x8xbf16>
    %63 = vector.extract_strided_slice %44 {offsets = [0, 0], sizes = [8, 8], strides = [1, 1]} : vector<8x32xf32> to vector<8x8xf32>
    %64 = arith.truncf %63 : vector<8x8xf32> to vector<8x8xbf16>
    %cst_28 = arith.constant dense<0.000000e+00> : vector<8x8xf32>
    %65 = tpu.matmul %62, %64, %cst_28 {dimension_numbers = #tpu.dot_dimension_numbers<[1], [0], [0], [1], [0, 0, 1, 1], [], []>} : vector<8x8xbf16>, vector<8x8xbf16>, vector<8x8xf32> -> vector<8x8xf32>
    %66 = vector.extract_strided_slice %42 {offsets = [0, 8], sizes = [8, 8], strides = [1, 1]} : vector<8x32xf32> to vector<8x8xf32>
    %67 = arith.truncf %66 : vector<8x8xf32> to vector<8x8xbf16>
    %68 = vector.extract_strided_slice %43 {offsets = [0, 8], sizes = [8, 8], strides = [1, 1]} : vector<8x32xf32> to vector<8x8xf32>
    %69 = arith.truncf %68 : vector<8x8xf32> to vector<8x8xbf16>
    %cst_29 = arith.constant dense<0.000000e+00> : vector<8x8xf32>
    %70 = tpu.matmul %67, %69, %cst_29 {dimension_numbers = #tpu.dot_dimension_numbers<[1], [1], [0], [0], [0, 0, 1, 0], [], []>} : vector<8x8xbf16>, vector<8x8xbf16>, vector<8x8xf32> -> vector<8x8xf32>
    %71 = vector.broadcast %5 : vector<1x8xf32> to vector<8x8xf32>
    %72 = arith.addf %70, %71 : vector<8x8xf32>
    %cst_30 = arith.constant dense<0xFF800000> : vector<8xf32>
    %73 = vector.multi_reduction <maximumf>, %72, %cst_30 [1] : vector<8x8xf32> to vector<8xf32>
    %74 = vector.shape_cast %73 : vector<8xf32> to vector<8x1xf32>
    %75 = vector.broadcast %74 : vector<8x1xf32> to vector<8x8xf32>
    %76 = arith.subf %72, %75 : vector<8x8xf32>
    %77 = math.exp %76 : vector<8x8xf32>
    %cst_31 = arith.constant dense<0.000000e+00> : vector<8xf32>
    %78 = vector.multi_reduction <add>, %77, %cst_31 [1] : vector<8x8xf32> to vector<8xf32>
    %79 = vector.shape_cast %78 : vector<8xf32> to vector<8x1xf32>
    %80 = tpu.reciprocal %79 {approx = true} : vector<8x1xf32> -> vector<8x1xf32>
    %81 = vector.broadcast %80 : vector<8x1xf32> to vector<8x8xf32>
    %82 = arith.mulf %77, %81 : vector<8x8xf32>
    %83 = arith.truncf %82 : vector<8x8xf32> to vector<8x8xbf16>
    %84 = vector.extract_strided_slice %44 {offsets = [0, 8], sizes = [8, 8], strides = [1, 1]} : vector<8x32xf32> to vector<8x8xf32>
    %85 = arith.truncf %84 : vector<8x8xf32> to vector<8x8xbf16>
    %cst_32 = arith.constant dense<0.000000e+00> : vector<8x8xf32>
    %86 = tpu.matmul %83, %85, %cst_32 {dimension_numbers = #tpu.dot_dimension_numbers<[1], [0], [0], [1], [0, 0, 1, 1], [], []>} : vector<8x8xbf16>, vector<8x8xbf16>, vector<8x8xf32> -> vector<8x8xf32>
    %87 = vector.extract_strided_slice %42 {offsets = [0, 16], sizes = [8, 8], strides = [1, 1]} : vector<8x32xf32> to vector<8x8xf32>
    %88 = arith.truncf %87 : vector<8x8xf32> to vector<8x8xbf16>
    %89 = vector.extract_strided_slice %43 {offsets = [0, 16], sizes = [8, 8], strides = [1, 1]} : vector<8x32xf32> to vector<8x8xf32>
    %90 = arith.truncf %89 : vector<8x8xf32> to vector<8x8xbf16>
    %cst_33 = arith.constant dense<0.000000e+00> : vector<8x8xf32>
    %91 = tpu.matmul %88, %90, %cst_33 {dimension_numbers = #tpu.dot_dimension_numbers<[1], [1], [0], [0], [0, 0, 1, 0], [], []>} : vector<8x8xbf16>, vector<8x8xbf16>, vector<8x8xf32> -> vector<8x8xf32>
    %92 = vector.broadcast %5 : vector<1x8xf32> to vector<8x8xf32>
    %93 = arith.addf %91, %92 : vector<8x8xf32>
    %cst_34 = arith.constant dense<0xFF800000> : vector<8xf32>
    %94 = vector.multi_reduction <maximumf>, %93, %cst_34 [1] : vector<8x8xf32> to vector<8xf32>
    %95 = vector.shape_cast %94 : vector<8xf32> to vector<8x1xf32>
    %96 = vector.broadcast %95 : vector<8x1xf32> to vector<8x8xf32>
    %97 = arith.subf %93, %96 : vector<8x8xf32>
    %98 = math.exp %97 : vector<8x8xf32>
    %cst_35 = arith.constant dense<0.000000e+00> : vector<8xf32>
    %99 = vector.multi_reduction <add>, %98, %cst_35 [1] : vector<8x8xf32> to vector<8xf32>
    %100 = vector.shape_cast %99 : vector<8xf32> to vector<8x1xf32>
    %101 = tpu.reciprocal %100 {approx = true} : vector<8x1xf32> -> vector<8x1xf32>
    %102 = vector.broadcast %101 : vector<8x1xf32> to vector<8x8xf32>
    %103 = arith.mulf %98, %102 : vector<8x8xf32>
    %104 = arith.truncf %103 : vector<8x8xf32> to vector<8x8xbf16>
    %105 = vector.extract_strided_slice %44 {offsets = [0, 16], sizes = [8, 8], strides = [1, 1]} : vector<8x32xf32> to vector<8x8xf32>
    %106 = arith.truncf %105 : vector<8x8xf32> to vector<8x8xbf16>
    %cst_36 = arith.constant dense<0.000000e+00> : vector<8x8xf32>
    %107 = tpu.matmul %104, %106, %cst_36 {dimension_numbers = #tpu.dot_dimension_numbers<[1], [0], [0], [1], [0, 0, 1, 1], [], []>} : vector<8x8xbf16>, vector<8x8xbf16>, vector<8x8xf32> -> vector<8x8xf32>
    %108 = vector.extract_strided_slice %42 {offsets = [0, 24], sizes = [8, 8], strides = [1, 1]} : vector<8x32xf32> to vector<8x8xf32>
    %109 = arith.truncf %108 : vector<8x8xf32> to vector<8x8xbf16>
    %110 = vector.extract_strided_slice %43 {offsets = [0, 24], sizes = [8, 8], strides = [1, 1]} : vector<8x32xf32> to vector<8x8xf32>
    %111 = arith.truncf %110 : vector<8x8xf32> to vector<8x8xbf16>
    %cst_37 = arith.constant dense<0.000000e+00> : vector<8x8xf32>
    %112 = tpu.matmul %109, %111, %cst_37 {dimension_numbers = #tpu.dot_dimension_numbers<[1], [1], [0], [0], [0, 0, 1, 0], [], []>} : vector<8x8xbf16>, vector<8x8xbf16>, vector<8x8xf32> -> vector<8x8xf32>
    %113 = vector.broadcast %5 : vector<1x8xf32> to vector<8x8xf32>
    %114 = arith.addf %112, %113 : vector<8x8xf32>
    %cst_38 = arith.constant dense<0xFF800000> : vector<8xf32>
    %115 = vector.multi_reduction <maximumf>, %114, %cst_38 [1] : vector<8x8xf32> to vector<8xf32>
    %116 = vector.shape_cast %115 : vector<8xf32> to vector<8x1xf32>
    %117 = vector.broadcast %116 : vector<8x1xf32> to vector<8x8xf32>
    %118 = arith.subf %114, %117 : vector<8x8xf32>
    %119 = math.exp %118 : vector<8x8xf32>
    %cst_39 = arith.constant dense<0.000000e+00> : vector<8xf32>
    %120 = vector.multi_reduction <add>, %119, %cst_39 [1] : vector<8x8xf32> to vector<8xf32>
    %121 = vector.shape_cast %120 : vector<8xf32> to vector<8x1xf32>
    %122 = tpu.reciprocal %121 {approx = true} : vector<8x1xf32> -> vector<8x1xf32>
    %123 = vector.broadcast %122 : vector<8x1xf32> to vector<8x8xf32>
    %124 = arith.mulf %119, %123 : vector<8x8xf32>
    %125 = arith.truncf %124 : vector<8x8xf32> to vector<8x8xbf16>
    %126 = vector.extract_strided_slice %44 {offsets = [0, 24], sizes = [8, 8], strides = [1, 1]} : vector<8x32xf32> to vector<8x8xf32>
    %127 = arith.truncf %126 : vector<8x8xf32> to vector<8x8xbf16>
    %cst_40 = arith.constant dense<0.000000e+00> : vector<8x8xf32>
    %128 = tpu.matmul %125, %127, %cst_40 {dimension_numbers = #tpu.dot_dimension_numbers<[1], [0], [0], [1], [0, 0, 1, 1], [], []>} : vector<8x8xbf16>, vector<8x8xbf16>, vector<8x8xf32> -> vector<8x8xf32>
    %129 = tpu.concatenate %65, %86, %107, %128 in 1 : vector<8x8xf32>, vector<8x8xf32>, vector<8x8xf32>, vector<8x8xf32> -> vector<8x32xf32>
    %130 = arith.truncf %129 : vector<8x32xf32> to vector<8x32xbf16>
    %cst_41 = arith.constant dense<0.000000e+00> : vector<8x32xf32>
    %131 = tpu.matmul %130, %35, %cst_41 {dimension_numbers = #tpu.dot_dimension_numbers<[1], [0], [0], [1], [0, 0, 1, 1], [], []>} : vector<8x32xbf16>, vector<32x32xbf16>, vector<8x32xf32> -> vector<8x32xf32>
    %132 = vector.broadcast %37 : vector<1x32xf32> to vector<8x32xf32>
    %133 = arith.addf %131, %132 : vector<8x32xf32>
    %134 = arith.addf %3, %133 : vector<8x32xf32>
    %135 = vector.extract_strided_slice %7 {offsets = [2, 0], sizes = [1, 32], strides = [1, 1]} : vector<6x32xf32> to vector<1x32xf32>
    %136 = vector.extract_strided_slice %7 {offsets = [3, 0], sizes = [1, 32], strides = [1, 1]} : vector<6x32xf32> to vector<1x32xf32>
    %cst_42 = arith.constant dense<0.000000e+00> : vector<8xf32>
    %137 = vector.multi_reduction <add>, %134, %cst_42 [1] : vector<8x32xf32> to vector<8xf32>
    %138 = vector.shape_cast %137 : vector<8xf32> to vector<8x1xf32>
    %cst_43 = arith.constant 3.200000e+01 : f32
    %139 = vector.broadcast %cst_43 : f32 to vector<8x1xf32>
    %140 = arith.divf %138, %139 : vector<8x1xf32>
    %141 = vector.broadcast %140 : vector<8x1xf32> to vector<8x32xf32>
    %142 = arith.subf %134, %141 : vector<8x32xf32>
    %143 = arith.mulf %142, %142 : vector<8x32xf32>
    %cst_44 = arith.constant dense<0.000000e+00> : vector<8xf32>
    %144 = vector.multi_reduction <add>, %143, %cst_44 [1] : vector<8x32xf32> to vector<8xf32>
    %145 = vector.shape_cast %144 : vector<8xf32> to vector<8x1xf32>
    %cst_45 = arith.constant 0.0322580636 : f32
    %146 = vector.broadcast %cst_45 : f32 to vector<8x1xf32>
    %147 = arith.mulf %145, %146 : vector<8x1xf32>
    %148 = math.sqrt %147 : vector<8x1xf32>
    %149 = vector.broadcast %135 : vector<1x32xf32> to vector<8x32xf32>
    %150 = arith.mulf %149, %142 : vector<8x32xf32>
    %cst_46 = arith.constant 9.99999997E-7 : f32
    %151 = vector.broadcast %cst_46 : f32 to vector<8x1xf32>
    %152 = arith.addf %148, %151 : vector<8x1xf32>
    %153 = vector.broadcast %152 : vector<8x1xf32> to vector<8x32xf32>
    %154 = arith.divf %150, %153 : vector<8x32xf32>
    %155 = vector.broadcast %136 : vector<1x32xf32> to vector<8x32xf32>
    %156 = arith.addf %154, %155 : vector<8x32xf32>
    %c0_47 = arith.constant 0 : index
    %c0_48 = arith.constant 0 : index
    %c0_49 = arith.constant 0 : index
    %157 = vector.load %arg9[%c0_47, %c0_48, %c0_49] : memref<1x32x64xbf16, #tpu.memory_space<vmem>>, vector<1x32x64xbf16>
    %158 = vector.shape_cast %157 : vector<1x32x64xbf16> to vector<32x64xbf16>
    %c0_50 = arith.constant 0 : index
    %c0_51 = arith.constant 0 : index
    %c0_52 = arith.constant 0 : index
    %159 = vector.load %arg10[%c0_50, %c0_51, %c0_52] : memref<1x1x64xf32, #tpu.memory_space<vmem>>, vector<1x1x64xf32>
    %160 = vector.shape_cast %159 : vector<1x1x64xf32> to vector<1x64xf32>
    %c0_53 = arith.constant 0 : index
    %c0_54 = arith.constant 0 : index
    %c0_55 = arith.constant 0 : index
    %161 = vector.load %arg11[%c0_53, %c0_54, %c0_55] : memref<1x64x32xbf16, #tpu.memory_space<vmem>>, vector<1x64x32xbf16>
    %162 = vector.shape_cast %161 : vector<1x64x32xbf16> to vector<64x32xbf16>
    %c0_56 = arith.constant 0 : index
    %c0_57 = arith.constant 0 : index
    %c0_58 = arith.constant 0 : index
    %163 = vector.load %arg12[%c0_56, %c0_57, %c0_58] : memref<1x1x32xf32, #tpu.memory_space<vmem>>, vector<1x1x32xf32>
    %164 = vector.shape_cast %163 : vector<1x1x32xf32> to vector<1x32xf32>
    %165 = arith.truncf %156 : vector<8x32xf32> to vector<8x32xbf16>
    %cst_59 = arith.constant dense<0.000000e+00> : vector<8x64xf32>
    %166 = tpu.matmul %165, %158, %cst_59 {dimension_numbers = #tpu.dot_dimension_numbers<[1], [0], [0], [1], [0, 0, 1, 1], [], []>} : vector<8x32xbf16>, vector<32x64xbf16>, vector<8x64xf32> -> vector<8x64xf32>
    %167 = vector.broadcast %160 : vector<1x64xf32> to vector<8x64xf32>
    %168 = arith.addf %166, %167 : vector<8x64xf32>
    %cst_60 = arith.constant 0.000000e+00 : f32
    %169 = vector.broadcast %cst_60 : f32 to vector<8x64xf32>
    %170 = arith.maximumf %168, %169 : vector<8x64xf32>
    %171 = arith.truncf %170 : vector<8x64xf32> to vector<8x64xbf16>
    %cst_61 = arith.constant dense<0.000000e+00> : vector<8x32xf32>
    %172 = tpu.matmul %171, %162, %cst_61 {dimension_numbers = #tpu.dot_dimension_numbers<[1], [0], [0], [1], [0, 0, 1, 1], [], []>} : vector<8x64xbf16>, vector<64x32xbf16>, vector<8x32xf32> -> vector<8x32xf32>
    %173 = vector.broadcast %164 : vector<1x32xf32> to vector<8x32xf32>
    %174 = arith.addf %172, %173 : vector<8x32xf32>
    %175 = arith.addf %134, %174 : vector<8x32xf32>
    %c0_62 = arith.constant 0 : index
    %c0_63 = arith.constant 0 : index
    %176 = vector.load %arg15[%c0_62, %c0_63] : memref<8x32xf32, #tpu.memory_space<vmem>>, vector<8x32xf32>
    tpu.vector_store %arg15[%c0_62, %c0_63], %175 {strides = array<i32>} : memref<8x32xf32, #tpu.memory_space<vmem>>, vector<8x32xf32>,
    %c1_i32 = arith.constant 1 : i32
    %177 = arith.cmpi eq, %arg1, %c1_i32 : i32
    %178 = arith.extui %177 : i1 to i32
    %c0_i32_64 = arith.constant 0 : i32
    %179 = arith.cmpi ne, %178, %c0_i32_64 : i32
    scf.if %179 {
      %c0_65 = arith.constant 0 : index
      %c0_66 = arith.constant 0 : index
      %180 = vector.load %arg13[%c0_65, %c0_66] : memref<2x32xf32, #tpu.memory_space<vmem>>, vector<2x32xf32>
      %181 = vector.extract_strided_slice %180 {offsets = [0, 0], sizes = [1, 32], strides = [1, 1]} : vector<2x32xf32> to vector<1x32xf32>
      %182 = vector.extract_strided_slice %180 {offsets = [1, 0], sizes = [1, 32], strides = [1, 1]} : vector<2x32xf32> to vector<1x32xf32>
      %cst_67 = arith.constant dense<0.000000e+00> : vector<8xf32>
      %183 = vector.multi_reduction <add>, %175, %cst_67 [1] : vector<8x32xf32> to vector<8xf32>
      %184 = vector.shape_cast %183 : vector<8xf32> to vector<8x1xf32>
      %cst_68 = arith.constant 3.200000e+01 : f32
      %185 = vector.broadcast %cst_68 : f32 to vector<8x1xf32>
      %186 = arith.divf %184, %185 : vector<8x1xf32>
      %187 = vector.broadcast %186 : vector<8x1xf32> to vector<8x32xf32>
      %188 = arith.subf %175, %187 : vector<8x32xf32>
      %189 = arith.mulf %188, %188 : vector<8x32xf32>
      %cst_69 = arith.constant dense<0.000000e+00> : vector<8xf32>
      %190 = vector.multi_reduction <add>, %189, %cst_69 [1] : vector<8x32xf32> to vector<8xf32>
      %191 = vector.shape_cast %190 : vector<8xf32> to vector<8x1xf32>
      %cst_70 = arith.constant 0.0322580636 : f32
      %192 = vector.broadcast %cst_70 : f32 to vector<8x1xf32>
      %193 = arith.mulf %191, %192 : vector<8x1xf32>
      %194 = math.sqrt %193 : vector<8x1xf32>
      %195 = vector.broadcast %181 : vector<1x32xf32> to vector<8x32xf32>
      %196 = arith.mulf %195, %188 : vector<8x32xf32>
      %cst_71 = arith.constant 9.99999997E-7 : f32
      %197 = vector.broadcast %cst_71 : f32 to vector<8x1xf32>
      %198 = arith.addf %194, %197 : vector<8x1xf32>
      %199 = vector.broadcast %198 : vector<8x1xf32> to vector<8x32xf32>
      %200 = arith.divf %196, %199 : vector<8x32xf32>
      %201 = vector.broadcast %182 : vector<1x32xf32> to vector<8x32xf32>
      %202 = arith.addf %200, %201 : vector<8x32xf32>
      %c0_72 = arith.constant 0 : index
      %c0_73 = arith.constant 0 : index
      %c0_74 = arith.constant 0 : index
      %203 = vector.load %arg14[%c0_72, %c0_73, %c0_74] : memref<1x8x32xf32, #tpu.memory_space<vmem>>, vector<1x8x32xf32>
      %204 = vector.shape_cast %203 : vector<1x8x32xf32> to vector<8x32xf32>
      %205 = vector.shape_cast %202 : vector<8x32xf32> to vector<1x8x32xf32>
      tpu.vector_store %arg14[%c0_72, %c0_73, %c0_74], %205 {strides = array<i32>} : memref<1x8x32xf32, #tpu.memory_space<vmem>>, vector<1x8x32xf32>,
    } else {
    }
    return
  }
  func.func @transform_0(%arg0: i32, %arg1: i32) -> (i32, i32, i32) {
    %c0_i32 = arith.constant 0 : i32
    %c0_i32_0 = arith.constant 0 : i32
    %c0_i32_1 = arith.constant 0 : i32
    return %arg0, %c0_i32, %c0_i32_0 : i32, i32, i32
  }
  func.func @transform_1(%arg0: i32, %arg1: i32) -> (i32, i32, i32) {
    %c0_i32 = arith.constant 0 : i32
    %c0_i32_0 = arith.constant 0 : i32
    %c0_i32_1 = arith.constant 0 : i32
    return %arg0, %c0_i32, %c0_i32_0 : i32, i32, i32
  }
  func.func @transform_2(%arg0: i32, %arg1: i32) -> (i32, i32, i32) {
    %c0_i32 = arith.constant 0 : i32
    %c0_i32_0 = arith.constant 0 : i32
    %c0_i32_1 = arith.constant 0 : i32
    return %arg1, %c0_i32, %c0_i32_0 : i32, i32, i32
  }
  func.func @transform_3(%arg0: i32, %arg1: i32) -> (i32, i32, i32) {
    %c0_i32 = arith.constant 0 : i32
    %c0_i32_0 = arith.constant 0 : i32
    %c0_i32_1 = arith.constant 0 : i32
    return %arg1, %c0_i32, %c0_i32_0 : i32, i32, i32
  }
  func.func @transform_4(%arg0: i32, %arg1: i32) -> (i32, i32, i32) {
    %c0_i32 = arith.constant 0 : i32
    %c0_i32_0 = arith.constant 0 : i32
    %c0_i32_1 = arith.constant 0 : i32
    return %arg1, %c0_i32, %c0_i32_0 : i32, i32, i32
  }
  func.func @transform_5(%arg0: i32, %arg1: i32) -> (i32, i32, i32) {
    %c0_i32 = arith.constant 0 : i32
    %c0_i32_0 = arith.constant 0 : i32
    %c0_i32_1 = arith.constant 0 : i32
    return %arg1, %c0_i32, %c0_i32_0 : i32, i32, i32
  }
  func.func @transform_6(%arg0: i32, %arg1: i32) -> (i32, i32, i32) {
    %c0_i32 = arith.constant 0 : i32
    %c0_i32_0 = arith.constant 0 : i32
    %c0_i32_1 = arith.constant 0 : i32
    return %arg1, %c0_i32, %c0_i32_0 : i32, i32, i32
  }
  func.func @transform_7(%arg0: i32, %arg1: i32) -> (i32, i32, i32) {
    %c0_i32 = arith.constant 0 : i32
    %c0_i32_0 = arith.constant 0 : i32
    %c0_i32_1 = arith.constant 0 : i32
    return %arg1, %c0_i32, %c0_i32_0 : i32, i32, i32
  }
  func.func @transform_8(%arg0: i32, %arg1: i32) -> (i32, i32, i32) {
    %c0_i32 = arith.constant 0 : i32
    %c0_i32_0 = arith.constant 0 : i32
    %c0_i32_1 = arith.constant 0 : i32
    return %arg1, %c0_i32, %c0_i32_0 : i32, i32, i32
  }
  func.func @transform_9(%arg0: i32, %arg1: i32) -> (i32, i32, i32) {
    %c0_i32 = arith.constant 0 : i32
    %c0_i32_0 = arith.constant 0 : i32
    %c0_i32_1 = arith.constant 0 : i32
    return %arg1, %c0_i32, %c0_i32_0 : i32, i32, i32
  }
  func.func @transform_10(%arg0: i32, %arg1: i32) -> (i32, i32, i32) {
    %c0_i32 = arith.constant 0 : i32
    %c0_i32_0 = arith.constant 0 : i32
    %c0_i32_1 = arith.constant 0 : i32
    return %arg1, %c0_i32, %c0_i32_0 : i32, i32, i32
  }
  func.func @transform_11(%arg0: i32, %arg1: i32) -> (i32, i32) {
    %c0_i32 = arith.constant 0 : i32
    %c0_i32_0 = arith.constant 0 : i32
    %c0_i32_1 = arith.constant 0 : i32
    return %c0_i32, %c0_i32_0 : i32, i32
  }
  func.func @transform_12(%arg0: i32, %arg1: i32) -> (i32, i32, i32) {
    %c0_i32 = arith.constant 0 : i32
    %c0_i32_0 = arith.constant 0 : i32
    %c0_i32_1 = arith.constant 0 : i32
    return %arg0, %c0_i32, %c0_i32_0 : i32, i32, i32
  }
}

module attributes {stable_mosaic.version = 11 : i64} {
  func.func @_cross_stack_kernel(%arg0: i32, %arg1: i32, %arg2: memref<1x8x32xf32, #tpu.memory_space<vmem>>, %arg3: memref<1x8x32xf32, #tpu.memory_space<vmem>>, %arg4: memref<1x8x8xf32, #tpu.memory_space<vmem>>, %arg5: memref<1x1x8xf32, #tpu.memory_space<vmem>>, %arg6: memref<1x6x32xf32, #tpu.memory_space<vmem>>, %arg7: memref<1x32x96xbf16, #tpu.memory_space<vmem>>, %arg8: memref<1x1x96xf32, #tpu.memory_space<vmem>>, %arg9: memref<1x32x32xbf16, #tpu.memory_space<vmem>>, %arg10: memref<1x1x32xf32, #tpu.memory_space<vmem>>, %arg11: memref<1x32x32xbf16, #tpu.memory_space<vmem>>, %arg12: memref<1x1x32xf32, #tpu.memory_space<vmem>>, %arg13: memref<1x32x64xbf16, #tpu.memory_space<vmem>>, %arg14: memref<1x1x64xf32, #tpu.memory_space<vmem>>, %arg15: memref<1x32x32xbf16, #tpu.memory_space<vmem>>, %arg16: memref<1x1x32xf32, #tpu.memory_space<vmem>>, %arg17: memref<1x32x64xbf16, #tpu.memory_space<vmem>>, %arg18: memref<1x1x64xf32, #tpu.memory_space<vmem>>, %arg19: memref<1x64x32xbf16, #tpu.memory_space<vmem>>, %arg20: memref<1x1x32xf32, #tpu.memory_space<vmem>>, %arg21: memref<2x32xf32, #tpu.memory_space<vmem>>, %arg22: memref<32x128xbf16, #tpu.memory_space<vmem>>, %arg23: memref<1x128xf32, #tpu.memory_space<vmem>>, %arg24: memref<1x8x128xf32, #tpu.memory_space<vmem>>, %arg25: memref<8x32xf32, #tpu.memory_space<vmem>>) attributes {dimension_semantics = [#tpu.dimension_semantics<parallel>, #tpu.dimension_semantics<arbitrary>], iteration_bounds = array<i64: 2, 2>, scalar_prefetch = 0 : i64, scratch_operands = 1 : i64, tpu.core_type = #tpu.core_type<tc>, window_params = [{transform_indices = @transform_0, window_bounds = array<i64: 1, 8, 32>}, {transform_indices = @transform_1, window_bounds = array<i64: 1, 8, 32>}, {transform_indices = @transform_2, window_bounds = array<i64: 1, 8, 8>}, {transform_indices = @transform_3, window_bounds = array<i64: 1, 1, 8>}, {transform_indices = @transform_4, window_bounds = array<i64: 1, 6, 32>}, {transform_indices = @transform_5, window_bounds = array<i64: 1, 32, 96>}, {transform_indices = @transform_6, window_bounds = array<i64: 1, 1, 96>}, {transform_indices = @transform_7, window_bounds = array<i64: 1, 32, 32>}, {transform_indices = @transform_8, window_bounds = array<i64: 1, 1, 32>}, {transform_indices = @transform_9, window_bounds = array<i64: 1, 32, 32>}, {transform_indices = @transform_10, window_bounds = array<i64: 1, 1, 32>}, {transform_indices = @transform_11, window_bounds = array<i64: 1, 32, 64>}, {transform_indices = @transform_12, window_bounds = array<i64: 1, 1, 64>}, {transform_indices = @transform_13, window_bounds = array<i64: 1, 32, 32>}, {transform_indices = @transform_14, window_bounds = array<i64: 1, 1, 32>}, {transform_indices = @transform_15, window_bounds = array<i64: 1, 32, 64>}, {transform_indices = @transform_16, window_bounds = array<i64: 1, 1, 64>}, {transform_indices = @transform_17, window_bounds = array<i64: 1, 64, 32>}, {transform_indices = @transform_18, window_bounds = array<i64: 1, 1, 32>}, {pipeline_mode = #tpu.pipeline_mode<synchronous>, transform_indices = @transform_19, window_bounds = array<i64: 2, 32>}, {pipeline_mode = #tpu.pipeline_mode<synchronous>, transform_indices = @transform_20, window_bounds = array<i64: 32, 128>}, {pipeline_mode = #tpu.pipeline_mode<synchronous>, transform_indices = @transform_21, window_bounds = array<i64: 1, 128>}, {transform_indices = @transform_22, window_bounds = array<i64: 1, 8, 128>}]} {
    %c0_i32 = arith.constant 0 : i32
    %0 = arith.cmpi eq, %arg1, %c0_i32 : i32
    %1 = arith.extui %0 : i1 to i32
    %c0_i32_0 = arith.constant 0 : i32
    %2 = arith.cmpi ne, %1, %c0_i32_0 : i32
    scf.if %2 {
      %c0_113 = arith.constant 0 : index
      %c0_114 = arith.constant 0 : index
      %c0_115 = arith.constant 0 : index
      %314 = vector.load %arg2[%c0_113, %c0_114, %c0_115] : memref<1x8x32xf32, #tpu.memory_space<vmem>>, vector<1x8x32xf32>
      %315 = vector.shape_cast %314 : vector<1x8x32xf32> to vector<8x32xf32>
      %c0_116 = arith.constant 0 : index
      %c0_117 = arith.constant 0 : index
      %316 = vector.load %arg25[%c0_116, %c0_117] : memref<8x32xf32, #tpu.memory_space<vmem>>, vector<8x32xf32>
      tpu.vector_store %arg25[%c0_116, %c0_117], %315 {strides = array<i32>} : memref<8x32xf32, #tpu.memory_space<vmem>>, vector<8x32xf32>,
    } else {
    }
    %c0 = arith.constant 0 : index
    %c0_1 = arith.constant 0 : index
    %3 = vector.load %arg25[%c0, %c0_1] : memref<8x32xf32, #tpu.memory_space<vmem>>, vector<8x32xf32>
    %c0_2 = arith.constant 0 : index
    %c0_3 = arith.constant 0 : index
    %c0_4 = arith.constant 0 : index
    %4 = vector.load %arg3[%c0_2, %c0_3, %c0_4] : memref<1x8x32xf32, #tpu.memory_space<vmem>>, vector<1x8x32xf32>
    %5 = vector.shape_cast %4 : vector<1x8x32xf32> to vector<8x32xf32>
    %c0_5 = arith.constant 0 : index
    %c0_6 = arith.constant 0 : index
    %c0_7 = arith.constant 0 : index
    %6 = vector.load %arg4[%c0_5, %c0_6, %c0_7] : memref<1x8x8xf32, #tpu.memory_space<vmem>>, vector<1x8x8xf32>
    %7 = vector.shape_cast %6 : vector<1x8x8xf32> to vector<8x8xf32>
    %c0_8 = arith.constant 0 : index
    %c0_9 = arith.constant 0 : index
    %c0_10 = arith.constant 0 : index
    %8 = vector.load %arg5[%c0_8, %c0_9, %c0_10] : memref<1x1x8xf32, #tpu.memory_space<vmem>>, vector<1x1x8xf32>
    %9 = vector.shape_cast %8 : vector<1x1x8xf32> to vector<1x8xf32>
    %c0_11 = arith.constant 0 : index
    %c0_12 = arith.constant 0 : index
    %c0_13 = arith.constant 0 : index
    %10 = vector.load %arg6[%c0_11, %c0_12, %c0_13] : memref<1x6x32xf32, #tpu.memory_space<vmem>>, vector<1x6x32xf32>
    %11 = vector.shape_cast %10 : vector<1x6x32xf32> to vector<6x32xf32>
    %12 = vector.extract_strided_slice %11 {offsets = [0, 0], sizes = [1, 32], strides = [1, 1]} : vector<6x32xf32> to vector<1x32xf32>
    %13 = vector.extract_strided_slice %11 {offsets = [1, 0], sizes = [1, 32], strides = [1, 1]} : vector<6x32xf32> to vector<1x32xf32>
    %cst = arith.constant dense<0.000000e+00> : vector<8xf32>
    %14 = vector.multi_reduction <add>, %3, %cst [1] : vector<8x32xf32> to vector<8xf32>
    %15 = vector.shape_cast %14 : vector<8xf32> to vector<8x1xf32>
    %cst_14 = arith.constant 3.200000e+01 : f32
    %16 = vector.broadcast %cst_14 : f32 to vector<8x1xf32>
    %17 = arith.divf %15, %16 : vector<8x1xf32>
    %18 = vector.broadcast %17 : vector<8x1xf32> to vector<8x32xf32>
    %19 = arith.subf %3, %18 : vector<8x32xf32>
    %20 = arith.mulf %19, %19 : vector<8x32xf32>
    %cst_15 = arith.constant dense<0.000000e+00> : vector<8xf32>
    %21 = vector.multi_reduction <add>, %20, %cst_15 [1] : vector<8x32xf32> to vector<8xf32>
    %22 = vector.shape_cast %21 : vector<8xf32> to vector<8x1xf32>
    %cst_16 = arith.constant 0.0322580636 : f32
    %23 = vector.broadcast %cst_16 : f32 to vector<8x1xf32>
    %24 = arith.mulf %22, %23 : vector<8x1xf32>
    %25 = math.sqrt %24 : vector<8x1xf32>
    %26 = vector.broadcast %12 : vector<1x32xf32> to vector<8x32xf32>
    %27 = arith.mulf %26, %19 : vector<8x32xf32>
    %cst_17 = arith.constant 9.99999997E-7 : f32
    %28 = vector.broadcast %cst_17 : f32 to vector<8x1xf32>
    %29 = arith.addf %25, %28 : vector<8x1xf32>
    %30 = vector.broadcast %29 : vector<8x1xf32> to vector<8x32xf32>
    %31 = arith.divf %27, %30 : vector<8x32xf32>
    %32 = vector.broadcast %13 : vector<1x32xf32> to vector<8x32xf32>
    %33 = arith.addf %31, %32 : vector<8x32xf32>
    %c0_18 = arith.constant 0 : index
    %c0_19 = arith.constant 0 : index
    %c0_20 = arith.constant 0 : index
    %34 = vector.load %arg7[%c0_18, %c0_19, %c0_20] : memref<1x32x96xbf16, #tpu.memory_space<vmem>>, vector<1x32x96xbf16>
    %35 = vector.shape_cast %34 : vector<1x32x96xbf16> to vector<32x96xbf16>
    %c0_21 = arith.constant 0 : index
    %c0_22 = arith.constant 0 : index
    %c0_23 = arith.constant 0 : index
    %36 = vector.load %arg8[%c0_21, %c0_22, %c0_23] : memref<1x1x96xf32, #tpu.memory_space<vmem>>, vector<1x1x96xf32>
    %37 = vector.shape_cast %36 : vector<1x1x96xf32> to vector<1x96xf32>
    %c0_24 = arith.constant 0 : index
    %c0_25 = arith.constant 0 : index
    %c0_26 = arith.constant 0 : index
    %38 = vector.load %arg9[%c0_24, %c0_25, %c0_26] : memref<1x32x32xbf16, #tpu.memory_space<vmem>>, vector<1x32x32xbf16>
    %39 = vector.shape_cast %38 : vector<1x32x32xbf16> to vector<32x32xbf16>
    %c0_27 = arith.constant 0 : index
    %c0_28 = arith.constant 0 : index
    %c0_29 = arith.constant 0 : index
    %40 = vector.load %arg10[%c0_27, %c0_28, %c0_29] : memref<1x1x32xf32, #tpu.memory_space<vmem>>, vector<1x1x32xf32>
    %41 = vector.shape_cast %40 : vector<1x1x32xf32> to vector<1x32xf32>
    %42 = arith.truncf %33 : vector<8x32xf32> to vector<8x32xbf16>
    %cst_30 = arith.constant dense<0.000000e+00> : vector<8x96xf32>
    %43 = tpu.matmul %42, %35, %cst_30 {dimension_numbers = #tpu.dot_dimension_numbers<[1], [0], [0], [1], [0, 0, 1, 1], [], []>} : vector<8x32xbf16>, vector<32x96xbf16>, vector<8x96xf32> -> vector<8x96xf32>
    %44 = vector.broadcast %37 : vector<1x96xf32> to vector<8x96xf32>
    %45 = arith.addf %43, %44 : vector<8x96xf32>
    %46 = vector.extract_strided_slice %45 {offsets = [0, 0], sizes = [8, 32], strides = [1, 1]} : vector<8x96xf32> to vector<8x32xf32>
    %47 = vector.extract_strided_slice %45 {offsets = [0, 32], sizes = [8, 32], strides = [1, 1]} : vector<8x96xf32> to vector<8x32xf32>
    %48 = vector.extract_strided_slice %45 {offsets = [0, 64], sizes = [8, 32], strides = [1, 1]} : vector<8x96xf32> to vector<8x32xf32>
    %49 = vector.extract_strided_slice %46 {offsets = [0, 0], sizes = [8, 8], strides = [1, 1]} : vector<8x32xf32> to vector<8x8xf32>
    %50 = arith.truncf %49 : vector<8x8xf32> to vector<8x8xbf16>
    %51 = vector.extract_strided_slice %47 {offsets = [0, 0], sizes = [8, 8], strides = [1, 1]} : vector<8x32xf32> to vector<8x8xf32>
    %52 = arith.truncf %51 : vector<8x8xf32> to vector<8x8xbf16>
    %cst_31 = arith.constant dense<0.000000e+00> : vector<8x8xf32>
    %53 = tpu.matmul %50, %52, %cst_31 {dimension_numbers = #tpu.dot_dimension_numbers<[1], [1], [0], [0], [0, 0, 1, 0], [], []>} : vector<8x8xbf16>, vector<8x8xbf16>, vector<8x8xf32> -> vector<8x8xf32>
    %54 = arith.addf %53, %7 : vector<8x8xf32>
    %cst_32 = arith.constant dense<0xFF800000> : vector<8xf32>
    %55 = vector.multi_reduction <maximumf>, %54, %cst_32 [1] : vector<8x8xf32> to vector<8xf32>
    %56 = vector.shape_cast %55 : vector<8xf32> to vector<8x1xf32>
    %57 = vector.broadcast %56 : vector<8x1xf32> to vector<8x8xf32>
    %58 = arith.subf %54, %57 : vector<8x8xf32>
    %59 = math.exp %58 : vector<8x8xf32>
    %cst_33 = arith.constant dense<0.000000e+00> : vector<8xf32>
    %60 = vector.multi_reduction <add>, %59, %cst_33 [1] : vector<8x8xf32> to vector<8xf32>
    %61 = vector.shape_cast %60 : vector<8xf32> to vector<8x1xf32>
    %62 = tpu.reciprocal %61 {approx = true} : vector<8x1xf32> -> vector<8x1xf32>
    %63 = vector.broadcast %62 : vector<8x1xf32> to vector<8x8xf32>
    %64 = arith.mulf %59, %63 : vector<8x8xf32>
    %65 = arith.truncf %64 : vector<8x8xf32> to vector<8x8xbf16>
    %66 = vector.extract_strided_slice %48 {offsets = [0, 0], sizes = [8, 8], strides = [1, 1]} : vector<8x32xf32> to vector<8x8xf32>
    %67 = arith.truncf %66 : vector<8x8xf32> to vector<8x8xbf16>
    %cst_34 = arith.constant dense<0.000000e+00> : vector<8x8xf32>
    %68 = tpu.matmul %65, %67, %cst_34 {dimension_numbers = #tpu.dot_dimension_numbers<[1], [0], [0], [1], [0, 0, 1, 1], [], []>} : vector<8x8xbf16>, vector<8x8xbf16>, vector<8x8xf32> -> vector<8x8xf32>
    %69 = vector.extract_strided_slice %46 {offsets = [0, 8], sizes = [8, 8], strides = [1, 1]} : vector<8x32xf32> to vector<8x8xf32>
    %70 = arith.truncf %69 : vector<8x8xf32> to vector<8x8xbf16>
    %71 = vector.extract_strided_slice %47 {offsets = [0, 8], sizes = [8, 8], strides = [1, 1]} : vector<8x32xf32> to vector<8x8xf32>
    %72 = arith.truncf %71 : vector<8x8xf32> to vector<8x8xbf16>
    %cst_35 = arith.constant dense<0.000000e+00> : vector<8x8xf32>
    %73 = tpu.matmul %70, %72, %cst_35 {dimension_numbers = #tpu.dot_dimension_numbers<[1], [1], [0], [0], [0, 0, 1, 0], [], []>} : vector<8x8xbf16>, vector<8x8xbf16>, vector<8x8xf32> -> vector<8x8xf32>
    %74 = arith.addf %73, %7 : vector<8x8xf32>
    %cst_36 = arith.constant dense<0xFF800000> : vector<8xf32>
    %75 = vector.multi_reduction <maximumf>, %74, %cst_36 [1] : vector<8x8xf32> to vector<8xf32>
    %76 = vector.shape_cast %75 : vector<8xf32> to vector<8x1xf32>
    %77 = vector.broadcast %76 : vector<8x1xf32> to vector<8x8xf32>
    %78 = arith.subf %74, %77 : vector<8x8xf32>
    %79 = math.exp %78 : vector<8x8xf32>
    %cst_37 = arith.constant dense<0.000000e+00> : vector<8xf32>
    %80 = vector.multi_reduction <add>, %79, %cst_37 [1] : vector<8x8xf32> to vector<8xf32>
    %81 = vector.shape_cast %80 : vector<8xf32> to vector<8x1xf32>
    %82 = tpu.reciprocal %81 {approx = true} : vector<8x1xf32> -> vector<8x1xf32>
    %83 = vector.broadcast %82 : vector<8x1xf32> to vector<8x8xf32>
    %84 = arith.mulf %79, %83 : vector<8x8xf32>
    %85 = arith.truncf %84 : vector<8x8xf32> to vector<8x8xbf16>
    %86 = vector.extract_strided_slice %48 {offsets = [0, 8], sizes = [8, 8], strides = [1, 1]} : vector<8x32xf32> to vector<8x8xf32>
    %87 = arith.truncf %86 : vector<8x8xf32> to vector<8x8xbf16>
    %cst_38 = arith.constant dense<0.000000e+00> : vector<8x8xf32>
    %88 = tpu.matmul %85, %87, %cst_38 {dimension_numbers = #tpu.dot_dimension_numbers<[1], [0], [0], [1], [0, 0, 1, 1], [], []>} : vector<8x8xbf16>, vector<8x8xbf16>, vector<8x8xf32> -> vector<8x8xf32>
    %89 = vector.extract_strided_slice %46 {offsets = [0, 16], sizes = [8, 8], strides = [1, 1]} : vector<8x32xf32> to vector<8x8xf32>
    %90 = arith.truncf %89 : vector<8x8xf32> to vector<8x8xbf16>
    %91 = vector.extract_strided_slice %47 {offsets = [0, 16], sizes = [8, 8], strides = [1, 1]} : vector<8x32xf32> to vector<8x8xf32>
    %92 = arith.truncf %91 : vector<8x8xf32> to vector<8x8xbf16>
    %cst_39 = arith.constant dense<0.000000e+00> : vector<8x8xf32>
    %93 = tpu.matmul %90, %92, %cst_39 {dimension_numbers = #tpu.dot_dimension_numbers<[1], [1], [0], [0], [0, 0, 1, 0], [], []>} : vector<8x8xbf16>, vector<8x8xbf16>, vector<8x8xf32> -> vector<8x8xf32>
    %94 = arith.addf %93, %7 : vector<8x8xf32>
    %cst_40 = arith.constant dense<0xFF800000> : vector<8xf32>
    %95 = vector.multi_reduction <maximumf>, %94, %cst_40 [1] : vector<8x8xf32> to vector<8xf32>
    %96 = vector.shape_cast %95 : vector<8xf32> to vector<8x1xf32>
    %97 = vector.broadcast %96 : vector<8x1xf32> to vector<8x8xf32>
    %98 = arith.subf %94, %97 : vector<8x8xf32>
    %99 = math.exp %98 : vector<8x8xf32>
    %cst_41 = arith.constant dense<0.000000e+00> : vector<8xf32>
    %100 = vector.multi_reduction <add>, %99, %cst_41 [1] : vector<8x8xf32> to vector<8xf32>
    %101 = vector.shape_cast %100 : vector<8xf32> to vector<8x1xf32>
    %102 = tpu.reciprocal %101 {approx = true} : vector<8x1xf32> -> vector<8x1xf32>
    %103 = vector.broadcast %102 : vector<8x1xf32> to vector<8x8xf32>
    %104 = arith.mulf %99, %103 : vector<8x8xf32>
    %105 = arith.truncf %104 : vector<8x8xf32> to vector<8x8xbf16>
    %106 = vector.extract_strided_slice %48 {offsets = [0, 16], sizes = [8, 8], strides = [1, 1]} : vector<8x32xf32> to vector<8x8xf32>
    %107 = arith.truncf %106 : vector<8x8xf32> to vector<8x8xbf16>
    %cst_42 = arith.constant dense<0.000000e+00> : vector<8x8xf32>
    %108 = tpu.matmul %105, %107, %cst_42 {dimension_numbers = #tpu.dot_dimension_numbers<[1], [0], [0], [1], [0, 0, 1, 1], [], []>} : vector<8x8xbf16>, vector<8x8xbf16>, vector<8x8xf32> -> vector<8x8xf32>
    %109 = vector.extract_strided_slice %46 {offsets = [0, 24], sizes = [8, 8], strides = [1, 1]} : vector<8x32xf32> to vector<8x8xf32>
    %110 = arith.truncf %109 : vector<8x8xf32> to vector<8x8xbf16>
    %111 = vector.extract_strided_slice %47 {offsets = [0, 24], sizes = [8, 8], strides = [1, 1]} : vector<8x32xf32> to vector<8x8xf32>
    %112 = arith.truncf %111 : vector<8x8xf32> to vector<8x8xbf16>
    %cst_43 = arith.constant dense<0.000000e+00> : vector<8x8xf32>
    %113 = tpu.matmul %110, %112, %cst_43 {dimension_numbers = #tpu.dot_dimension_numbers<[1], [1], [0], [0], [0, 0, 1, 0], [], []>} : vector<8x8xbf16>, vector<8x8xbf16>, vector<8x8xf32> -> vector<8x8xf32>
    %114 = arith.addf %113, %7 : vector<8x8xf32>
    %cst_44 = arith.constant dense<0xFF800000> : vector<8xf32>
    %115 = vector.multi_reduction <maximumf>, %114, %cst_44 [1] : vector<8x8xf32> to vector<8xf32>
    %116 = vector.shape_cast %115 : vector<8xf32> to vector<8x1xf32>
    %117 = vector.broadcast %116 : vector<8x1xf32> to vector<8x8xf32>
    %118 = arith.subf %114, %117 : vector<8x8xf32>
    %119 = math.exp %118 : vector<8x8xf32>
    %cst_45 = arith.constant dense<0.000000e+00> : vector<8xf32>
    %120 = vector.multi_reduction <add>, %119, %cst_45 [1] : vector<8x8xf32> to vector<8xf32>
    %121 = vector.shape_cast %120 : vector<8xf32> to vector<8x1xf32>
    %122 = tpu.reciprocal %121 {approx = true} : vector<8x1xf32> -> vector<8x1xf32>
    %123 = vector.broadcast %122 : vector<8x1xf32> to vector<8x8xf32>
    %124 = arith.mulf %119, %123 : vector<8x8xf32>
    %125 = arith.truncf %124 : vector<8x8xf32> to vector<8x8xbf16>
    %126 = vector.extract_strided_slice %48 {offsets = [0, 24], sizes = [8, 8], strides = [1, 1]} : vector<8x32xf32> to vector<8x8xf32>
    %127 = arith.truncf %126 : vector<8x8xf32> to vector<8x8xbf16>
    %cst_46 = arith.constant dense<0.000000e+00> : vector<8x8xf32>
    %128 = tpu.matmul %125, %127, %cst_46 {dimension_numbers = #tpu.dot_dimension_numbers<[1], [0], [0], [1], [0, 0, 1, 1], [], []>} : vector<8x8xbf16>, vector<8x8xbf16>, vector<8x8xf32> -> vector<8x8xf32>
    %129 = tpu.concatenate %68, %88, %108, %128 in 1 : vector<8x8xf32>, vector<8x8xf32>, vector<8x8xf32>, vector<8x8xf32> -> vector<8x32xf32>
    %130 = arith.truncf %129 : vector<8x32xf32> to vector<8x32xbf16>
    %cst_47 = arith.constant dense<0.000000e+00> : vector<8x32xf32>
    %131 = tpu.matmul %130, %39, %cst_47 {dimension_numbers = #tpu.dot_dimension_numbers<[1], [0], [0], [1], [0, 0, 1, 1], [], []>} : vector<8x32xbf16>, vector<32x32xbf16>, vector<8x32xf32> -> vector<8x32xf32>
    %132 = vector.broadcast %41 : vector<1x32xf32> to vector<8x32xf32>
    %133 = arith.addf %131, %132 : vector<8x32xf32>
    %134 = arith.addf %3, %133 : vector<8x32xf32>
    %135 = vector.extract_strided_slice %11 {offsets = [2, 0], sizes = [1, 32], strides = [1, 1]} : vector<6x32xf32> to vector<1x32xf32>
    %136 = vector.extract_strided_slice %11 {offsets = [3, 0], sizes = [1, 32], strides = [1, 1]} : vector<6x32xf32> to vector<1x32xf32>
    %cst_48 = arith.constant dense<0.000000e+00> : vector<8xf32>
    %137 = vector.multi_reduction <add>, %134, %cst_48 [1] : vector<8x32xf32> to vector<8xf32>
    %138 = vector.shape_cast %137 : vector<8xf32> to vector<8x1xf32>
    %cst_49 = arith.constant 3.200000e+01 : f32
    %139 = vector.broadcast %cst_49 : f32 to vector<8x1xf32>
    %140 = arith.divf %138, %139 : vector<8x1xf32>
    %141 = vector.broadcast %140 : vector<8x1xf32> to vector<8x32xf32>
    %142 = arith.subf %134, %141 : vector<8x32xf32>
    %143 = arith.mulf %142, %142 : vector<8x32xf32>
    %cst_50 = arith.constant dense<0.000000e+00> : vector<8xf32>
    %144 = vector.multi_reduction <add>, %143, %cst_50 [1] : vector<8x32xf32> to vector<8xf32>
    %145 = vector.shape_cast %144 : vector<8xf32> to vector<8x1xf32>
    %cst_51 = arith.constant 0.0322580636 : f32
    %146 = vector.broadcast %cst_51 : f32 to vector<8x1xf32>
    %147 = arith.mulf %145, %146 : vector<8x1xf32>
    %148 = math.sqrt %147 : vector<8x1xf32>
    %149 = vector.broadcast %135 : vector<1x32xf32> to vector<8x32xf32>
    %150 = arith.mulf %149, %142 : vector<8x32xf32>
    %cst_52 = arith.constant 9.99999997E-7 : f32
    %151 = vector.broadcast %cst_52 : f32 to vector<8x1xf32>
    %152 = arith.addf %148, %151 : vector<8x1xf32>
    %153 = vector.broadcast %152 : vector<8x1xf32> to vector<8x32xf32>
    %154 = arith.divf %150, %153 : vector<8x32xf32>
    %155 = vector.broadcast %136 : vector<1x32xf32> to vector<8x32xf32>
    %156 = arith.addf %154, %155 : vector<8x32xf32>
    %c0_53 = arith.constant 0 : index
    %c0_54 = arith.constant 0 : index
    %c0_55 = arith.constant 0 : index
    %157 = vector.load %arg11[%c0_53, %c0_54, %c0_55] : memref<1x32x32xbf16, #tpu.memory_space<vmem>>, vector<1x32x32xbf16>
    %158 = vector.shape_cast %157 : vector<1x32x32xbf16> to vector<32x32xbf16>
    %c0_56 = arith.constant 0 : index
    %c0_57 = arith.constant 0 : index
    %c0_58 = arith.constant 0 : index
    %159 = vector.load %arg12[%c0_56, %c0_57, %c0_58] : memref<1x1x32xf32, #tpu.memory_space<vmem>>, vector<1x1x32xf32>
    %160 = vector.shape_cast %159 : vector<1x1x32xf32> to vector<1x32xf32>
    %c0_59 = arith.constant 0 : index
    %c0_60 = arith.constant 0 : index
    %c0_61 = arith.constant 0 : index
    %161 = vector.load %arg13[%c0_59, %c0_60, %c0_61] : memref<1x32x64xbf16, #tpu.memory_space<vmem>>, vector<1x32x64xbf16>
    %162 = vector.shape_cast %161 : vector<1x32x64xbf16> to vector<32x64xbf16>
    %c0_62 = arith.constant 0 : index
    %c0_63 = arith.constant 0 : index
    %c0_64 = arith.constant 0 : index
    %163 = vector.load %arg14[%c0_62, %c0_63, %c0_64] : memref<1x1x64xf32, #tpu.memory_space<vmem>>, vector<1x1x64xf32>
    %164 = vector.shape_cast %163 : vector<1x1x64xf32> to vector<1x64xf32>
    %c0_65 = arith.constant 0 : index
    %c0_66 = arith.constant 0 : index
    %c0_67 = arith.constant 0 : index
    %165 = vector.load %arg15[%c0_65, %c0_66, %c0_67] : memref<1x32x32xbf16, #tpu.memory_space<vmem>>, vector<1x32x32xbf16>
    %166 = vector.shape_cast %165 : vector<1x32x32xbf16> to vector<32x32xbf16>
    %c0_68 = arith.constant 0 : index
    %c0_69 = arith.constant 0 : index
    %c0_70 = arith.constant 0 : index
    %167 = vector.load %arg16[%c0_68, %c0_69, %c0_70] : memref<1x1x32xf32, #tpu.memory_space<vmem>>, vector<1x1x32xf32>
    %168 = vector.shape_cast %167 : vector<1x1x32xf32> to vector<1x32xf32>
    %169 = arith.truncf %156 : vector<8x32xf32> to vector<8x32xbf16>
    %cst_71 = arith.constant dense<0.000000e+00> : vector<8x32xf32>
    %170 = tpu.matmul %169, %158, %cst_71 {dimension_numbers = #tpu.dot_dimension_numbers<[1], [0], [0], [1], [0, 0, 1, 1], [], []>} : vector<8x32xbf16>, vector<32x32xbf16>, vector<8x32xf32> -> vector<8x32xf32>
    %171 = vector.broadcast %160 : vector<1x32xf32> to vector<8x32xf32>
    %172 = arith.addf %170, %171 : vector<8x32xf32>
    %173 = arith.truncf %5 : vector<8x32xf32> to vector<8x32xbf16>
    %cst_72 = arith.constant dense<0.000000e+00> : vector<8x64xf32>
    %174 = tpu.matmul %173, %162, %cst_72 {dimension_numbers = #tpu.dot_dimension_numbers<[1], [0], [0], [1], [0, 0, 1, 1], [], []>} : vector<8x32xbf16>, vector<32x64xbf16>, vector<8x64xf32> -> vector<8x64xf32>
    %175 = vector.broadcast %164 : vector<1x64xf32> to vector<8x64xf32>
    %176 = arith.addf %174, %175 : vector<8x64xf32>
    %177 = vector.extract_strided_slice %176 {offsets = [0, 0], sizes = [8, 32], strides = [1, 1]} : vector<8x64xf32> to vector<8x32xf32>
    %178 = vector.extract_strided_slice %176 {offsets = [0, 32], sizes = [8, 32], strides = [1, 1]} : vector<8x64xf32> to vector<8x32xf32>
    %179 = vector.extract_strided_slice %172 {offsets = [0, 0], sizes = [8, 8], strides = [1, 1]} : vector<8x32xf32> to vector<8x8xf32>
    %180 = arith.truncf %179 : vector<8x8xf32> to vector<8x8xbf16>
    %181 = vector.extract_strided_slice %177 {offsets = [0, 0], sizes = [8, 8], strides = [1, 1]} : vector<8x32xf32> to vector<8x8xf32>
    %182 = arith.truncf %181 : vector<8x8xf32> to vector<8x8xbf16>
    %cst_73 = arith.constant dense<0.000000e+00> : vector<8x8xf32>
    %183 = tpu.matmul %180, %182, %cst_73 {dimension_numbers = #tpu.dot_dimension_numbers<[1], [1], [0], [0], [0, 0, 1, 0], [], []>} : vector<8x8xbf16>, vector<8x8xbf16>, vector<8x8xf32> -> vector<8x8xf32>
    %184 = vector.broadcast %9 : vector<1x8xf32> to vector<8x8xf32>
    %185 = arith.addf %183, %184 : vector<8x8xf32>
    %cst_74 = arith.constant dense<0xFF800000> : vector<8xf32>
    %186 = vector.multi_reduction <maximumf>, %185, %cst_74 [1] : vector<8x8xf32> to vector<8xf32>
    %187 = vector.shape_cast %186 : vector<8xf32> to vector<8x1xf32>
    %188 = vector.broadcast %187 : vector<8x1xf32> to vector<8x8xf32>
    %189 = arith.subf %185, %188 : vector<8x8xf32>
    %190 = math.exp %189 : vector<8x8xf32>
    %cst_75 = arith.constant dense<0.000000e+00> : vector<8xf32>
    %191 = vector.multi_reduction <add>, %190, %cst_75 [1] : vector<8x8xf32> to vector<8xf32>
    %192 = vector.shape_cast %191 : vector<8xf32> to vector<8x1xf32>
    %193 = tpu.reciprocal %192 {approx = true} : vector<8x1xf32> -> vector<8x1xf32>
    %194 = vector.broadcast %193 : vector<8x1xf32> to vector<8x8xf32>
    %195 = arith.mulf %190, %194 : vector<8x8xf32>
    %196 = arith.truncf %195 : vector<8x8xf32> to vector<8x8xbf16>
    %197 = vector.extract_strided_slice %178 {offsets = [0, 0], sizes = [8, 8], strides = [1, 1]} : vector<8x32xf32> to vector<8x8xf32>
    %198 = arith.truncf %197 : vector<8x8xf32> to vector<8x8xbf16>
    %cst_76 = arith.constant dense<0.000000e+00> : vector<8x8xf32>
    %199 = tpu.matmul %196, %198, %cst_76 {dimension_numbers = #tpu.dot_dimension_numbers<[1], [0], [0], [1], [0, 0, 1, 1], [], []>} : vector<8x8xbf16>, vector<8x8xbf16>, vector<8x8xf32> -> vector<8x8xf32>
    %200 = vector.extract_strided_slice %172 {offsets = [0, 8], sizes = [8, 8], strides = [1, 1]} : vector<8x32xf32> to vector<8x8xf32>
    %201 = arith.truncf %200 : vector<8x8xf32> to vector<8x8xbf16>
    %202 = vector.extract_strided_slice %177 {offsets = [0, 8], sizes = [8, 8], strides = [1, 1]} : vector<8x32xf32> to vector<8x8xf32>
    %203 = arith.truncf %202 : vector<8x8xf32> to vector<8x8xbf16>
    %cst_77 = arith.constant dense<0.000000e+00> : vector<8x8xf32>
    %204 = tpu.matmul %201, %203, %cst_77 {dimension_numbers = #tpu.dot_dimension_numbers<[1], [1], [0], [0], [0, 0, 1, 0], [], []>} : vector<8x8xbf16>, vector<8x8xbf16>, vector<8x8xf32> -> vector<8x8xf32>
    %205 = vector.broadcast %9 : vector<1x8xf32> to vector<8x8xf32>
    %206 = arith.addf %204, %205 : vector<8x8xf32>
    %cst_78 = arith.constant dense<0xFF800000> : vector<8xf32>
    %207 = vector.multi_reduction <maximumf>, %206, %cst_78 [1] : vector<8x8xf32> to vector<8xf32>
    %208 = vector.shape_cast %207 : vector<8xf32> to vector<8x1xf32>
    %209 = vector.broadcast %208 : vector<8x1xf32> to vector<8x8xf32>
    %210 = arith.subf %206, %209 : vector<8x8xf32>
    %211 = math.exp %210 : vector<8x8xf32>
    %cst_79 = arith.constant dense<0.000000e+00> : vector<8xf32>
    %212 = vector.multi_reduction <add>, %211, %cst_79 [1] : vector<8x8xf32> to vector<8xf32>
    %213 = vector.shape_cast %212 : vector<8xf32> to vector<8x1xf32>
    %214 = tpu.reciprocal %213 {approx = true} : vector<8x1xf32> -> vector<8x1xf32>
    %215 = vector.broadcast %214 : vector<8x1xf32> to vector<8x8xf32>
    %216 = arith.mulf %211, %215 : vector<8x8xf32>
    %217 = arith.truncf %216 : vector<8x8xf32> to vector<8x8xbf16>
    %218 = vector.extract_strided_slice %178 {offsets = [0, 8], sizes = [8, 8], strides = [1, 1]} : vector<8x32xf32> to vector<8x8xf32>
    %219 = arith.truncf %218 : vector<8x8xf32> to vector<8x8xbf16>
    %cst_80 = arith.constant dense<0.000000e+00> : vector<8x8xf32>
    %220 = tpu.matmul %217, %219, %cst_80 {dimension_numbers = #tpu.dot_dimension_numbers<[1], [0], [0], [1], [0, 0, 1, 1], [], []>} : vector<8x8xbf16>, vector<8x8xbf16>, vector<8x8xf32> -> vector<8x8xf32>
    %221 = vector.extract_strided_slice %172 {offsets = [0, 16], sizes = [8, 8], strides = [1, 1]} : vector<8x32xf32> to vector<8x8xf32>
    %222 = arith.truncf %221 : vector<8x8xf32> to vector<8x8xbf16>
    %223 = vector.extract_strided_slice %177 {offsets = [0, 16], sizes = [8, 8], strides = [1, 1]} : vector<8x32xf32> to vector<8x8xf32>
    %224 = arith.truncf %223 : vector<8x8xf32> to vector<8x8xbf16>
    %cst_81 = arith.constant dense<0.000000e+00> : vector<8x8xf32>
    %225 = tpu.matmul %222, %224, %cst_81 {dimension_numbers = #tpu.dot_dimension_numbers<[1], [1], [0], [0], [0, 0, 1, 0], [], []>} : vector<8x8xbf16>, vector<8x8xbf16>, vector<8x8xf32> -> vector<8x8xf32>
    %226 = vector.broadcast %9 : vector<1x8xf32> to vector<8x8xf32>
    %227 = arith.addf %225, %226 : vector<8x8xf32>
    %cst_82 = arith.constant dense<0xFF800000> : vector<8xf32>
    %228 = vector.multi_reduction <maximumf>, %227, %cst_82 [1] : vector<8x8xf32> to vector<8xf32>
    %229 = vector.shape_cast %228 : vector<8xf32> to vector<8x1xf32>
    %230 = vector.broadcast %229 : vector<8x1xf32> to vector<8x8xf32>
    %231 = arith.subf %227, %230 : vector<8x8xf32>
    %232 = math.exp %231 : vector<8x8xf32>
    %cst_83 = arith.constant dense<0.000000e+00> : vector<8xf32>
    %233 = vector.multi_reduction <add>, %232, %cst_83 [1] : vector<8x8xf32> to vector<8xf32>
    %234 = vector.shape_cast %233 : vector<8xf32> to vector<8x1xf32>
    %235 = tpu.reciprocal %234 {approx = true} : vector<8x1xf32> -> vector<8x1xf32>
    %236 = vector.broadcast %235 : vector<8x1xf32> to vector<8x8xf32>
    %237 = arith.mulf %232, %236 : vector<8x8xf32>
    %238 = arith.truncf %237 : vector<8x8xf32> to vector<8x8xbf16>
    %239 = vector.extract_strided_slice %178 {offsets = [0, 16], sizes = [8, 8], strides = [1, 1]} : vector<8x32xf32> to vector<8x8xf32>
    %240 = arith.truncf %239 : vector<8x8xf32> to vector<8x8xbf16>
    %cst_84 = arith.constant dense<0.000000e+00> : vector<8x8xf32>
    %241 = tpu.matmul %238, %240, %cst_84 {dimension_numbers = #tpu.dot_dimension_numbers<[1], [0], [0], [1], [0, 0, 1, 1], [], []>} : vector<8x8xbf16>, vector<8x8xbf16>, vector<8x8xf32> -> vector<8x8xf32>
    %242 = vector.extract_strided_slice %172 {offsets = [0, 24], sizes = [8, 8], strides = [1, 1]} : vector<8x32xf32> to vector<8x8xf32>
    %243 = arith.truncf %242 : vector<8x8xf32> to vector<8x8xbf16>
    %244 = vector.extract_strided_slice %177 {offsets = [0, 24], sizes = [8, 8], strides = [1, 1]} : vector<8x32xf32> to vector<8x8xf32>
    %245 = arith.truncf %244 : vector<8x8xf32> to vector<8x8xbf16>
    %cst_85 = arith.constant dense<0.000000e+00> : vector<8x8xf32>
    %246 = tpu.matmul %243, %245, %cst_85 {dimension_numbers = #tpu.dot_dimension_numbers<[1], [1], [0], [0], [0, 0, 1, 0], [], []>} : vector<8x8xbf16>, vector<8x8xbf16>, vector<8x8xf32> -> vector<8x8xf32>
    %247 = vector.broadcast %9 : vector<1x8xf32> to vector<8x8xf32>
    %248 = arith.addf %246, %247 : vector<8x8xf32>
    %cst_86 = arith.constant dense<0xFF800000> : vector<8xf32>
    %249 = vector.multi_reduction <maximumf>, %248, %cst_86 [1] : vector<8x8xf32> to vector<8xf32>
    %250 = vector.shape_cast %249 : vector<8xf32> to vector<8x1xf32>
    %251 = vector.broadcast %250 : vector<8x1xf32> to vector<8x8xf32>
    %252 = arith.subf %248, %251 : vector<8x8xf32>
    %253 = math.exp %252 : vector<8x8xf32>
    %cst_87 = arith.constant dense<0.000000e+00> : vector<8xf32>
    %254 = vector.multi_reduction <add>, %253, %cst_87 [1] : vector<8x8xf32> to vector<8xf32>
    %255 = vector.shape_cast %254 : vector<8xf32> to vector<8x1xf32>
    %256 = tpu.reciprocal %255 {approx = true} : vector<8x1xf32> -> vector<8x1xf32>
    %257 = vector.broadcast %256 : vector<8x1xf32> to vector<8x8xf32>
    %258 = arith.mulf %253, %257 : vector<8x8xf32>
    %259 = arith.truncf %258 : vector<8x8xf32> to vector<8x8xbf16>
    %260 = vector.extract_strided_slice %178 {offsets = [0, 24], sizes = [8, 8], strides = [1, 1]} : vector<8x32xf32> to vector<8x8xf32>
    %261 = arith.truncf %260 : vector<8x8xf32> to vector<8x8xbf16>
    %cst_88 = arith.constant dense<0.000000e+00> : vector<8x8xf32>
    %262 = tpu.matmul %259, %261, %cst_88 {dimension_numbers = #tpu.dot_dimension_numbers<[1], [0], [0], [1], [0, 0, 1, 1], [], []>} : vector<8x8xbf16>, vector<8x8xbf16>, vector<8x8xf32> -> vector<8x8xf32>
    %263 = tpu.concatenate %199, %220, %241, %262 in 1 : vector<8x8xf32>, vector<8x8xf32>, vector<8x8xf32>, vector<8x8xf32> -> vector<8x32xf32>
    %264 = arith.truncf %263 : vector<8x32xf32> to vector<8x32xbf16>
    %cst_89 = arith.constant dense<0.000000e+00> : vector<8x32xf32>
    %265 = tpu.matmul %264, %166, %cst_89 {dimension_numbers = #tpu.dot_dimension_numbers<[1], [0], [0], [1], [0, 0, 1, 1], [], []>} : vector<8x32xbf16>, vector<32x32xbf16>, vector<8x32xf32> -> vector<8x32xf32>
    %266 = vector.broadcast %168 : vector<1x32xf32> to vector<8x32xf32>
    %267 = arith.addf %265, %266 : vector<8x32xf32>
    %268 = arith.addf %134, %267 : vector<8x32xf32>
    %269 = vector.extract_strided_slice %11 {offsets = [4, 0], sizes = [1, 32], strides = [1, 1]} : vector<6x32xf32> to vector<1x32xf32>
    %270 = vector.extract_strided_slice %11 {offsets = [5, 0], sizes = [1, 32], strides = [1, 1]} : vector<6x32xf32> to vector<1x32xf32>
    %cst_90 = arith.constant dense<0.000000e+00> : vector<8xf32>
    %271 = vector.multi_reduction <add>, %268, %cst_90 [1] : vector<8x32xf32> to vector<8xf32>
    %272 = vector.shape_cast %271 : vector<8xf32> to vector<8x1xf32>
    %cst_91 = arith.constant 3.200000e+01 : f32
    %273 = vector.broadcast %cst_91 : f32 to vector<8x1xf32>
    %274 = arith.divf %272, %273 : vector<8x1xf32>
    %275 = vector.broadcast %274 : vector<8x1xf32> to vector<8x32xf32>
    %276 = arith.subf %268, %275 : vector<8x32xf32>
    %277 = arith.mulf %276, %276 : vector<8x32xf32>
    %cst_92 = arith.constant dense<0.000000e+00> : vector<8xf32>
    %278 = vector.multi_reduction <add>, %277, %cst_92 [1] : vector<8x32xf32> to vector<8xf32>
    %279 = vector.shape_cast %278 : vector<8xf32> to vector<8x1xf32>
    %cst_93 = arith.constant 0.0322580636 : f32
    %280 = vector.broadcast %cst_93 : f32 to vector<8x1xf32>
    %281 = arith.mulf %279, %280 : vector<8x1xf32>
    %282 = math.sqrt %281 : vector<8x1xf32>
    %283 = vector.broadcast %269 : vector<1x32xf32> to vector<8x32xf32>
    %284 = arith.mulf %283, %276 : vector<8x32xf32>
    %cst_94 = arith.constant 9.99999997E-7 : f32
    %285 = vector.broadcast %cst_94 : f32 to vector<8x1xf32>
    %286 = arith.addf %282, %285 : vector<8x1xf32>
    %287 = vector.broadcast %286 : vector<8x1xf32> to vector<8x32xf32>
    %288 = arith.divf %284, %287 : vector<8x32xf32>
    %289 = vector.broadcast %270 : vector<1x32xf32> to vector<8x32xf32>
    %290 = arith.addf %288, %289 : vector<8x32xf32>
    %c0_95 = arith.constant 0 : index
    %c0_96 = arith.constant 0 : index
    %c0_97 = arith.constant 0 : index
    %291 = vector.load %arg17[%c0_95, %c0_96, %c0_97] : memref<1x32x64xbf16, #tpu.memory_space<vmem>>, vector<1x32x64xbf16>
    %292 = vector.shape_cast %291 : vector<1x32x64xbf16> to vector<32x64xbf16>
    %c0_98 = arith.constant 0 : index
    %c0_99 = arith.constant 0 : index
    %c0_100 = arith.constant 0 : index
    %293 = vector.load %arg18[%c0_98, %c0_99, %c0_100] : memref<1x1x64xf32, #tpu.memory_space<vmem>>, vector<1x1x64xf32>
    %294 = vector.shape_cast %293 : vector<1x1x64xf32> to vector<1x64xf32>
    %c0_101 = arith.constant 0 : index
    %c0_102 = arith.constant 0 : index
    %c0_103 = arith.constant 0 : index
    %295 = vector.load %arg19[%c0_101, %c0_102, %c0_103] : memref<1x64x32xbf16, #tpu.memory_space<vmem>>, vector<1x64x32xbf16>
    %296 = vector.shape_cast %295 : vector<1x64x32xbf16> to vector<64x32xbf16>
    %c0_104 = arith.constant 0 : index
    %c0_105 = arith.constant 0 : index
    %c0_106 = arith.constant 0 : index
    %297 = vector.load %arg20[%c0_104, %c0_105, %c0_106] : memref<1x1x32xf32, #tpu.memory_space<vmem>>, vector<1x1x32xf32>
    %298 = vector.shape_cast %297 : vector<1x1x32xf32> to vector<1x32xf32>
    %299 = arith.truncf %290 : vector<8x32xf32> to vector<8x32xbf16>
    %cst_107 = arith.constant dense<0.000000e+00> : vector<8x64xf32>
    %300 = tpu.matmul %299, %292, %cst_107 {dimension_numbers = #tpu.dot_dimension_numbers<[1], [0], [0], [1], [0, 0, 1, 1], [], []>} : vector<8x32xbf16>, vector<32x64xbf16>, vector<8x64xf32> -> vector<8x64xf32>
    %301 = vector.broadcast %294 : vector<1x64xf32> to vector<8x64xf32>
    %302 = arith.addf %300, %301 : vector<8x64xf32>
    %cst_108 = arith.constant 0.000000e+00 : f32
    %303 = vector.broadcast %cst_108 : f32 to vector<8x64xf32>
    %304 = arith.maximumf %302, %303 : vector<8x64xf32>
    %305 = arith.truncf %304 : vector<8x64xf32> to vector<8x64xbf16>
    %cst_109 = arith.constant dense<0.000000e+00> : vector<8x32xf32>
    %306 = tpu.matmul %305, %296, %cst_109 {dimension_numbers = #tpu.dot_dimension_numbers<[1], [0], [0], [1], [0, 0, 1, 1], [], []>} : vector<8x64xbf16>, vector<64x32xbf16>, vector<8x32xf32> -> vector<8x32xf32>
    %307 = vector.broadcast %298 : vector<1x32xf32> to vector<8x32xf32>
    %308 = arith.addf %306, %307 : vector<8x32xf32>
    %309 = arith.addf %268, %308 : vector<8x32xf32>
    %c0_110 = arith.constant 0 : index
    %c0_111 = arith.constant 0 : index
    %310 = vector.load %arg25[%c0_110, %c0_111] : memref<8x32xf32, #tpu.memory_space<vmem>>, vector<8x32xf32>
    tpu.vector_store %arg25[%c0_110, %c0_111], %309 {strides = array<i32>} : memref<8x32xf32, #tpu.memory_space<vmem>>, vector<8x32xf32>,
    %c1_i32 = arith.constant 1 : i32
    %311 = arith.cmpi eq, %arg1, %c1_i32 : i32
    %312 = arith.extui %311 : i1 to i32
    %c0_i32_112 = arith.constant 0 : i32
    %313 = arith.cmpi ne, %312, %c0_i32_112 : i32
    scf.if %313 {
      %c0_113 = arith.constant 0 : index
      %c0_114 = arith.constant 0 : index
      %314 = vector.load %arg21[%c0_113, %c0_114] : memref<2x32xf32, #tpu.memory_space<vmem>>, vector<2x32xf32>
      %315 = vector.extract_strided_slice %314 {offsets = [0, 0], sizes = [1, 32], strides = [1, 1]} : vector<2x32xf32> to vector<1x32xf32>
      %316 = vector.extract_strided_slice %314 {offsets = [1, 0], sizes = [1, 32], strides = [1, 1]} : vector<2x32xf32> to vector<1x32xf32>
      %cst_115 = arith.constant dense<0.000000e+00> : vector<8xf32>
      %317 = vector.multi_reduction <add>, %309, %cst_115 [1] : vector<8x32xf32> to vector<8xf32>
      %318 = vector.shape_cast %317 : vector<8xf32> to vector<8x1xf32>
      %cst_116 = arith.constant 3.200000e+01 : f32
      %319 = vector.broadcast %cst_116 : f32 to vector<8x1xf32>
      %320 = arith.divf %318, %319 : vector<8x1xf32>
      %321 = vector.broadcast %320 : vector<8x1xf32> to vector<8x32xf32>
      %322 = arith.subf %309, %321 : vector<8x32xf32>
      %323 = arith.mulf %322, %322 : vector<8x32xf32>
      %cst_117 = arith.constant dense<0.000000e+00> : vector<8xf32>
      %324 = vector.multi_reduction <add>, %323, %cst_117 [1] : vector<8x32xf32> to vector<8xf32>
      %325 = vector.shape_cast %324 : vector<8xf32> to vector<8x1xf32>
      %cst_118 = arith.constant 0.0322580636 : f32
      %326 = vector.broadcast %cst_118 : f32 to vector<8x1xf32>
      %327 = arith.mulf %325, %326 : vector<8x1xf32>
      %328 = math.sqrt %327 : vector<8x1xf32>
      %329 = vector.broadcast %315 : vector<1x32xf32> to vector<8x32xf32>
      %330 = arith.mulf %329, %322 : vector<8x32xf32>
      %cst_119 = arith.constant 9.99999997E-7 : f32
      %331 = vector.broadcast %cst_119 : f32 to vector<8x1xf32>
      %332 = arith.addf %328, %331 : vector<8x1xf32>
      %333 = vector.broadcast %332 : vector<8x1xf32> to vector<8x32xf32>
      %334 = arith.divf %330, %333 : vector<8x32xf32>
      %335 = vector.broadcast %316 : vector<1x32xf32> to vector<8x32xf32>
      %336 = arith.addf %334, %335 : vector<8x32xf32>
      %337 = arith.truncf %336 : vector<8x32xf32> to vector<8x32xbf16>
      %c0_120 = arith.constant 0 : index
      %c0_121 = arith.constant 0 : index
      %338 = vector.load %arg22[%c0_120, %c0_121] : memref<32x128xbf16, #tpu.memory_space<vmem>>, vector<32x128xbf16>
      %cst_122 = arith.constant dense<0.000000e+00> : vector<8x128xf32>
      %339 = tpu.matmul %337, %338, %cst_122 {dimension_numbers = #tpu.dot_dimension_numbers<[1], [0], [0], [1], [0, 0, 1, 1], [], []>} : vector<8x32xbf16>, vector<32x128xbf16>, vector<8x128xf32> -> vector<8x128xf32>
      %c0_123 = arith.constant 0 : index
      %c0_124 = arith.constant 0 : index
      %340 = vector.load %arg23[%c0_123, %c0_124] : memref<1x128xf32, #tpu.memory_space<vmem>>, vector<1x128xf32>
      %341 = vector.broadcast %340 : vector<1x128xf32> to vector<8x128xf32>
      %342 = arith.addf %339, %341 : vector<8x128xf32>
      %c0_125 = arith.constant 0 : index
      %c0_126 = arith.constant 0 : index
      %c0_127 = arith.constant 0 : index
      %343 = vector.load %arg24[%c0_125, %c0_126, %c0_127] : memref<1x8x128xf32, #tpu.memory_space<vmem>>, vector<1x8x128xf32>
      %344 = vector.shape_cast %343 : vector<1x8x128xf32> to vector<8x128xf32>
      %345 = vector.shape_cast %342 : vector<8x128xf32> to vector<1x8x128xf32>
      tpu.vector_store %arg24[%c0_125, %c0_126, %c0_127], %345 {strides = array<i32>} : memref<1x8x128xf32, #tpu.memory_space<vmem>>, vector<1x8x128xf32>,
    } else {
    }
    return
  }
  func.func @transform_0(%arg0: i32, %arg1: i32) -> (i32, i32, i32) {
    %c0_i32 = arith.constant 0 : i32
    %c0_i32_0 = arith.constant 0 : i32
    %c0_i32_1 = arith.constant 0 : i32
    return %arg0, %c0_i32, %c0_i32_0 : i32, i32, i32
  }
  func.func @transform_1(%arg0: i32, %arg1: i32) -> (i32, i32, i32) {
    %c0_i32 = arith.constant 0 : i32
    %c0_i32_0 = arith.constant 0 : i32
    %c0_i32_1 = arith.constant 0 : i32
    return %arg0, %c0_i32, %c0_i32_0 : i32, i32, i32
  }
  func.func @transform_2(%arg0: i32, %arg1: i32) -> (i32, i32, i32) {
    %c0_i32 = arith.constant 0 : i32
    %c0_i32_0 = arith.constant 0 : i32
    %c0_i32_1 = arith.constant 0 : i32
    return %arg0, %c0_i32, %c0_i32_0 : i32, i32, i32
  }
  func.func @transform_3(%arg0: i32, %arg1: i32) -> (i32, i32, i32) {
    %c0_i32 = arith.constant 0 : i32
    %c0_i32_0 = arith.constant 0 : i32
    %c0_i32_1 = arith.constant 0 : i32
    return %arg0, %c0_i32, %c0_i32_0 : i32, i32, i32
  }
  func.func @transform_4(%arg0: i32, %arg1: i32) -> (i32, i32, i32) {
    %c0_i32 = arith.constant 0 : i32
    %c0_i32_0 = arith.constant 0 : i32
    %c0_i32_1 = arith.constant 0 : i32
    return %arg1, %c0_i32, %c0_i32_0 : i32, i32, i32
  }
  func.func @transform_5(%arg0: i32, %arg1: i32) -> (i32, i32, i32) {
    %c0_i32 = arith.constant 0 : i32
    %c0_i32_0 = arith.constant 0 : i32
    %c0_i32_1 = arith.constant 0 : i32
    return %arg1, %c0_i32, %c0_i32_0 : i32, i32, i32
  }
  func.func @transform_6(%arg0: i32, %arg1: i32) -> (i32, i32, i32) {
    %c0_i32 = arith.constant 0 : i32
    %c0_i32_0 = arith.constant 0 : i32
    %c0_i32_1 = arith.constant 0 : i32
    return %arg1, %c0_i32, %c0_i32_0 : i32, i32, i32
  }
  func.func @transform_7(%arg0: i32, %arg1: i32) -> (i32, i32, i32) {
    %c0_i32 = arith.constant 0 : i32
    %c0_i32_0 = arith.constant 0 : i32
    %c0_i32_1 = arith.constant 0 : i32
    return %arg1, %c0_i32, %c0_i32_0 : i32, i32, i32
  }
  func.func @transform_8(%arg0: i32, %arg1: i32) -> (i32, i32, i32) {
    %c0_i32 = arith.constant 0 : i32
    %c0_i32_0 = arith.constant 0 : i32
    %c0_i32_1 = arith.constant 0 : i32
    return %arg1, %c0_i32, %c0_i32_0 : i32, i32, i32
  }
  func.func @transform_9(%arg0: i32, %arg1: i32) -> (i32, i32, i32) {
    %c0_i32 = arith.constant 0 : i32
    %c0_i32_0 = arith.constant 0 : i32
    %c0_i32_1 = arith.constant 0 : i32
    return %arg1, %c0_i32, %c0_i32_0 : i32, i32, i32
  }
  func.func @transform_10(%arg0: i32, %arg1: i32) -> (i32, i32, i32) {
    %c0_i32 = arith.constant 0 : i32
    %c0_i32_0 = arith.constant 0 : i32
    %c0_i32_1 = arith.constant 0 : i32
    return %arg1, %c0_i32, %c0_i32_0 : i32, i32, i32
  }
  func.func @transform_11(%arg0: i32, %arg1: i32) -> (i32, i32, i32) {
    %c0_i32 = arith.constant 0 : i32
    %c0_i32_0 = arith.constant 0 : i32
    %c0_i32_1 = arith.constant 0 : i32
    return %arg1, %c0_i32, %c0_i32_0 : i32, i32, i32
  }
  func.func @transform_12(%arg0: i32, %arg1: i32) -> (i32, i32, i32) {
    %c0_i32 = arith.constant 0 : i32
    %c0_i32_0 = arith.constant 0 : i32
    %c0_i32_1 = arith.constant 0 : i32
    return %arg1, %c0_i32, %c0_i32_0 : i32, i32, i32
  }
  func.func @transform_13(%arg0: i32, %arg1: i32) -> (i32, i32, i32) {
    %c0_i32 = arith.constant 0 : i32
    %c0_i32_0 = arith.constant 0 : i32
    %c0_i32_1 = arith.constant 0 : i32
    return %arg1, %c0_i32, %c0_i32_0 : i32, i32, i32
  }
  func.func @transform_14(%arg0: i32, %arg1: i32) -> (i32, i32, i32) {
    %c0_i32 = arith.constant 0 : i32
    %c0_i32_0 = arith.constant 0 : i32
    %c0_i32_1 = arith.constant 0 : i32
    return %arg1, %c0_i32, %c0_i32_0 : i32, i32, i32
  }
  func.func @transform_15(%arg0: i32, %arg1: i32) -> (i32, i32, i32) {
    %c0_i32 = arith.constant 0 : i32
    %c0_i32_0 = arith.constant 0 : i32
    %c0_i32_1 = arith.constant 0 : i32
    return %arg1, %c0_i32, %c0_i32_0 : i32, i32, i32
  }
  func.func @transform_16(%arg0: i32, %arg1: i32) -> (i32, i32, i32) {
    %c0_i32 = arith.constant 0 : i32
    %c0_i32_0 = arith.constant 0 : i32
    %c0_i32_1 = arith.constant 0 : i32
    return %arg1, %c0_i32, %c0_i32_0 : i32, i32, i32
  }
  func.func @transform_17(%arg0: i32, %arg1: i32) -> (i32, i32, i32) {
    %c0_i32 = arith.constant 0 : i32
    %c0_i32_0 = arith.constant 0 : i32
    %c0_i32_1 = arith.constant 0 : i32
    return %arg1, %c0_i32, %c0_i32_0 : i32, i32, i32
  }
  func.func @transform_18(%arg0: i32, %arg1: i32) -> (i32, i32, i32) {
    %c0_i32 = arith.constant 0 : i32
    %c0_i32_0 = arith.constant 0 : i32
    %c0_i32_1 = arith.constant 0 : i32
    return %arg1, %c0_i32, %c0_i32_0 : i32, i32, i32
  }
  func.func @transform_19(%arg0: i32, %arg1: i32) -> (i32, i32) {
    %c0_i32 = arith.constant 0 : i32
    %c0_i32_0 = arith.constant 0 : i32
    %c0_i32_1 = arith.constant 0 : i32
    return %c0_i32, %c0_i32_0 : i32, i32
  }
  func.func @transform_20(%arg0: i32, %arg1: i32) -> (i32, i32) {
    %c0_i32 = arith.constant 0 : i32
    %c0_i32_0 = arith.constant 0 : i32
    %c0_i32_1 = arith.constant 0 : i32
    return %c0_i32, %c0_i32_0 : i32, i32
  }
  func.func @transform_21(%arg0: i32, %arg1: i32) -> (i32, i32) {
    %c0_i32 = arith.constant 0 : i32
    %c0_i32_0 = arith.constant 0 : i32
    %c0_i32_1 = arith.constant 0 : i32
    return %c0_i32, %c0_i32_0 : i32, i32
  }
  func.func @transform_22(%arg0: i32, %arg1: i32) -> (i32, i32, i32) {
    %c0_i32 = arith.constant 0 : i32
    %c0_i32_0 = arith.constant 0 : i32
    %c0_i32_1 = arith.constant 0 : i32
    return %arg0, %c0_i32, %c0_i32_0 : i32, i32, i32
  }
}

</mosaic_0001>

<bundles_post_ra>
// kernel: transformer_forward.2
= control target key start
LH: loop header
LB: loop body
LE: loop exit
PB: predicated region body
PF: predicated region fallthrough
CT: control target
= control target key end

     0   :  { %s2000_s21 = smov 0   ;;  %s2002_s22 = smov 0   ;;  %s2274_s0 = inlined_call_operand.vmem [shape: f32[2,8,32], index: 0, kind: input, shape index: {}]   ;;  %s2275_s1 = inlined_call_operand.vmem [shape: f32[2,1,8], index: 1, kind: input, shape index: {}]   ;;  %s2276_s2 = inlined_call_operand.vmem [shape: f32[2,6,32], index: 2, kind: input, shape index: {}]   ;;  %s2277_s3 = inlined_call_operand.vmem [shape: bf16[2,32,96], index: 3, kind: input, shape index: {}]   ;;  %s2278_s4 = inlined_call_operand.vmem [shape: f32[2,1,96], index: 4, kind: input, shape index: {}]   ;;  %s2279_s5 = inlined_call_operand.vmem [shape: bf16[2,32,32], index: 5, kind: input, shape index: {}]   ;;  %s2280_s6 = inlined_call_operand.vmem [shape: f32[2,1,32], index: 6, kind: input, shape index: {}]   ;;  %s2281_s7 = inlined_call_operand.vmem [shape: bf16[2,32,64], index: 7, kind: input, shape index: {}]   ;;  %s2282_s8 = inlined_call_operand.vmem [shape: f32[2,1,64], index: 8, kind: input, shape index: {}]   ;;  %s2283_s9 = inlined_call_operand.vmem [shape: bf16[2,64,32], index: 9, kind: input, shape index: {}]   ;;  %s2284_s10 = inlined_call_operand.vmem [shape: f32[2,1,32], index: 10, kind: input, shape index: {}]   ;;  %s2285_s11 = inlined_call_operand.vmem [shape: f32[2,32], index: 11, kind: input, shape index: {}]   ;;  %s2286_s12 = inlined_call_operand.vmem [shape: f32[2,8,32], index: 12, kind: output, shape index: {}]  }
   0x1   :  { %2292 = sst [smem:[#allocation10_spill]] %s2274_s0  ;;  %s2004_s23 = smov 0  }
   0x2   :  { %2293 = sst [smem:[#allocation11_spill]] %s2276_s2  ;;  %s2006_s24 = smov 0  }
   0x3   :  { %2294 = sst [smem:[#allocation12_spill]] %s2277_s3  ;;  %s2008_s25 = smov 0  }
   0x4   :  { %2295 = sst [smem:[#allocation13_spill]] %s2279_s5 }
   0x5   :  { %2296 = sst [smem:[#allocation14_spill]] %s2285_s11 }
   0x6 LB: > { %2297 = sst [smem:[#allocation3_spill]] %s1901_s21  ;;  %s31_s26 = sadd.s32 1, %s1909_s23  ;;  %s1917_s25 = sphi %s2008_s25, %s22_s25   ;;  %s1913_s24 = sphi %s2006_s24, %s2318_s24   ;;  %s1909_s23 = sphi %s2004_s23, %s2317_s23   ;;  %s1905_s22 = sphi %s2002_s22, %s2316_s22   ;;  %s1901_s21 = sphi %s2000_s21, %s2315_s21  }
   0x7   : > { %2298 = sst [smem:[#allocation4_spill]] %s1909_s23  ;;  %s34_s27 = sadd.s32 1, %s1913_s24 }
   0x8   : > { %2299 = sst [smem:[#allocation5_spill]] %s1913_s24  ;;  %p32_p0 = scmp.ge.s32.totalorder %s31_s26, 2 }
   0x9   : > { %2300 = sst [smem:[#allocation6_spill]] %s1917_s25  ;;  %p1624_p1 = scmp.ge.s32.totalorder %s1917_s25, 1 }
   0xa   : > { %p462_p2 = scmp.lt.s32.totalorder %s1917_s25, 5  ;;  %s2320_s26 = smov (%p32_p0, %s31_s26), 0 }
   0xb   : > { %2301 = sst [smem:[#allocation7_spill]] %s2320_s26  ;;  %s2322_s27 = smov (!%p32_p0, %s34_s27), %s1913_s24 }
   0xc   : > { %p463_p3 = pnand %p1624_p1, %p462_p2  ;;  %p36_p4 = scmp.ge.s32.totalorder %s2322_s27, 2 }
   0xe   : > { %s2324_s27 = smov (%p36_p4, %s2322_s27), 0  ;;  %466 = sbr.rel (%p463_p3) target bundleno = 2942 (0xb7e), region = 68 }
   0xf   : > { %2302 = sst [smem:[#allocation8_spill]] %s2324_s27 }
  0x15   : > { %p541_p5 = scmp.lt.s32.totalorder %s1905_s22, 1  ;;  %p548_p6 = scmp.lt.s32.totalorder %s1901_s21, 1 }
  0x16   : > { %s2303_s0 = sld [smem:[#allocation10_spill]]  ;;  %s2304_s2 = sld [smem:[#allocation11_spill]] }
  0x17   : > { %s2326_s22 = smov (!%p541_p5, %s1905_s22), 1  ;;  %s2305_s3 = sld [smem:[#allocation12_spill]] }
  0x18   : > { %s2036_s28 = scalar_select %p548_p6, %s1901_s21, 1 }
  0x19   : > { %s1625_s29 = sshll.u32 %s2326_s22, 3  ;;  %s2306_s5 = sld [smem:[#allocation13_spill]] }
  0x1a   : > { %s1626_s18 = sshll.u32 %s2036_s28, 3  ;;  %s1667_s26 = sshll.u32 %s2036_s28, 4 }
  0x1b   : > { %s1670_s11 = sshll.u32 %s2036_s28, 5  ;;  %s583_s14 = scalar_lea.vmem %s2284_s10, %s2036_s28 }
  0x1c   : > { %s544_s17 = scalar_lea.vmem %s2303_s0, %s1625_s29  ;;  %s2050_s27 = scalar_lea.vmem %s2304_s2, %s1626_s18 }
  0x1d   : > { %s2056_s25 = scalar_lea.vmem %s2305_s3, %s1667_s26  ;;  %s567_s18 = scalar_lea.vmem %s2280_s6, %s2036_s28 }
  0x1e   : > { %s2074_s2 = scalar_lea.vmem %s2281_s7, %s1667_s26  ;;  %s575_s3 = scalar_lea.vmem %s2282_s8, %s2036_s28 }
  0x1f   : > { %s2065_s15 = scalar_lea.vmem %s2306_s5, %s1667_s26  ;;  %s2093_s19 = scalar_lea.vmem %s2286_s12, %s1625_s29 }
  0x20   : > { %2307 = sst [smem:[#allocation9_spill]] %s2065_s15  ;;  %s2088_s15 = scalar_lea.vmem %s2283_s9, %s1670_s11 }
  0x21   : > { %s2308_s26 = sld [smem:[#allocation3_spill]] }
  0x27   : > { %p1636_p7 = scmp.ne.s32.totalorder %s2308_s26, 0 }
  0x28   : > { %v593_v0 = vld [vmem:[%s544_s17] sm:$0xff] (!%p1636_p7)  ;;  %vm594_vm0 = vcmask (!%p1636_p7), 261120  }
  0x29   : > { %592 = sbr.rel (%p1636_p7) target bundleno = 48 (0x30), region = 72  ;;  %595 = vst.msk [vmem:[#allocation2] sm:$0xff] (!%p1636_p7), %vm594_vm0, %v593_v0 }
  0x30 PF: > { %v2096_v1 = vld [vmem:[#allocation2] sm:$0xff]  ;;  %vm599_vm1 = vcmask 261120   ;;  %v1919_v9 = vmov 0.0   ;;  %vm1920_vm2 = vmmov 0   ;;  %v1842_v10 = vld [vmem:[%s2056_s25 + $0x8] sm:$0xff]   ;;  %v618_v14 = vlaneseq  ;;  %s1921_s29 = smov 120   ;;  %s2310_s0 = scalar_lea.vmem %s2275_s1, %s2326_s22 }
  0x31   : > { %v600_v2 = vsel %vm599_vm1, %v2096_v1, 0.0  ;;  %v1841_v8 = vld [vmem:[%s2056_s25] sm:$0xff]   ;;  %1701 = vmatprep.subr.bf16.mxu0 %v1919_v9  ;;  %1705 = vmatprep.mubr.msk.bf16.mxu0 %vm1920_vm2, %v1919_v9  ;;  %s1922_s17 = smov 96   ;;  %s1923_s30 = smov 88   ;;  %vm713_vm5 = vcmask 64512   ;;  %vm777_vm6 = vcmask 1043456  }
  0x32   : > { %601 = vadd.xlane.f32.xlu0 %v600_v2  ;;  %1702 = vmatpush3.bf16.msra.mxu0 %v1841_v8  ;;  %v2112_v18 = vshrl.u32 %v618_v14, 7  ;;  %v2116_v22 = vld [vmem:[%s2050_s27] sm:$0x3f]  ;;  %s2309_s27 = scalar_lea.vmem %s2278_s4, %s2036_s28  ;;  %s1924_s20 = smov 80   ;;  %vm1164_vm7 = vcmask 130048   ;;  %vm1166_vm8 = vcmask 195584  }
  0x33   : > { %1709 = vmatprep.subr.bf16.mxu1 %v1919_v9  ;;  %1703 = vmatprep.subr.bf16.mxu0 %v1919_v9  ;;  %v1637_v31 = vld [vmem:[%s2309_s27] ss:$0 sm:$0xff]  ;;  %s1925_s23 = smov 112   ;;  %s1926_s24 = smov 72   ;;  %vm1369_vm11 = vcmask 523264  }
  0x34   : > { %1711 = vmatprep.mubr.msk.bf16.mxu1 %vm1920_vm2, %v1919_v9  ;;  %v620_v21 = vsub.s32 0, %v2112_v18  ;;  %v628_v24 = vsub.s32 1, %v2112_v18  ;;  %s1927_s11 = smov 104   ;;  %v1641_v49 = vld [vmem:[%s2310_s0] ss:$0 sm:$0xff]  ;;  %s1928_s22 = smov 64  }
  0x35   : > { %s1929_s16 = smov 56   ;;  %s1930_s26 = smov 48  }
  0x36   : > { %1704 = vmatpush3.bf16.msra.mxu0 %v1842_v10  ;;  %v621_v23 = vrot.slane %v2116_v22, %v620_v21  ;;  %v629_v26 = vrot.slane %v2116_v22, %v628_v24  ;;  %s1931_s5 = smov 40   ;;  %s2311_s25 = sld [smem:[#allocation9_spill]] }
  0x37   : > { %1715 = vmatprep.subr.bf16.mxu0 %v1919_v9  ;;  %s1932_s27 = smov 8  }
  0xbf   : > { %v602_v3 = vpop.xlane.xlu0 %601 }
  0xc0   : > { %v604_v4 = vmul.f32 0.03125, %v602_v3 }
  0xc2   : > { %v605_v5 = vsub.f32 %v2096_v1, %v604_v4 }
  0xc4   : > { %v606_v6 = vmul.f32 %v605_v5, %v605_v5  ;;  %v622_v25 = vmul.f32 %v621_v23, %v605_v5 }
  0xc6   : > { %v607_v7 = vsel %vm599_vm1, %v606_v6, 0.0 }
  0xc7   : > { %608 = vadd.xlane.f32.xlu0 %v607_v7 }
 0x154   : > { %v609_v11 = vpop.xlane.xlu0 %608 }
 0x155   : > { %v610_v12 = vmul.f32 0.032258064, %v609_v11 }
 0x157   : > { %1851 = vrsqrt.f32 %v610_v12  ;;  %vm613_vm3 = vcmp.eq.f32.partialorder %v610_v12, inf  ;;  %v616_v16 = vand.u32 2147483648, %v610_v12  ;;  %vm615_vm4 = vcmp.eq.f32.partialorder %v610_v12, 0.0 }
 0x161   : > { %v1852_v13 = vpop.eup %1851 }
 0x162   : > { %v612_v15 = vmul.f32 %v1852_v13, %v610_v12 }
 0x164   : > { %v614_v17 = vsel %vm613_vm3, %v610_v12, %v612_v15 }
 0x165   : > { %v617_v19 = vsel %vm615_vm4, %v616_v16, %v614_v17 }
 0x166   : > { %v623_v20 = vadd.f32 1e-06, %v617_v19 }
 0x168   : > { %1853 = vrcp.f32 %v623_v20 }
 0x172   : > { %v1854_v27 = vpop.eup %1853 }
 0x173   : > { %v625_v28 = vmul.f32 %v1854_v27, %v622_v25 }
 0x175   : > { %v630_v29 = vadd.f32 %v629_v26, %v625_v28 }
 0x177   : > { %v641_v30 = vpack.c.bf16 %v630_v29, %v630_v29 }
 0x179   : > { %1706 = vmatmul.mubr.msk.bf16.vlgmr.msra.gmra.mrb[0].mxu0 %vm599_vm1, %v641_v30 }
 0x17a   : > { %1717 = vmatprep.mubr.msk.bf16.mxu0 %vm1920_vm2, %v1919_v9 }
 0x24c   : > { %v697_v32 = vpop.f32.mrb[0].mxu0 }
 0x24d   : > { %v698_v33 = vadd.f32 %v1637_v31, %v697_v32  ;;  %v1707_v34 = vpop.f32.mrb[1].mxu0 }
 0x24e   : > { %v700_v35 = vpop.f32.mrb[2].mxu0 }
 0x24f   : > { %v2133_v36 = vpack.c.bf16 %v698_v33, %v698_v33  ;;  %v1708_v37 = vpop.f32.mrb[3].mxu0 }
 0x251   : > { %821 = vrot.lane.b32.xlu0 %v2133_v36, %s1921_s29  ;;  %711 = vrot.lane.b32.xlu1 %v2133_v36, %s1922_s17  ;;  %s1933_s29 = smov 16   ;;  %s1934_s17 = smov 24  }
 0x255   : > { %823 = vrot.lane.b32.xlu1 %v2133_v36, %s1923_s30 }
 0x259   : > { %933 = vrot.lane.b32.xlu1 %v2133_v36, %s1924_s20 }
 0x25d   : > { %931 = vrot.lane.b32.xlu1 %v2133_v36, %s1925_s23 }
 0x261   : > { %1043 = vrot.lane.b32.xlu1 %v2133_v36, %s1926_s24 }
 0x265   : > { %1041 = vrot.lane.b32.xlu1 %v2133_v36, %s1927_s11 }
 0x2c3   : > { %v712_v38 = vpop.permute.xlu1 %711  ;;  %v822_v43 = vpop.permute.xlu0 %821 }
 0x2c4   : > { %v718_v39 = vsel %vm713_vm5, %v712_v38, 0 }
 0x2c5   : > { %1710 = vmatpush3.bf16.xpose.msra.mxu1 %v718_v39 }
 0x2c6   : > { %1721 = vmatprep.subr.bf16.mxu1 %v1919_v9 }
 0x2c7   : > { %v824_v40 = vpop.permute.xlu1 %823 }
 0x2c8   : > { %v829_v41 = vsel %vm713_vm5, %v824_v40, 0 }
 0x2cb   : > { %v934_v42 = vpop.permute.xlu1 %933 }
 0x2cc   : > { %1712 = vmatmul.mubr.msk.bf16.vlgmr.msra.gmra.mrb[0].mxu1 %vm713_vm5, %v2133_v36  ;;  %v939_v45 = vsel %vm713_vm5, %v934_v42, 0 }
 0x2cd   : > { %1722 = vmatpush3.bf16.xpose.msra.mxu1 %v829_v41  ;;  %1723 = vmatprep.mubr.msk.bf16.mxu1 %vm1920_vm2, %v1919_v9 }
 0x2ce   : > { %1733 = vmatprep.subr.bf16.mxu1 %v1919_v9 }
 0x2cf   : > { %v932_v44 = vpop.permute.xlu1 %931 }
 0x2d3   : > { %v1044_v46 = vpop.permute.xlu1 %1043 }
 0x2d4   : > { %1724 = vmatmul.mubr.msk.bf16.vlgmr.msra.gmra.mrb[4].mxu1 %vm713_vm5, %v822_v43  ;;  %v1049_v47 = vsel %vm713_vm5, %v1044_v46, 0 }
 0x2d5   : > { %1734 = vmatpush3.bf16.xpose.msra.mxu1 %v939_v45  ;;  %1735 = vmatprep.mubr.msk.bf16.mxu1 %vm1920_vm2, %v1919_v9 }
 0x2d6   : > { %1745 = vmatprep.subr.bf16.mxu1 %v1919_v9 }
 0x2d7   : > { %v1042_v48 = vpop.permute.xlu1 %1041 }
 0x2dc   : > { %1736 = vmatmul.mubr.msk.bf16.vlgmr.msra.gmra.mrb[8].mxu1 %vm713_vm5, %v932_v44 }
 0x2dd   : > { %1746 = vmatpush3.bf16.xpose.msra.mxu1 %v1049_v47  ;;  %1747 = vmatprep.mubr.msk.bf16.mxu1 %vm1920_vm2, %v1919_v9 }
 0x2de   : > { %1757 = vmatprep.subr.bf16.mxu1 %v1919_v9 }
 0x2e4   : > { %1748 = vmatmul.mubr.msk.bf16.vlgmr.msra.gmra.mrb[12].mxu1 %vm713_vm5, %v1042_v48 }
 0x2e5   : > { %1761 = vmatprep.mubr.msk.bf16.mxu1 %vm1920_vm2, %v1919_v9 }
 0x39f   : > { %v754_v50 = vpop.f32.mrb[0].mxu1 }
 0x3a0   : > { %v755_v51 = vadd.f32 %v1641_v49, %v754_v50  ;;  %v1713_v52 = vpop.f32.mrb[1].mxu1 }
 0x3a1   : > { %v757_v53 = vpop.f32.mrb[2].mxu1 }
 0x3a2   : > { %v1714_v54 = vpop.f32.mrb[3].mxu1  ;;  %v760_v55 = vsel %vm713_vm5, %v755_v51, -inf }
 0x3a3   : > { %761 = vmax.xlane.f32.xlu1 %v760_v55 }
 0x3a7   : > { %v865_v56 = vpop.f32.mrb[4].mxu1 }
 0x3a8   : > { %v866_v57 = vadd.f32 %v1641_v49, %v865_v56  ;;  %v1725_v58 = vpop.f32.mrb[5].mxu1 }
 0x3a9   : > { %v868_v59 = vpop.f32.mrb[6].mxu1 }
 0x3aa   : > { %v1726_v60 = vpop.f32.mrb[7].mxu1  ;;  %v871_v61 = vsel %vm713_vm5, %v866_v57, -inf }
 0x3ab   : > { %872 = vmax.xlane.f32.xlu0 %v871_v61 }
 0x3af   : > { %v975_v62 = vpop.f32.mrb[8].mxu1 }
 0x3b0   : > { %v976_v63 = vadd.f32 %v1641_v49, %v975_v62  ;;  %v1737_v0 = vpop.f32.mrb[9].mxu1 }
 0x3b1   : > { %v978_v2 = vpop.f32.mrb[10].mxu1 }
 0x3b2   : > { %v1738_v3 = vpop.f32.mrb[11].mxu1  ;;  %v981_v4 = vsel %vm713_vm5, %v976_v63, -inf }
 0x3b3   : > { %982 = vmax.xlane.f32.xlu1 %v981_v4 }
 0x3b7   : > { %v1085_v5 = vpop.f32.mrb[12].mxu1 }
 0x3b8   : > { %v1086_v6 = vadd.f32 %v1641_v49, %v1085_v5  ;;  %v1749_v7 = vpop.f32.mrb[13].mxu1  ;;  %v1843_v5 = vld [vmem:[%s2311_s25] sm:$0xff]  }
 0x3b9   : > { %v1088_v8 = vpop.f32.mrb[14].mxu1  ;;  %1758 = vmatpush3.bf16.msra.mxu1 %v1843_v5 }
 0x3ba   : > { %v1750_v10 = vpop.f32.mrb[15].mxu1  ;;  %v1091_v11 = vsel %vm713_vm5, %v1086_v6, -inf  ;;  %1759 = vmatprep.subr.bf16.mxu1 %v1919_v9 }
 0x3bb   : > { %1092 = vmax.xlane.f32.xlu0 %v1091_v11 }
 0x430   : > { %v762_v12 = vpop.xlane.xlu1 %761 }
 0x431   : > { %v763_v13 = vsub.f32 %v755_v51, %v762_v12 }
 0x433   : > { %v764_v14 = vmul.f32 1.442695, %v763_v13 }
 0x435   : > { %1855 = vpow2.f32 %v764_v14 }
 0x438   : > { %v873_v15 = vpop.xlane.xlu0 %872 }
 0x439   : > { %v874_v16 = vsub.f32 %v866_v57, %v873_v15 }
 0x43b   : > { %v875_v17 = vmul.f32 1.442695, %v874_v16 }
 0x43d   : > { %1857 = vpow2.f32 %v875_v17 }
 0x43f   : > { %v1856_v19 = vpop.eup %1855 }
 0x440   : > { %v766_v20 = vsel %vm713_vm5, %v1856_v19, 0.0  ;;  %v983_v31 = vpop.xlane.xlu1 %982 }
 0x441   : > { %767 = vadd.xlane.f32.xlu1 %v766_v20  ;;  %v984_v32 = vsub.f32 %v976_v63, %v983_v31 }
 0x443   : > { %v985_v33 = vmul.f32 1.442695, %v984_v32 }
 0x447   : > { %v1858_v23 = vpop.eup %1857 }
 0x448   : > { %v1093_v25 = vpop.xlane.xlu0 %1092  ;;  %v877_v26 = vsel %vm713_vm5, %v1858_v23, 0.0 }
 0x449   : > { %v1094_v27 = vsub.f32 %v1086_v6, %v1093_v25  ;;  %878 = vadd.xlane.f32.xlu0 %v877_v26  ;;  %v1844_v6 = vld [vmem:[%s2311_s25 + $0x8] sm:$0xff]  }
 0x44a   : > { %1760 = vmatpush3.bf16.msra.mxu1 %v1844_v6 }
 0x44b   : > { %v1095_v28 = vmul.f32 1.442695, %v1094_v27  ;;  %1773 = vmatprep.subr.bf16.mxu1 %v1919_v9  ;;  %v1650_v27 = vld [vmem:[%s567_s18] ss:$0 sm:$0xff] }
 0x44d   : > { %1859 = vpow2.f32 %v1095_v28 }
 0x44e   : > { %1861 = vpow2.f32 %v985_v33 }
 0x452   : > { %772 = vrot.lane.b32.xlu1 %v2133_v36, %s1928_s22 }
 0x457   : > { %v1860_v29 = vpop.eup %1859 }
 0x458   : > { %v1097_v30 = vsel %vm713_vm5, %v1860_v29, 0.0  ;;  %v1862_v34 = vpop.eup %1861 }
 0x459   : > { %1098 = vadd.xlane.f32.xlu0 %v1097_v30  ;;  %v987_v35 = vsel %vm713_vm5, %v1862_v34, 0.0 }
 0x46f   : > { %883 = vrot.lane.b32.xlu0 %v2133_v36, %s1929_s16 }
 0x476   : > { %988 = vadd.xlane.f32.xlu1 %v987_v35 }
 0x487   : > { %993 = vrot.lane.b32.xlu1 %v2133_v36, %s1930_s26 }
 0x48b   : > { %1103 = vrot.lane.b32.xlu1 %v2133_v36, %s1931_s5 }
 0x4ce   : > { %v768_v37 = vpop.xlane.xlu1 %767 }
 0x4cf   : > { %1863 = vrcp.f32 %v768_v37 }
 0x4d2   : > { %v773_v38 = vpop.permute.xlu1 %772 }
 0x4d3   : > { %v779_v39 = vsel %vm777_vm6, %v773_v38, 0 }
 0x4d4   : > { %1716 = vmatpush3.bf16.msra.mxu0 %v779_v39 }
 0x4d5   : > { %1727 = vmatprep.subr.bf16.mxu0 %v1919_v9 }
 0x4d6   : > { %v879_v41 = vpop.xlane.xlu0 %878 }
 0x4d7   : > { %1865 = vrcp.f32 %v879_v41  ;;  %v1845_v41 = vld [vmem:[%s2074_s2] sm:$0xff]  }
 0x4d9   : > { %v1864_v40 = vpop.eup %1863 }
 0x4da   : > { %v770_v42 = vmul.f32 %v1864_v40, %v1856_v19 }
 0x4dc   : > { %v771_v43 = vpack.c.bf16 %v770_v42, %v770_v42  ;;  %v1846_v42 = vld [vmem:[%s2074_s2 + $0x8] sm:$0xff]  }
 0x4de   : > { %1718 = vmatmul.mubr.msk.bf16.vlgmr.msra.gmra.mrb[4].mxu0 %vm713_vm5, %v771_v43  ;;  %v1848_v43 = vld [vmem:[%s2088_s15 + $0x8] sm:$0xff]  }
 0x4df   : > { %1729 = vmatprep.mubr.msk.bf16.mxu0 %vm1920_vm2, %v1919_v9 }
 0x4e1   : > { %v1866_v36 = vpop.eup %1865 }
 0x4e2   : > { %v881_v45 = vmul.f32 %v1866_v36, %v1858_v23 }
 0x4e4   : > { %v882_v48 = vpack.c.bf16 %v881_v45, %v881_v45 }
 0x4e6   : > { %v1099_v44 = vpop.xlane.xlu0 %1098 }
 0x4ea   : > { %v884_v46 = vpop.permute.xlu0 %883 }
 0x4eb   : > { %v889_v47 = vsel %vm777_vm6, %v884_v46, 0 }
 0x4ec   : > { %1728 = vmatpush3.bf16.msra.mxu0 %v889_v47 }
 0x4ed   : > { %1739 = vmatprep.subr.bf16.mxu0 %v1919_v9 }
 0x4ef   : > { %1730 = vmatmul.mubr.msk.bf16.vlgmr.msra.gmra.mrb[8].mxu0 %vm713_vm5, %v882_v48 }
 0x4f0   : > { %1741 = vmatprep.mubr.msk.bf16.mxu0 %vm1920_vm2, %v1919_v9 }
 0x503   : > { %v989_v49 = vpop.xlane.xlu1 %988 }
 0x504   : > { %1867 = vrcp.f32 %v989_v49 }
 0x505   : > { %1869 = vrcp.f32 %v1099_v44 }
 0x507   : > { %v994_v50 = vpop.permute.xlu1 %993 }
 0x508   : > { %v999_v51 = vsel %vm777_vm6, %v994_v50, 0 }
 0x509   : > { %1740 = vmatpush3.bf16.msra.mxu0 %v999_v51  ;;  %v1250_v51 = vsub.s32 2, %v2112_v18 }
 0x50a   : > { %1751 = vmatprep.subr.bf16.mxu0 %v1919_v9 }
 0x50b   : > { %v1104_v54 = vpop.permute.xlu1 %1103 }
 0x50c   : > { %v1109_v57 = vsel %vm777_vm6, %v1104_v54, 0 }
 0x50e   : > { %v1868_v52 = vpop.eup %1867 }
 0x50f   : > { %v991_v53 = vmul.f32 %v1868_v52, %v1862_v34  ;;  %v1870_v56 = vpop.eup %1869  ;;  %v1251_v52 = vrot.slane %v2116_v22, %v1250_v51 }
 0x510   : > { %v1101_v58 = vmul.f32 %v1870_v56, %v1860_v29 }
 0x511   : > { %v992_v55 = vpack.c.bf16 %v991_v53, %v991_v53  ;;  %v1258_v53 = vsub.s32 3, %v2112_v18 }
 0x512   : > { %v1102_v59 = vpack.c.bf16 %v1101_v58, %v1101_v58 }
 0x513   : > { %1742 = vmatmul.mubr.msk.bf16.vlgmr.msra.gmra.mrb[12].mxu0 %vm713_vm5, %v992_v55  ;;  %v1259_v55 = vrot.slane %v2116_v22, %v1258_v53 }
 0x514   : > { %1752 = vmatpush3.bf16.msra.mxu0 %v1109_v57  ;;  %1753 = vmatprep.mubr.msk.bf16.mxu0 %vm1920_vm2, %v1919_v9 }
 0x515   : > { %1765 = vmatprep.subr.bf16.mxu0 %v1919_v9 }
 0x51b   : > { %1754 = vmatmul.mubr.msk.bf16.vlgmr.msra.gmra.mrb[16].mxu0 %vm713_vm5, %v1102_v59 }
 0x51c   : > { %1769 = vmatprep.mubr.msk.bf16.mxu0 %vm1920_vm2, %v1919_v9  ;;  %1766 = vmatpush3.bf16.msra.mxu0 %v1845_v41 }
 0x51d   : > { %1767 = vmatprep.subr.bf16.mxu0 %v1919_v9 }
 0x520   : > { %1768 = vmatpush3.bf16.msra.mxu0 %v1846_v42 }
 0x5b1   : > { %v815_v60 = vpop.f32.mrb[4].mxu0 }
 0x5b2   : > { %v1719_v61 = vpop.f32.mrb[5].mxu0 }
 0x5b3   : > { %v818_v62 = vpop.f32.mrb[6].mxu0  ;;  %v1850_v61 = vld [vmem:[%s2088_s15 + $0x18] sm:$0xff]  }
 0x5b4   : > { %v1720_v63 = vpop.f32.mrb[7].mxu0  ;;  %v1654_v62 = vld [vmem:[%s575_s3] ss:$0 sm:$0xff]  ;;  %s2312_s3 = sld [smem:[#allocation3_spill]] }
 0x5ba   : > { %p1664_p8 = scmp.ne.s32.totalorder %s2312_s3, 1 }
 0x5c2   : > { %v925_v0 = vpop.f32.mrb[8].mxu0 }
 0x5c3   : > { %1152 = vrot.lane.b32.xlu0 %v925_v0, %s1932_s27  ;;  %v1731_v2 = vpop.f32.mrb[9].mxu0 }
 0x5c4   : > { %v928_v3 = vpop.f32.mrb[10].mxu0 }
 0x5c5   : > { %v1732_v4 = vpop.f32.mrb[11].mxu0 }
 0x5e6   : > { %v1035_v7 = vpop.f32.mrb[12].mxu0 }
 0x5e7   : > { %1156 = vrot.lane.b32.xlu1 %v1035_v7, %s1933_s29  ;;  %v1743_v8 = vpop.f32.mrb[13].mxu0 }
 0x5e8   : > { %v1038_v10 = vpop.f32.mrb[14].mxu0 }
 0x5e9   : > { %v1744_v11 = vpop.f32.mrb[15].mxu0 }
 0x5ee   : > { %v1145_v12 = vpop.f32.mrb[16].mxu0 }
 0x5ef   : > { %1160 = vrot.lane.b32.xlu0 %v1145_v12, %s1934_s17  ;;  %v1755_v13 = vpop.f32.mrb[17].mxu0 }
 0x5f0   : > { %v1148_v14 = vpop.f32.mrb[18].mxu0 }
 0x5f1   : > { %v1756_v15 = vpop.f32.mrb[19].mxu0 }
 0x635   : > { %v1153_v16 = vpop.permute.xlu0 %1152 }
 0x636   : > { %v1163_v19 = vsel %vm713_vm5, %v815_v60, %v1153_v16  ;;  %v1849_v60 = vld [vmem:[%s2088_s15 + $0x10] sm:$0xff]  }
 0x659   : > { %v1157_v17 = vpop.permute.xlu1 %1156 }
 0x65a   : > { %v1165_v20 = vsel %vm1164_vm7, %v1163_v19, %v1157_v17 }
 0x661   : > { %v1161_v23 = vpop.permute.xlu0 %1160 }
 0x662   : > { %v1167_v25 = vsel %vm1166_vm8, %v1165_v20, %v1161_v23 }
 0x663   : > { %v1168_v26 = vpack.c.bf16 %v1167_v25, %v1167_v25 }
 0x665   : > { %1762 = vmatmul.mubr.msk.bf16.vlgmr.msra.gmra.mrb[16].mxu1 %vm599_vm1, %v1168_v26 }
 0x666   : > { %1781 = vmatprep.mubr.msk.bf16.mxu1 %vm1920_vm2, %v1919_v9 }
 0x738   : > { %v1224_v28 = vpop.f32.mrb[16].mxu1 }
 0x739   : > { %v1225_v29 = vadd.f32 %v1650_v27, %v1224_v28  ;;  %v1763_v30 = vpop.f32.mrb[17].mxu1 }
 0x73a   : > { %v1227_v31 = vpop.f32.mrb[18].mxu1 }
 0x73b   : > { %v2214_v32 = vadd.f32 %v1225_v29, %v2096_v1  ;;  %v1764_v33 = vpop.f32.mrb[19].mxu1  ;;  %v1847_v1 = vld [vmem:[%s2088_s15] sm:$0xff]  }
 0x73c   : > { %1774 = vmatpush3.bf16.msra.mxu1 %v1847_v1 }
 0x73d   : > { %v1231_v34 = vsel %vm599_vm1, %v2214_v32, 0.0  ;;  %1775 = vmatprep.subr.bf16.mxu1 %v1919_v9 }
 0x73e   : > { %1232 = vadd.xlane.f32.xlu1 %v1231_v34 }
 0x740   : > { %1776 = vmatpush3.bf16.msra.mxu1 %v1848_v43 }
 0x741   : > { %1777 = vmatprep.subr.bf16.mxu1 %v1919_v9 }
 0x744   : > { %1778 = vmatpush3.bf16.msra.mxu1 %v1849_v60 }
 0x745   : > { %1779 = vmatprep.subr.bf16.mxu1 %v1919_v9  ;;  %v1658_v9 = vld [vmem:[%s583_s14] ss:$0 sm:$0xff]  ;;  %s2313_s14 = sld [smem:[#allocation14_spill]] (!%p1664_p8) }
 0x748   : > { %1780 = vmatpush3.bf16.msra.mxu1 %v1850_v61 }
 0x74b   : > { %v1419_v31 = vld [vmem:[%s2313_s14] sm:$0x3] (!%p1664_p8) }
 0x74c   : > { %v1448_v34 = vrot.slane (!%p1664_p8), %v1419_v31, %v628_v24 }
 0x7cb   : > { %v1233_v35 = vpop.xlane.xlu1 %1232 }
 0x7cc   : > { %v1234_v37 = vmul.f32 0.03125, %v1233_v35 }
 0x7ce   : > { %v1235_v38 = vsub.f32 %v2214_v32, %v1234_v37 }
 0x7d0   : > { %v1236_v39 = vmul.f32 %v1235_v38, %v1235_v38  ;;  %v1252_v54 = vmul.f32 %v1251_v52, %v1235_v38 }
 0x7d2   : > { %v1237_v40 = vsel %vm599_vm1, %v1236_v39, 0.0 }
 0x7d3   : > { %1238 = vadd.xlane.f32.xlu0 %v1237_v40 }
 0x860   : > { %v1239_v36 = vpop.xlane.xlu0 %1238 }
 0x861   : > { %v1240_v44 = vmul.f32 0.032258064, %v1239_v36 }
 0x863   : > { %1871 = vrsqrt.f32 %v1240_v44  ;;  %vm1243_vm9 = vcmp.eq.f32.partialorder %v1240_v44, inf  ;;  %v1246_v47 = vand.u32 2147483648, %v1240_v44  ;;  %vm1245_vm10 = vcmp.eq.f32.partialorder %v1240_v44, 0.0 }
 0x86d   : > { %v1872_v45 = vpop.eup %1871 }
 0x86e   : > { %v1242_v46 = vmul.f32 %v1872_v45, %v1240_v44 }
 0x870   : > { %v1244_v48 = vsel %vm1243_vm9, %v1240_v44, %v1242_v46 }
 0x871   : > { %v1247_v49 = vsel %vm1245_vm10, %v1246_v47, %v1244_v48 }
 0x872   : > { %v1253_v50 = vadd.f32 1e-06, %v1247_v49 }
 0x874   : > { %1873 = vrcp.f32 %v1253_v50 }
 0x87e   : > { %v1874_v56 = vpop.eup %1873 }
 0x87f   : > { %v1255_v57 = vmul.f32 %v1874_v56, %v1252_v54 }
 0x881   : > { %v1260_v58 = vadd.f32 %v1259_v55, %v1255_v57 }
 0x883   : > { %v1275_v59 = vpack.c.bf16 %v1260_v58, %v1260_v58 }
 0x885   : > { %1770 = vmatmul.mubr.msk.bf16.vlgmr.msra.gmra.mrb[20].mxu0 %vm599_vm1, %v1275_v59 }
 0x958   : > { %v1331_v63 = vpop.f32.mrb[20].mxu0 }
 0x959   : > { %v1332_v22 = vadd.f32 %v1654_v62, %v1331_v63  ;;  %v1771_v0 = vpop.f32.mrb[21].mxu0 }
 0x95a   : > { %v1334_v2 = vpop.f32.mrb[22].mxu0 }
 0x95b   : > { %v1337_v3 = vmax.f32 %v1332_v22, 0.0  ;;  %v1772_v4 = vpop.f32.mrb[23].mxu0 }
 0x95d   : > { %v1338_v5 = vpack.c.bf16 %v1337_v3, %v1337_v3 }
 0x95f   : > { %1782 = vmatmul.mubr.msk.bf16.vlgmr.msra.gmra.mrb[20].mxu1 %vm1369_vm11, %v1338_v5 }
 0xa31   : > { %1418 = sbr.rel (%p1664_p8) target bundleno = 2942 (0xb7e), region = 76 }
 0xa32   : > { %v1407_v6 = vpop.f32.mrb[20].mxu1 }
 0xa33   : > { %v1408_v7 = vadd.f32 %v1658_v9, %v1407_v6  ;;  %v1783_v8 = vpop.f32.mrb[21].mxu1 }
 0xa34   : > { %v1410_v10 = vpop.f32.mrb[22].mxu1 }
 0xa35   : > { %v1413_v11 = vadd.f32 %v1408_v7, %v2214_v32  ;;  %v1784_v12 = vpop.f32.mrb[23].mxu1  ;;  %v1440_v32 = vrot.slane (!%p1664_p8), %v1419_v31, %v620_v21 }
 0xa37   : > { %1414 = vst.msk [vmem:[#allocation2] sm:$0xff] %vm599_vm1, %v1413_v11  ;;  %v1420_v13 = vsel (!%p1664_p8), %vm599_vm1, %v1413_v11, 0.0 }
 0xa38   : > { %1421 = vadd.xlane.f32.xlu0 %v1420_v13 }
 0xac5   : > { %v1422_v14 = vpop.xlane.xlu0 %1421 }
 0xac6   : > { %v1423_v15 = vmul.f32 0.03125, %v1422_v14 }
 0xac8   : > { %v1424_v16 = vsub.f32 %v1413_v11, %v1423_v15 }
 0xaca   : > { %v1425_v17 = vmul.f32 %v1424_v16, %v1424_v16  ;;  %v1441_v33 = vmul.f32 %v1440_v32, %v1424_v16 }
 0xacc   : > { %v1426_v19 = vsel %vm599_vm1, %v1425_v17, 0.0 }
 0xacd   : > { %1427 = vadd.xlane.f32.xlu0 %v1426_v19 }
 0xb5a   : > { %v1428_v20 = vpop.xlane.xlu0 %1427 }
 0xb5b   : > { %v1429_v23 = vmul.f32 0.032258064, %v1428_v20 }
 0xb5d   : > { %1875 = vrsqrt.f32 %v1429_v23  ;;  %vm1432_vm12 = vcmp.eq.f32.partialorder %v1429_v23, inf  ;;  %v1435_v27 = vand.u32 2147483648, %v1429_v23  ;;  %vm1434_vm13 = vcmp.eq.f32.partialorder %v1429_v23, 0.0 }
 0xb67   : > { %v1876_v25 = vpop.eup %1875 }
 0xb68   : > { %v1431_v26 = vmul.f32 %v1876_v25, %v1429_v23 }
 0xb6a   : > { %v1433_v28 = vsel %vm1432_vm12, %v1429_v23, %v1431_v26 }
 0xb6b   : > { %v1436_v29 = vsel %vm1434_vm13, %v1435_v27, %v1433_v28 }
 0xb6c   : > { %v1442_v30 = vadd.f32 1e-06, %v1436_v29 }
 0xb6e   : > { %1877 = vrcp.f32 %v1442_v30 }
 0xb78   : > { %v1878_v35 = vpop.eup %1877 }
 0xb79   : > { %v1444_v37 = vmul.f32 %v1878_v35, %v1441_v33 }
 0xb7b   : > { %v1449_v38 = vadd.f32 %v1448_v34, %v1444_v37 }
 0xb7d   : > { %1450 = vst.msk [vmem:[%s2093_s19] sm:$0xff] %vm599_vm1, %v1449_v38 }
 0xb7e PF: > { %s2314_s11 = sld [smem:[#allocation6_spill]]  ;;  %s2315_s21 = sld [smem:[#allocation4_spill]] }
 0xb7f   : > { %s2316_s22 = sld [smem:[#allocation5_spill]]  ;;  %s2317_s23 = sld [smem:[#allocation7_spill]] }
 0xb80   : > { %s2318_s24 = sld [smem:[#allocation8_spill]] }
 0xb84   : > { %s22_s25 = sadd.s32 1, %s2314_s11  }
 0xb85   : > { %p19_p9 = scmp.ge.s32.totalorder %s22_s25, 6  }
 0xb87   :  { %21 = sbr.rel (!%p19_p9) target bundleno = 6 (0x6), region = 136 }

// kernel: transformer_forward.3
= control target key start
LH: loop header
LB: loop body
LE: loop exit
PB: predicated region body
PF: predicated region fallthrough
CT: control target
= control target key end

     0   :  { %s4129_s0 = inlined_call_operand.vmem [shape: f32[2,8,32], index: 0, kind: input, shape index: {}]   ;;  %s4130_s1 = inlined_call_operand.vmem [shape: f32[2,8,32], index: 1, kind: input, shape index: {}]   ;;  %s4131_s2 = inlined_call_operand.vmem [shape: f32[2,8,8], index: 2, kind: input, shape index: {}]   ;;  %s4132_s3 = inlined_call_operand.vmem [shape: f32[2,1,8], index: 3, kind: input, shape index: {}]   ;;  %s4133_s4 = inlined_call_operand.vmem [shape: f32[2,6,32], index: 4, kind: input, shape index: {}]   ;;  %s4134_s5 = inlined_call_operand.vmem [shape: bf16[2,32,96], index: 5, kind: input, shape index: {}]   ;;  %s4135_s6 = inlined_call_operand.vmem [shape: f32[2,1,96], index: 6, kind: input, shape index: {}]   ;;  %s4136_s7 = inlined_call_operand.vmem [shape: bf16[2,32,32], index: 7, kind: input, shape index: {}]   ;;  %s4137_s8 = inlined_call_operand.vmem [shape: f32[2,1,32], index: 8, kind: input, shape index: {}]   ;;  %s4138_s9 = inlined_call_operand.vmem [shape: bf16[2,32,32], index: 9, kind: input, shape index: {}]   ;;  %s4139_s10 = inlined_call_operand.vmem [shape: f32[2,1,32], index: 10, kind: input, shape index: {}]   ;;  %s4140_s11 = inlined_call_operand.vmem [shape: bf16[2,32,64], index: 11, kind: input, shape index: {}]   ;;  %s4141_s12 = inlined_call_operand.vmem [shape: f32[2,1,64], index: 12, kind: input, shape index: {}]   ;;  %s4142_s13 = inlined_call_operand.vmem [shape: bf16[2,32,32], index: 13, kind: input, shape index: {}]   ;;  %s4143_s14 = inlined_call_operand.vmem [shape: f32[2,1,32], index: 14, kind: input, shape index: {}]   ;;  %s4144_s15 = inlined_call_operand.vmem [shape: bf16[2,32,64], index: 15, kind: input, shape index: {}]   ;;  %s4145_s16 = inlined_call_operand.vmem [shape: f32[2,1,64], index: 16, kind: input, shape index: {}]   ;;  %s4146_s17 = inlined_call_operand.vmem [shape: bf16[2,64,32], index: 17, kind: input, shape index: {}]   ;;  %s4147_s18 = inlined_call_operand.vmem [shape: f32[2,1,32], index: 18, kind: input, shape index: {}]   ;;  %s4148_s19 = inlined_call_operand.vmem [shape: f32[2,32], index: 19, kind: input, shape index: {}]   ;;  %s4149_s20 = inlined_call_operand.vmem [shape: bf16[32,128], index: 20, kind: input, shape index: {}]   ;;  %s4150_s21 = inlined_call_operand.vmem [shape: f32[1,128], index: 21, kind: input, shape index: {}]   ;;  %s4151_s22 = inlined_call_operand.hbm [shape: f32[2,8,128], index: 22, kind: output, shape index: {}]  }
   0x1   :  { %4172 = sst [smem:[#allocation22_spill]] %s4129_s0 }
   0x2   :  { %4173 = sst [smem:[#allocation23_spill]] %s4130_s1 }
   0x3   :  { %4174 = sst [smem:[#allocation24_spill]] %s4131_s2 }
   0x4   :  { %4175 = sst [smem:[#allocation25_spill]] %s4132_s3 }
   0x5   :  { %4176 = sst [smem:[#allocation26_spill]] %s4133_s4 }
   0x6   :  { %4177 = sst [smem:[#allocation27_spill]] %s4134_s5 }
   0x7   :  { %4178 = sst [smem:[#allocation28_spill]] %s4135_s6 }
   0x8   :  { %4179 = sst [smem:[#allocation29_spill]] %s4136_s7 }
   0x9   :  { %4180 = sst [smem:[#allocation30_spill]] %s4138_s9 }
   0xa   :  { %4181 = sst [smem:[#allocation31_spill]] %s4139_s10 }
   0xb   :  { %4182 = sst [smem:[#allocation32_spill]] %s4140_s11 }
   0xc   :  { %4183 = sst [smem:[#allocation33_spill]] %s4141_s12 }
   0xd   :  { %4184 = sst [smem:[#allocation34_spill]] %s4142_s13 }
   0xe   :  { %4185 = sst [smem:[#allocation35_spill]] %s4145_s16 }
   0xf   :  { %4186 = sst [smem:[#allocation36_spill]] %s4146_s17 }
  0x10   :  { %4187 = sst [smem:[#allocation37_spill]] %s4147_s18 }
  0x11   :  { %4188 = sst [smem:[#allocation38_spill]] %s4148_s19 }
  0x12   :  { %4189 = sst [smem:[#allocation39_spill]] %s4149_s20 }
  0x13   :  { %4190 = sst [smem:[#allocation40_spill]] %s4150_s21 }
  0x14   :  { %4191 = sst [smem:[#allocation41_spill]] %s4151_s22 }
  0x15   :  { %27 = vsyncpa [#allocation4], 0 }
  0x16   :  { %29 = vsyncpa [#allocation4 + $0x1], 0  ;;  %s3584_s3 = smov 0   ;;  %s3586_s28 = smov 0  }
  0x17   :  { %s3588_s29 = smov 0   ;;  %s3590_s30 = smov 0  }
  0x18   :  { %s3592_s4 = smov 0   ;;  %s3594_s0 = smov 0  }
  0x19   :  { %s3596_s23 = smov 0   ;;  %s3598_s1 = smov 0  }
  0x1a LB: > { %4192 = sst [smem:[#allocation6_spill]] %s3420_s3  ;;  %s2889_s5 = sadd.s32 4294967295, %s3448_s1   ;;  %s3448_s1 = sphi %s3598_s1, %s35_s1   ;;  %s3444_s23 = sphi %s3596_s23, %s4264_s23   ;;  %s3440_s0 = sphi %s3594_s0, %s4263_s0   ;;  %s3436_s4 = sphi %s3592_s4, %s4262_s4   ;;  %s3432_s30 = sphi %s3590_s30, %s4261_s30   ;;  %s3428_s29 = sphi %s3588_s29, %s4260_s29   ;;  %s3424_s28 = sphi %s3586_s28, %s4259_s28   ;;  %s3420_s3 = sphi %s3584_s3, %s4258_s3  }
  0x1b   : > { %4193 = sst [smem:[#allocation7_spill]] %s3424_s28  ;;  %s2890_s24 = sadd.s32 4294967294, %s3448_s1  }
  0x1c   : > { %4194 = sst [smem:[#allocation8_spill]] %s3428_s29  ;;  %s44_s6 = sadd.s32 1, %s3440_s0 }
  0x1d   : > { %4195 = sst [smem:[#allocation9_spill]] %s3432_s30  ;;  %p45_p0 = scmp.ge.s32.totalorder %s44_s6, 2 }
  0x1e   : > { %4196 = sst [smem:[#allocation10_spill]] %s3436_s4  ;;  %s47_s25 = sadd.s32 1, %s3444_s23 }
  0x1f   : > { %4197 = sst [smem:[#allocation11_spill]] %s3440_s0  ;;  %p621_p1 = scmp.ne.s32.totalorder %s3428_s29, %s3424_s28 }
  0x20   : > { %4198 = sst [smem:[#allocation12_spill]] %s3444_s23  ;;  %p622_p2 = scmp.eq.s32.totalorder %s2889_s5, 3 }
  0x21   : > { %4199 = sst [smem:[#allocation13_spill]] %s3448_s1  ;;  %s4266_s6 = smov (%p45_p0, %s44_s6), 0 }
  0x22   : > { %4200 = sst [smem:[#allocation14_spill]] %s4266_s6  ;;  %s4268_s25 = smov (!%p45_p0, %s47_s25), %s3444_s23 }
  0x23   : > { %p3633_p3 = por %p622_p2, %p621_p1  ;;  %p627_p4 = scmp.ne.s32.totalorder %s3424_s28, %s3420_s3 }
  0x24   : > { %p49_p5 = scmp.ge.s32.totalorder %s4268_s25, 2  ;;  %p628_p6 = scmp.eq.s32.totalorder %s2890_s24, 3 }
  0x25   : > { %s4201_s26 = scalar_select %p3633_p3, 1, 0 }
  0x26   : > { %p2893_p7 = scmp.ge.s32.totalorder %s3448_s1, 1  ;;  %p787_p8 = scmp.lt.s32.totalorder %s3448_s1, 5 }
  0x27   : > { %4202 = sst [smem:[#allocation15_spill]] %s4201_s26  ;;  %s4270_s25 = smov (%p49_p5, %s4268_s25), 0 }
  0x28   : > { %4203 = sst [smem:[#allocation16_spill]] %s4270_s25  ;;  %p3643_p9 = por %p628_p6, %p627_p4 }
  0x29   : > { %p788_p10 = pnand %p2893_p7, %p787_p8  ;;  %s608_s27 = ssub.s32 %s3444_s23, %s4270_s25 }
  0x2a   : > { %s4204_s2 = scalar_select %p3643_p9, 1, 0 }
  0x2b   : > { %s611_s5 = sadd.s32 1, %s3428_s29  ;;  %p609_p11 = scmp.eq.s32.totalorder %s608_s27, 0 }
  0x2c   : > { %4205 = sst [smem:[#allocation17_spill]] %s4204_s2  ;;  %791 = sbr.rel (%p788_p10) target bundleno = 5004 (0x138c), region = 108 }
  0x2d   : > { %s3651_s6 = scalar_select %p609_p11, %s3428_s29, %s611_s5  }
  0x2f   : > { %4206 = sst [smem:[#allocation18_spill]] %s3651_s6 }
  0x33   : > { %s4156_s24 = sand.u32 1, %s3424_s28   ;;  %p919_p12 = scmp.lt.s32.totalorder %s3436_s4, 1 }
  0x34   : > { %s3657_s0 = sshll.u32 %s4156_s24, 3  ;;  %p934_p13 = scmp.lt.s32.totalorder %s3432_s30, 1 }
  0x35   : > { %s3661_s2 = scalar_select %p919_p12, %s3436_s4, 1 }
  0x36   : > { %s3664_s27 = scalar_select %p934_p13, %s3432_s30, 1 }
  0x37   : > { %4207 = sst [smem:[#allocation19_spill]] %s3661_s2  ;;  %s3667_s5 = sshll.u32 %s3661_s2, 3 }
  0x38   : > { %4208 = sst [smem:[#allocation20_spill]] %s3667_s5  ;;  %s4210_s1 = sld [smem:[#allocation22_spill]] }
  0x39   : > { %s2898_s23 = sshll.u32 %s3664_s27, 3  ;;  %s4213_s16 = sld [smem:[#allocation26_spill]] }
  0x3a   : > { %s2970_s3 = sshll.u32 %s3664_s27, 4  ;;  %s4214_s24 = sld [smem:[#allocation27_spill]] }
  0x3b   : > { %s4216_s7 = sld [smem:[#allocation29_spill]]  ;;  %s4217_s9 = sld [smem:[#allocation30_spill]] }
  0x3c   : > { %s4219_s11 = sld [smem:[#allocation32_spill]]  ;;  %s4221_s13 = sld [smem:[#allocation34_spill]] }
  0x3d   : > { %s2976_s21 = sshll.u32 %s3664_s27, 5  ;;  %s4224_s10 = sld [smem:[#allocation37_spill]] }
  0x3e   : > { %s922_s22 = scalar_lea.vmem %s4210_s1, %s3667_s5  ;;  %s3740_s5 = scalar_lea.vmem %s4144_s15, %s2970_s3 }
  0x3f   : > { %s3689_s6 = scalar_lea.vmem %s4213_s16, %s2898_s23  ;;  %s918_s2 = scalar_lea.vmem [#allocation3], %s3657_s0 }
  0x40   : > { %s3695_s28 = scalar_lea.vmem %s4214_s24, %s2970_s3  ;;  %s4226_s23 = sld [smem:[#allocation9_spill]] }
  0x41   : > { %s3704_s17 = scalar_lea.vmem %s4216_s7, %s2970_s3  ;;  %s3713_s29 = scalar_lea.vmem %s4217_s9, %s2970_s3 }
  0x42   : > { %s3722_s19 = scalar_lea.vmem %s4219_s11, %s2970_s3  ;;  %s3731_s16 = scalar_lea.vmem %s4221_s13, %s2970_s3 }
  0x43   : > { %4222 = sst [smem:[#allocation21_spill]] %s3731_s16  ;;  %s977_s7 = scalar_lea.vmem %s4143_s14, %s3664_s27 }
  0x44   : > { %s4223_s9 = sld [smem:[#allocation35_spill]]  ;;  %s993_s18 = scalar_lea.vmem %s4224_s10, %s3664_s27 }
  0x45   : > { %s4225_s16 = sld [smem:[#allocation36_spill]] }
  0x46   : > { %p2913_p0 = scmp.ne.s32.totalorder %s4226_s23, 0 }
  0x47   : > { %v999_v0 = vld [vmem:[%s922_s22] sm:$0xff] (!%p2913_p0)  ;;  %vm1000_vm0 = vcmask (!%p2913_p0), 261120  }
  0x48   : > { %998 = sbr.rel (%p2913_p0) target bundleno = 79 (0x4f), region = 112  ;;  %1001 = vst.msk [vmem:[#allocation2] sm:$0xff] (!%p2913_p0), %vm1000_vm0, %v999_v0 }
  0x4a   : > { %s985_s11 = scalar_lea.vmem %s4223_s9, %s3664_s27 }
  0x4b   : > { %s3754_s12 = scalar_lea.vmem %s4225_s16, %s2976_s21 }
  0x4f PF: > { %v3758_v1 = vld [vmem:[#allocation2] sm:$0xff]  ;;  %vm1007_vm1 = vcmask 261120   ;;  %v3450_v9 = vmov 0.0   ;;  %vm3451_vm2 = vmmov 0   ;;  %v3289_v10 = vld [vmem:[%s3695_s28 + $0x8] sm:$0xff]   ;;  %v1026_v14 = vlaneseq  ;;  %s4227_s13 = sld [smem:[#allocation28_spill]] }
  0x50   : > { %v1008_v2 = vsel %vm1007_vm1, %v3758_v1, 0.0  ;;  %v3288_v8 = vld [vmem:[%s3695_s28] sm:$0xff]   ;;  %3035 = vmatprep.subr.bf16.mxu1 %v3450_v9  ;;  %3039 = vmatprep.mubr.msk.bf16.mxu1 %vm3451_vm2, %v3450_v9  ;;  %s3453_s3 = smov 96   ;;  %s3454_s28 = smov 88   ;;  %vm1115_vm5 = vcmask 64512   ;;  %vm1179_vm6 = vcmask 1043456  }
  0x51   : > { %1009 = vadd.xlane.f32.xlu0 %v1008_v2  ;;  %3036 = vmatpush3.bf16.msra.mxu1 %v3288_v8  ;;  %v3774_v18 = vshrl.u32 %v1026_v14, 7  ;;  %v3778_v22 = vld [vmem:[%s3689_s6] sm:$0x3f]  ;;  %s3452_s6 = smov 120   ;;  %s3455_s20 = smov 80   ;;  %vm1566_vm7 = vcmask 130048  }
  0x52   : > { %3049 = vmatprep.subr.bf16.mxu0 %v3450_v9  ;;  %3037 = vmatprep.subr.bf16.mxu1 %v3450_v9  ;;  %s3456_s16 = smov 112   ;;  %s3457_s24 = smov 72   ;;  %vm1568_vm8 = vcmask 195584   ;;  %vm2464_vm13 = vcmask 523264  }
  0x53   : > { %3051 = vmatprep.mubr.msk.bf16.mxu0 %vm3451_vm2, %v3450_v9  ;;  %v1028_v21 = vsub.s32 0, %v3774_v18  ;;  %v1036_v24 = vsub.s32 1, %v3774_v18  ;;  %s3458_s1 = smov 104   ;;  %s4229_s4 = sld [smem:[#allocation20_spill]] }
  0x54   : > { %s4230_s30 = sld [smem:[#allocation24_spill]]  ;;  %s3459_s23 = smov 64  }
  0x55   : > { %3038 = vmatpush3.bf16.msra.mxu1 %v3289_v10  ;;  %v1029_v23 = vrot.slane %v3778_v22, %v1028_v21  ;;  %v1037_v26 = vrot.slane %v3778_v22, %v1036_v24  ;;  %s4228_s22 = scalar_lea.vmem %s4227_s13, %s3664_s27  ;;  %s3460_s9 = smov 56  }
  0x56   : > { %3043 = vmatprep.subr.bf16.mxu1 %v3450_v9  ;;  %v2914_v31 = vld [vmem:[%s4228_s22] ss:$0 sm:$0xff]  ;;  %s3461_s10 = smov 48   ;;  %s3462_s13 = smov 40  }
  0x57   : > { %s3463_s22 = smov 8   ;;  %s3464_s26 = smov 16  }
  0x58   : > { %s3465_s21 = smov 24  }
  0x5a   : > { %s4231_s25 = scalar_lea.vmem %s4230_s30, %s4229_s4 }
  0x5b   : > { %v1004_v49 = vld [vmem:[%s4231_s25] sm:$0xff]  ;;  %s4232_s25 = scalar_lea.vmem %s4137_s8, %s3664_s27 }
  0xde   : > { %v1010_v3 = vpop.xlane.xlu0 %1009 }
  0xdf   : > { %v1012_v4 = vmul.f32 0.03125, %v1010_v3 }
  0xe1   : > { %v1013_v5 = vsub.f32 %v3758_v1, %v1012_v4 }
  0xe3   : > { %v1014_v6 = vmul.f32 %v1013_v5, %v1013_v5  ;;  %v1030_v25 = vmul.f32 %v1029_v23, %v1013_v5 }
  0xe5   : > { %v1015_v7 = vsel %vm1007_vm1, %v1014_v6, 0.0 }
  0xe6   : > { %1016 = vadd.xlane.f32.xlu0 %v1015_v7 }
 0x173   : > { %v1017_v11 = vpop.xlane.xlu0 %1016 }
 0x174   : > { %v1018_v12 = vmul.f32 0.032258064, %v1017_v11 }
 0x176   : > { %3304 = vrsqrt.f32 %v1018_v12  ;;  %vm1021_vm3 = vcmp.eq.f32.partialorder %v1018_v12, inf  ;;  %v1024_v16 = vand.u32 2147483648, %v1018_v12  ;;  %vm1023_vm4 = vcmp.eq.f32.partialorder %v1018_v12, 0.0 }
 0x180   : > { %v3305_v13 = vpop.eup %3304 }
 0x181   : > { %v1020_v15 = vmul.f32 %v3305_v13, %v1018_v12 }
 0x183   : > { %v1022_v17 = vsel %vm1021_vm3, %v1018_v12, %v1020_v15 }
 0x184   : > { %v1025_v19 = vsel %vm1023_vm4, %v1024_v16, %v1022_v17 }
 0x185   : > { %v1031_v20 = vadd.f32 1e-06, %v1025_v19 }
 0x187   : > { %3306 = vrcp.f32 %v1031_v20 }
 0x191   : > { %v3307_v27 = vpop.eup %3306 }
 0x192   : > { %v1033_v28 = vmul.f32 %v3307_v27, %v1030_v25 }
 0x194   : > { %v1038_v29 = vadd.f32 %v1037_v26, %v1033_v28 }
 0x196   : > { %v1049_v30 = vpack.c.bf16 %v1038_v29, %v1038_v29 }
 0x198   : > { %3040 = vmatmul.mubr.msk.bf16.vlgmr.msra.gmra.mrb[0].mxu1 %vm1007_vm1, %v1049_v30 }
 0x199   : > { %3045 = vmatprep.mubr.msk.bf16.mxu1 %vm3451_vm2, %v3450_v9 }
 0x26b   : > { %v1105_v32 = vpop.f32.mrb[0].mxu1 }
 0x26c   : > { %v1106_v33 = vadd.f32 %v2914_v31, %v1105_v32  ;;  %v3041_v34 = vpop.f32.mrb[1].mxu1 }
 0x26d   : > { %v1108_v35 = vpop.f32.mrb[2].mxu1 }
 0x26e   : > { %v3795_v36 = vpack.c.bf16 %v1106_v33, %v1106_v33  ;;  %v3042_v37 = vpop.f32.mrb[3].mxu1 }
 0x270   : > { %1223 = vrot.lane.b32.xlu0 %v3795_v36, %s3452_s6  ;;  %1113 = vrot.lane.b32.xlu1 %v3795_v36, %s3453_s3 }
 0x274   : > { %1225 = vrot.lane.b32.xlu1 %v3795_v36, %s3454_s28 }
 0x278   : > { %1335 = vrot.lane.b32.xlu1 %v3795_v36, %s3455_s20 }
 0x27c   : > { %1333 = vrot.lane.b32.xlu1 %v3795_v36, %s3456_s16 }
 0x280   : > { %1445 = vrot.lane.b32.xlu1 %v3795_v36, %s3457_s24 }
 0x284   : > { %1443 = vrot.lane.b32.xlu1 %v3795_v36, %s3458_s1 }
 0x2e2   : > { %v1114_v38 = vpop.permute.xlu1 %1113  ;;  %v1224_v43 = vpop.permute.xlu0 %1223 }
 0x2e3   : > { %v1120_v39 = vsel %vm1115_vm5, %v1114_v38, 0 }
 0x2e4   : > { %3044 = vmatpush3.bf16.xpose.msra.mxu1 %v1120_v39 }
 0x2e5   : > { %3055 = vmatprep.subr.bf16.mxu1 %v3450_v9 }
 0x2e6   : > { %v1226_v40 = vpop.permute.xlu1 %1225 }
 0x2e7   : > { %v1231_v41 = vsel %vm1115_vm5, %v1226_v40, 0 }
 0x2ea   : > { %v1336_v42 = vpop.permute.xlu1 %1335 }
 0x2eb   : > { %3046 = vmatmul.mubr.msk.bf16.vlgmr.msra.gmra.mrb[4].mxu1 %vm1115_vm5, %v3795_v36  ;;  %v1341_v45 = vsel %vm1115_vm5, %v1336_v42, 0 }
 0x2ec   : > { %3056 = vmatpush3.bf16.xpose.msra.mxu1 %v1231_v41  ;;  %3057 = vmatprep.mubr.msk.bf16.mxu1 %vm3451_vm2, %v3450_v9 }
 0x2ed   : > { %3067 = vmatprep.subr.bf16.mxu1 %v3450_v9 }
 0x2ee   : > { %v1334_v44 = vpop.permute.xlu1 %1333 }
 0x2f2   : > { %v1446_v46 = vpop.permute.xlu1 %1445 }
 0x2f3   : > { %3058 = vmatmul.mubr.msk.bf16.vlgmr.msra.gmra.mrb[8].mxu1 %vm1115_vm5, %v1224_v43  ;;  %v1451_v47 = vsel %vm1115_vm5, %v1446_v46, 0 }
 0x2f4   : > { %3068 = vmatpush3.bf16.xpose.msra.mxu1 %v1341_v45  ;;  %3069 = vmatprep.mubr.msk.bf16.mxu1 %vm3451_vm2, %v3450_v9 }
 0x2f5   : > { %3079 = vmatprep.subr.bf16.mxu1 %v3450_v9 }
 0x2f6   : > { %v1444_v48 = vpop.permute.xlu1 %1443 }
 0x2fb   : > { %3070 = vmatmul.mubr.msk.bf16.vlgmr.msra.gmra.mrb[12].mxu1 %vm1115_vm5, %v1334_v44 }
 0x2fc   : > { %3080 = vmatpush3.bf16.xpose.msra.mxu1 %v1451_v47  ;;  %3081 = vmatprep.mubr.msk.bf16.mxu1 %vm3451_vm2, %v3450_v9 }
 0x2fd   : > { %3091 = vmatprep.subr.bf16.mxu1 %v3450_v9 }
 0x303   : > { %3082 = vmatmul.mubr.msk.bf16.vlgmr.msra.gmra.mrb[16].mxu1 %vm1115_vm5, %v1444_v48 }
 0x304   : > { %3095 = vmatprep.mubr.msk.bf16.mxu1 %vm3451_vm2, %v3450_v9 }
 0x3be   : > { %v1156_v50 = vpop.f32.mrb[4].mxu1 }
 0x3bf   : > { %v1157_v51 = vadd.f32 %v1156_v50, %v1004_v49  ;;  %v3047_v52 = vpop.f32.mrb[5].mxu1 }
 0x3c0   : > { %v1159_v53 = vpop.f32.mrb[6].mxu1 }
 0x3c1   : > { %v3048_v54 = vpop.f32.mrb[7].mxu1  ;;  %v1162_v55 = vsel %vm1115_vm5, %v1157_v51, -inf }
 0x3c2   : > { %1163 = vmax.xlane.f32.xlu1 %v1162_v55 }
 0x3c6   : > { %v1267_v56 = vpop.f32.mrb[8].mxu1 }
 0x3c7   : > { %v1268_v57 = vadd.f32 %v1267_v56, %v1004_v49  ;;  %v3059_v58 = vpop.f32.mrb[9].mxu1 }
 0x3c8   : > { %v1270_v59 = vpop.f32.mrb[10].mxu1 }
 0x3c9   : > { %v3060_v60 = vpop.f32.mrb[11].mxu1  ;;  %v1273_v61 = vsel %vm1115_vm5, %v1268_v57, -inf }
 0x3ca   : > { %1274 = vmax.xlane.f32.xlu0 %v1273_v61 }
 0x3ce   : > { %v1377_v62 = vpop.f32.mrb[12].mxu1 }
 0x3cf   : > { %v1378_v63 = vadd.f32 %v1377_v62, %v1004_v49  ;;  %v3071_v0 = vpop.f32.mrb[13].mxu1 }
 0x3d0   : > { %v1380_v2 = vpop.f32.mrb[14].mxu1 }
 0x3d1   : > { %v3072_v3 = vpop.f32.mrb[15].mxu1  ;;  %v1383_v4 = vsel %vm1115_vm5, %v1378_v63, -inf }
 0x3d2   : > { %1384 = vmax.xlane.f32.xlu1 %v1383_v4 }
 0x3d6   : > { %v1487_v5 = vpop.f32.mrb[16].mxu1 }
 0x3d7   : > { %v1488_v6 = vadd.f32 %v1487_v5, %v1004_v49  ;;  %v3083_v7 = vpop.f32.mrb[17].mxu1  ;;  %v3290_v5 = vld [vmem:[%s3704_s17] sm:$0xff]  }
 0x3d8   : > { %v1490_v8 = vpop.f32.mrb[18].mxu1  ;;  %3092 = vmatpush3.bf16.msra.mxu1 %v3290_v5 }
 0x3d9   : > { %v3084_v10 = vpop.f32.mrb[19].mxu1  ;;  %v1493_v11 = vsel %vm1115_vm5, %v1488_v6, -inf  ;;  %3093 = vmatprep.subr.bf16.mxu1 %v3450_v9 }
 0x3da   : > { %1494 = vmax.xlane.f32.xlu0 %v1493_v11 }
 0x44f   : > { %v1164_v12 = vpop.xlane.xlu1 %1163 }
 0x450   : > { %v1165_v13 = vsub.f32 %v1157_v51, %v1164_v12 }
 0x452   : > { %v1166_v14 = vmul.f32 1.442695, %v1165_v13 }
 0x454   : > { %3308 = vpow2.f32 %v1166_v14 }
 0x457   : > { %v1275_v15 = vpop.xlane.xlu0 %1274 }
 0x458   : > { %v1276_v16 = vsub.f32 %v1268_v57, %v1275_v15 }
 0x45a   : > { %v1277_v17 = vmul.f32 1.442695, %v1276_v16 }
 0x45c   : > { %3310 = vpow2.f32 %v1277_v17 }
 0x45e   : > { %v3309_v19 = vpop.eup %3308 }
 0x45f   : > { %v1168_v20 = vsel %vm1115_vm5, %v3309_v19, 0.0  ;;  %v1385_v31 = vpop.xlane.xlu1 %1384 }
 0x460   : > { %1169 = vadd.xlane.f32.xlu1 %v1168_v20  ;;  %v1386_v32 = vsub.f32 %v1378_v63, %v1385_v31 }
 0x462   : > { %v1387_v33 = vmul.f32 1.442695, %v1386_v32 }
 0x466   : > { %v3311_v23 = vpop.eup %3310 }
 0x467   : > { %v1495_v25 = vpop.xlane.xlu0 %1494  ;;  %v1279_v26 = vsel %vm1115_vm5, %v3311_v23, 0.0 }
 0x468   : > { %v1496_v27 = vsub.f32 %v1488_v6, %v1495_v25  ;;  %1280 = vadd.xlane.f32.xlu0 %v1279_v26  ;;  %v3291_v6 = vld [vmem:[%s3704_s17 + $0x8] sm:$0xff]  }
 0x469   : > { %3094 = vmatpush3.bf16.msra.mxu1 %v3291_v6 }
 0x46a   : > { %v1497_v28 = vmul.f32 1.442695, %v1496_v27  ;;  %3107 = vmatprep.subr.bf16.mxu1 %v3450_v9  ;;  %v2926_v27 = vld [vmem:[%s4232_s25] ss:$0 sm:$0xff] }
 0x46c   : > { %3312 = vpow2.f32 %v1497_v28 }
 0x46d   : > { %3314 = vpow2.f32 %v1387_v33 }
 0x471   : > { %1174 = vrot.lane.b32.xlu1 %v3795_v36, %s3459_s23  ;;  %s4237_s23 = sld [smem:[#allocation31_spill]] }
 0x476   : > { %v3313_v29 = vpop.eup %3312 }
 0x477   : > { %v1499_v30 = vsel %vm1115_vm5, %v3313_v29, 0.0  ;;  %v3315_v34 = vpop.eup %3314 }
 0x478   : > { %1500 = vadd.xlane.f32.xlu0 %v1499_v30  ;;  %v1389_v35 = vsel %vm1115_vm5, %v3315_v34, 0.0 }
 0x48e   : > { %1285 = vrot.lane.b32.xlu0 %v3795_v36, %s3460_s9  ;;  %s4238_s9 = scalar_lea.vmem %s4237_s23, %s3664_s27 }
 0x495   : > { %1390 = vadd.xlane.f32.xlu1 %v1389_v35 }
 0x4a6   : > { %1395 = vrot.lane.b32.xlu1 %v3795_v36, %s3461_s10  ;;  %s4233_s10 = sld [smem:[#allocation23_spill]] }
 0x4aa   : > { %1505 = vrot.lane.b32.xlu1 %v3795_v36, %s3462_s13 }
 0x4ac   : > { %s4234_s13 = scalar_lea.vmem %s4233_s10, %s4229_s4  ;;  %s4235_s4 = sld [smem:[#allocation33_spill]] }
 0x4ad   : > { %s4240_s10 = sld [smem:[#allocation25_spill]] }
 0x4b2   : > { %s4236_s17 = scalar_lea.vmem %s4235_s4, %s3664_s27 }
 0x4ed   : > { %v1170_v37 = vpop.xlane.xlu1 %1169 }
 0x4ee   : > { %3316 = vrcp.f32 %v1170_v37 }
 0x4f1   : > { %v1175_v38 = vpop.permute.xlu1 %1174 }
 0x4f2   : > { %v1181_v39 = vsel %vm1179_vm6, %v1175_v38, 0 }
 0x4f3   : > { %3050 = vmatpush3.bf16.msra.mxu0 %v1181_v39 }
 0x4f4   : > { %3061 = vmatprep.subr.bf16.mxu0 %v3450_v9 }
 0x4f5   : > { %v1281_v41 = vpop.xlane.xlu0 %1280 }
 0x4f6   : > { %3318 = vrcp.f32 %v1281_v41  ;;  %v3292_v41 = vld [vmem:[%s3722_s19] sm:$0xff]  }
 0x4f8   : > { %v3317_v40 = vpop.eup %3316 }
 0x4f9   : > { %v1172_v42 = vmul.f32 %v3317_v40, %v3309_v19 }
 0x4fb   : > { %v1173_v43 = vpack.c.bf16 %v1172_v42, %v1172_v42  ;;  %v3293_v42 = vld [vmem:[%s3722_s19 + $0x8] sm:$0xff]  }
 0x4fd   : > { %3052 = vmatmul.mubr.msk.bf16.vlgmr.msra.gmra.mrb[0].mxu0 %vm1115_vm5, %v1173_v43  ;;  %v3294_v43 = vld [vmem:[%s3713_s29] sm:$0xff]  }
 0x4fe   : > { %3063 = vmatprep.mubr.msk.bf16.mxu0 %vm3451_vm2, %v3450_v9 }
 0x500   : > { %v3319_v36 = vpop.eup %3318 }
 0x501   : > { %v1283_v45 = vmul.f32 %v3319_v36, %v3311_v23  ;;  %v3295_v36 = vld [vmem:[%s3713_s29 + $0x8] sm:$0xff]  }
 0x503   : > { %v1284_v48 = vpack.c.bf16 %v1283_v45, %v1283_v45 }
 0x505   : > { %v1501_v44 = vpop.xlane.xlu0 %1500 }
 0x509   : > { %v1286_v46 = vpop.permute.xlu0 %1285 }
 0x50a   : > { %v1291_v47 = vsel %vm1179_vm6, %v1286_v46, 0 }
 0x50b   : > { %3062 = vmatpush3.bf16.msra.mxu0 %v1291_v47 }
 0x50c   : > { %3073 = vmatprep.subr.bf16.mxu0 %v3450_v9 }
 0x50e   : > { %3064 = vmatmul.mubr.msk.bf16.vlgmr.msra.gmra.mrb[4].mxu0 %vm1115_vm5, %v1284_v48 }
 0x50f   : > { %3075 = vmatprep.mubr.msk.bf16.mxu0 %vm3451_vm2, %v3450_v9 }
 0x522   : > { %v1391_v49 = vpop.xlane.xlu1 %1390 }
 0x523   : > { %3320 = vrcp.f32 %v1391_v49 }
 0x524   : > { %3322 = vrcp.f32 %v1501_v44 }
 0x526   : > { %v1396_v50 = vpop.permute.xlu1 %1395 }
 0x527   : > { %v1401_v51 = vsel %vm1179_vm6, %v1396_v50, 0 }
 0x528   : > { %3074 = vmatpush3.bf16.msra.mxu0 %v1401_v51 }
 0x529   : > { %3085 = vmatprep.subr.bf16.mxu0 %v3450_v9 }
 0x52a   : > { %v1506_v54 = vpop.permute.xlu1 %1505 }
 0x52b   : > { %v1511_v57 = vsel %vm1179_vm6, %v1506_v54, 0 }
 0x52d   : > { %v3321_v52 = vpop.eup %3320 }
 0x52e   : > { %v1393_v53 = vmul.f32 %v3321_v52, %v3315_v34  ;;  %v3323_v56 = vpop.eup %3322 }
 0x52f   : > { %v1503_v58 = vmul.f32 %v3323_v56, %v3313_v29 }
 0x530   : > { %v1394_v55 = vpack.c.bf16 %v1393_v53, %v1393_v53  ;;  %v1652_v53 = vsub.s32 2, %v3774_v18 }
 0x531   : > { %v1504_v59 = vpack.c.bf16 %v1503_v58, %v1503_v58 }
 0x532   : > { %3076 = vmatmul.mubr.msk.bf16.vlgmr.msra.gmra.mrb[8].mxu0 %vm1115_vm5, %v1394_v55  ;;  %v1653_v54 = vrot.slane %v3778_v22, %v1652_v53  ;;  %v1660_v55 = vsub.s32 3, %v3774_v18 }
 0x533   : > { %3086 = vmatpush3.bf16.msra.mxu0 %v1511_v57  ;;  %3087 = vmatprep.mubr.msk.bf16.mxu0 %vm3451_vm2, %v3450_v9 }
 0x534   : > { %3099 = vmatprep.subr.bf16.mxu0 %v3450_v9  ;;  %v1661_v57 = vrot.slane %v3778_v22, %v1660_v55 }
 0x53a   : > { %3088 = vmatmul.mubr.msk.bf16.vlgmr.msra.gmra.mrb[12].mxu0 %vm1115_vm5, %v1504_v59 }
 0x53b   : > { %3103 = vmatprep.mubr.msk.bf16.mxu0 %vm3451_vm2, %v3450_v9  ;;  %3100 = vmatpush3.bf16.msra.mxu0 %v3294_v43 }
 0x53c   : > { %3101 = vmatprep.subr.bf16.mxu0 %v3450_v9 }
 0x53f   : > { %3102 = vmatpush3.bf16.msra.mxu0 %v3295_v36 }
 0x540   : > { %3115 = vmatprep.subr.bf16.mxu0 %v3450_v9 }
 0x5d0   : > { %v1217_v60 = vpop.f32.mrb[0].mxu0 }
 0x5d1   : > { %v3053_v61 = vpop.f32.mrb[1].mxu0 }
 0x5d2   : > { %v1220_v62 = vpop.f32.mrb[2].mxu0 }
 0x5d3   : > { %v3054_v63 = vpop.f32.mrb[3].mxu0  ;;  %v2934_v62 = vld [vmem:[%s4236_s17] ss:$0 sm:$0xff] }
 0x5e1   : > { %v1327_v0 = vpop.f32.mrb[4].mxu0 }
 0x5e2   : > { %1554 = vrot.lane.b32.xlu0 %v1327_v0, %s3463_s22  ;;  %v3065_v2 = vpop.f32.mrb[5].mxu0 }
 0x5e3   : > { %v1330_v3 = vpop.f32.mrb[6].mxu0 }
 0x5e4   : > { %v3066_v4 = vpop.f32.mrb[7].mxu0 }
 0x605   : > { %v1437_v7 = vpop.f32.mrb[8].mxu0 }
 0x606   : > { %1558 = vrot.lane.b32.xlu1 %v1437_v7, %s3464_s26  ;;  %v3077_v8 = vpop.f32.mrb[9].mxu0  ;;  %v2930_v7 = vld [vmem:[%s4238_s9] ss:$0 sm:$0xff] }
 0x607   : > { %v1440_v10 = vpop.f32.mrb[10].mxu0 }
 0x608   : > { %v3078_v11 = vpop.f32.mrb[11].mxu0 }
 0x60d   : > { %v1547_v12 = vpop.f32.mrb[12].mxu0 }
 0x60e   : > { %1562 = vrot.lane.b32.xlu0 %v1547_v12, %s3465_s21  ;;  %v3089_v13 = vpop.f32.mrb[13].mxu0 }
 0x60f   : > { %v1550_v14 = vpop.f32.mrb[14].mxu0 }
 0x610   : > { %v3090_v15 = vpop.f32.mrb[15].mxu0 }
 0x654   : > { %v1555_v16 = vpop.permute.xlu0 %1554 }
 0x655   : > { %v1565_v19 = vsel %vm1115_vm5, %v1217_v60, %v1555_v16 }
 0x678   : > { %v1559_v17 = vpop.permute.xlu1 %1558 }
 0x679   : > { %v1567_v20 = vsel %vm1566_vm7, %v1565_v19, %v1559_v17 }
 0x680   : > { %v1563_v23 = vpop.permute.xlu0 %1562 }
 0x681   : > { %v1569_v25 = vsel %vm1568_vm8, %v1567_v20, %v1563_v23 }
 0x682   : > { %v1570_v26 = vpack.c.bf16 %v1569_v25, %v1569_v25 }
 0x684   : > { %3096 = vmatmul.mubr.msk.bf16.vlgmr.msra.gmra.mrb[20].mxu1 %vm1007_vm1, %v1570_v26 }
 0x685   : > { %3111 = vmatprep.mubr.msk.bf16.mxu1 %vm3451_vm2, %v3450_v9  ;;  %3108 = vmatpush3.bf16.msra.mxu1 %v3292_v41 }
 0x686   : > { %3109 = vmatprep.subr.bf16.mxu1 %v3450_v9 }
 0x689   : > { %3110 = vmatpush3.bf16.msra.mxu1 %v3293_v42 }
 0x68a   : > { %3121 = vmatprep.subr.bf16.mxu1 %v3450_v9 }
 0x757   : > { %v1626_v28 = vpop.f32.mrb[20].mxu1 }
 0x758   : > { %v1627_v29 = vadd.f32 %v2926_v27, %v1626_v28  ;;  %v3097_v30 = vpop.f32.mrb[21].mxu1 }
 0x759   : > { %v1629_v31 = vpop.f32.mrb[22].mxu1 }
 0x75a   : > { %v3888_v32 = vadd.f32 %v1627_v29, %v3758_v1  ;;  %v3098_v33 = vpop.f32.mrb[23].mxu1  ;;  %v1003_v1 = vld [vmem:[%s4234_s13] sm:$0xff] }
 0x75b   : > { %v1740_v44 = vpack.c.bf16 %v1003_v1, %v1003_v1 }
 0x75c   : > { %v1633_v34 = vsel %vm1007_vm1, %v3888_v32, 0.0 }
 0x75d   : > { %1634 = vadd.xlane.f32.xlu1 %v1633_v34  ;;  %3112 = vmatmul.mubr.msk.bf16.vlgmr.msra.gmra.mrb[24].mxu1 %vm1007_vm1, %v1740_v44 }
 0x75e   : > { %3123 = vmatprep.mubr.msk.bf16.mxu1 %vm3451_vm2, %v3450_v9 }
 0x7ea   : > { %v1635_v35 = vpop.xlane.xlu1 %1634 }
 0x7eb   : > { %v1636_v37 = vmul.f32 0.03125, %v1635_v35 }
 0x7ed   : > { %v1637_v38 = vsub.f32 %v3888_v32, %v1636_v37 }
 0x7ef   : > { %v1638_v39 = vmul.f32 %v1637_v38, %v1637_v38  ;;  %v1654_v56 = vmul.f32 %v1653_v54, %v1637_v38 }
 0x7f1   : > { %v1639_v40 = vsel %vm1007_vm1, %v1638_v39, 0.0 }
 0x7f2   : > { %1640 = vadd.xlane.f32.xlu0 %v1639_v40 }
 0x830   : > { %v1796_v63 = vpop.f32.mrb[24].mxu1 }
 0x831   : > { %v1797_v0 = vadd.f32 %v2934_v62, %v1796_v63  ;;  %v3113_v2 = vpop.f32.mrb[25].mxu1 }
 0x832   : > { %v1799_v3 = vpop.f32.mrb[26].mxu1 }
 0x833   : > { %v3922_v4 = vpack.c.bf16 %v1797_v0, %v1797_v0  ;;  %v3114_v5 = vpop.f32.mrb[27].mxu1 }
 0x835   : > { %1920 = vrot.lane.b32.xlu0 %v3922_v4, %s3452_s6  ;;  %v1814_v6 = vsel %vm1115_vm5, %v3922_v4, 0 }
 0x87f   : > { %v1641_v45 = vpop.xlane.xlu0 %1640 }
 0x880   : > { %v1642_v46 = vmul.f32 0.032258064, %v1641_v45 }
 0x882   : > { %3324 = vrsqrt.f32 %v1642_v46  ;;  %vm1645_vm9 = vcmp.eq.f32.partialorder %v1642_v46, inf  ;;  %v1648_v49 = vand.u32 2147483648, %v1642_v46  ;;  %vm1647_vm10 = vcmp.eq.f32.partialorder %v1642_v46, 0.0 }
 0x88c   : > { %v3325_v47 = vpop.eup %3324 }
 0x88d   : > { %v1644_v48 = vmul.f32 %v3325_v47, %v1642_v46 }
 0x88f   : > { %v1646_v50 = vsel %vm1645_vm9, %v1642_v46, %v1644_v48 }
 0x890   : > { %v1649_v51 = vsel %vm1647_vm10, %v1648_v49, %v1646_v50 }
 0x891   : > { %v1655_v52 = vadd.f32 1e-06, %v1649_v51 }
 0x893   : > { %3326 = vrcp.f32 %v1655_v52 }
 0x89d   : > { %v3327_v58 = vpop.eup %3326 }
 0x89e   : > { %v1657_v59 = vmul.f32 %v3327_v58, %v1654_v56 }
 0x8a0   : > { %v1662_v60 = vadd.f32 %v1661_v57, %v1657_v59 }
 0x8a2   : > { %v1678_v61 = vpack.c.bf16 %v1662_v60, %v1662_v60 }
 0x8a4   : > { %3104 = vmatmul.mubr.msk.bf16.vlgmr.msra.gmra.mrb[16].mxu0 %vm1007_vm1, %v1678_v61 }
 0x8a5   : > { %3117 = vmatprep.mubr.msk.bf16.mxu0 %vm3451_vm2, %v3450_v9  ;;  %3116 = vmatpush3.bf16.xpose.msra.mxu0 %v1814_v6 }
 0x8a6   : > { %3127 = vmatprep.subr.bf16.mxu0 %v3450_v9 }
 0x8a7   : > { %v1921_v12 = vpop.permute.xlu0 %1920 }
 0x8a8   : > { %v1926_v16 = vsel %vm1115_vm5, %v1921_v12, 0 }
 0x977   : > { %v1734_v8 = vpop.f32.mrb[16].mxu0 }
 0x978   : > { %v1735_v10 = vadd.f32 %v2930_v7, %v1734_v8  ;;  %v3105_v11 = vpop.f32.mrb[17].mxu0 }
 0x979   : > { %v1737_v13 = vpop.f32.mrb[18].mxu0 }
 0x97a   : > { %v1802_v14 = vpack.c.bf16 %v1735_v10, %v1735_v10  ;;  %v3106_v15 = vpop.f32.mrb[19].mxu0 }
 0x97c   : > { %1918 = vrot.lane.b32.xlu1 %v1802_v14, %s3452_s6  ;;  %2028 = vrot.lane.b32.xlu0 %v1802_v14, %s3456_s16  ;;  %s4239_s6 = sld [smem:[#allocation19_spill]] }
 0x97d   : > { %3118 = vmatmul.mubr.msk.bf16.vlgmr.msra.gmra.mrb[20].mxu0 %vm1115_vm5, %v1802_v14 }
 0x97e   : > { %3128 = vmatpush3.bf16.xpose.msra.mxu0 %v1926_v16  ;;  %3129 = vmatprep.mubr.msk.bf16.mxu0 %vm3451_vm2, %v3450_v9 }
 0x97f   : > { %3139 = vmatprep.subr.bf16.mxu0 %v3450_v9 }
 0x980   : > { %2030 = vrot.lane.b32.xlu1 %v3922_v4, %s3456_s16  ;;  %2138 = vrot.lane.b32.xlu0 %v1802_v14, %s3458_s1 }
 0x982   : > { %s4241_s13 = scalar_lea.vmem %s4240_s10, %s4239_s6 }
 0x983   : > { %v2938_v28 = vld [vmem:[%s4241_s13] ss:$0 sm:$0xff] }
 0x984   : > { %2140 = vrot.lane.b32.xlu1 %v3922_v4, %s3458_s1 }
 0x9ee   : > { %v1919_v17 = vpop.permute.xlu1 %1918  ;;  %v2029_v25 = vpop.permute.xlu0 %2028 }
 0x9ef   : > { %3130 = vmatmul.mubr.msk.bf16.vlgmr.msra.gmra.mrb[24].mxu0 %vm1115_vm5, %v1919_v17 }
 0x9f0   : > { %3141 = vmatprep.mubr.msk.bf16.mxu0 %vm3451_vm2, %v3450_v9 }
 0x9f2   : > { %v2031_v19 = vpop.permute.xlu1 %2030  ;;  %v2139_v27 = vpop.permute.xlu0 %2138 }
 0x9f3   : > { %v2036_v20 = vsel %vm1115_vm5, %v2031_v19, 0 }
 0x9f4   : > { %3140 = vmatpush3.bf16.xpose.msra.mxu0 %v2036_v20 }
 0x9f5   : > { %3151 = vmatprep.subr.bf16.mxu0 %v3450_v9 }
 0x9f6   : > { %v2141_v23 = vpop.permute.xlu1 %2140 }
 0x9f7   : > { %v2146_v26 = vsel %vm1115_vm5, %v2141_v23, 0 }
 0x9fb   : > { %3142 = vmatmul.mubr.msk.bf16.vlgmr.msra.gmra.mrb[28].mxu0 %vm1115_vm5, %v2029_v25 }
 0x9fc   : > { %3152 = vmatpush3.bf16.xpose.msra.mxu0 %v2146_v26  ;;  %3153 = vmatprep.mubr.msk.bf16.mxu0 %vm3451_vm2, %v3450_v9 }
 0x9fd   : > { %3163 = vmatprep.subr.bf16.mxu0 %v3450_v9 }
 0xa03   : > { %3154 = vmatmul.mubr.msk.bf16.vlgmr.msra.gmra.mrb[32].mxu0 %vm1115_vm5, %v2139_v27 }
 0xa04   : > { %3167 = vmatprep.mubr.msk.bf16.mxu0 %vm3451_vm2, %v3450_v9 }
 0xa50   : > { %v1850_v29 = vpop.f32.mrb[20].mxu0 }
 0xa51   : > { %v1851_v30 = vadd.f32 %v2938_v28, %v1850_v29  ;;  %v3119_v31 = vpop.f32.mrb[21].mxu0 }
 0xa52   : > { %v1853_v33 = vpop.f32.mrb[22].mxu0 }
 0xa53   : > { %v3120_v34 = vpop.f32.mrb[23].mxu0  ;;  %v1856_v35 = vsel %vm1115_vm5, %v1851_v30, -inf }
 0xa54   : > { %1857 = vmax.xlane.f32.xlu1 %v1856_v35 }
 0xac2   : > { %v1962_v37 = vpop.f32.mrb[24].mxu0 }
 0xac3   : > { %v1963_v38 = vadd.f32 %v2938_v28, %v1962_v37  ;;  %v3131_v39 = vpop.f32.mrb[25].mxu0 }
 0xac4   : > { %v1965_v40 = vpop.f32.mrb[26].mxu0 }
 0xac5   : > { %v3132_v41 = vpop.f32.mrb[27].mxu0  ;;  %v1968_v42 = vsel %vm1115_vm5, %v1963_v38, -inf }
 0xac6   : > { %1969 = vmax.xlane.f32.xlu0 %v1968_v42 }
 0xace   : > { %v2072_v1 = vpop.f32.mrb[28].mxu0 }
 0xacf   : > { %v2073_v43 = vadd.f32 %v2938_v28, %v2072_v1  ;;  %v3143_v36 = vpop.f32.mrb[29].mxu0 }
 0xad0   : > { %v2075_v44 = vpop.f32.mrb[30].mxu0 }
 0xad1   : > { %v3144_v45 = vpop.f32.mrb[31].mxu0  ;;  %v2078_v46 = vsel %vm1115_vm5, %v2073_v43, -inf }
 0xad2   : > { %2079 = vmax.xlane.f32.xlu0 %v2078_v46 }
 0xad6   : > { %v2182_v47 = vpop.f32.mrb[32].mxu0 }
 0xad7   : > { %v2183_v48 = vadd.f32 %v2938_v28, %v2182_v47  ;;  %v3155_v49 = vpop.f32.mrb[33].mxu0 }
 0xad8   : > { %v2185_v50 = vpop.f32.mrb[34].mxu0 }
 0xad9   : > { %v3156_v51 = vpop.f32.mrb[35].mxu0  ;;  %v2188_v52 = vsel %vm1115_vm5, %v2183_v48, -inf }
 0xada   : > { %2189 = vmax.xlane.f32.xlu1 %v2188_v52 }
 0xae1   : > { %v1858_v53 = vpop.xlane.xlu1 %1857 }
 0xae2   : > { %v1859_v54 = vsub.f32 %v1851_v30, %v1858_v53 }
 0xae4   : > { %v1860_v55 = vmul.f32 1.442695, %v1859_v54 }
 0xae6   : > { %3328 = vpow2.f32 %v1860_v55 }
 0xaf0   : > { %v3329_v56 = vpop.eup %3328 }
 0xaf1   : > { %v1862_v57 = vsel %vm1115_vm5, %v3329_v56, 0.0 }
 0xaf2   : > { %1863 = vadd.xlane.f32.xlu0 %v1862_v57 }
 0xb53   : > { %v1970_v58 = vpop.xlane.xlu0 %1969 }
 0xb54   : > { %v1971_v59 = vsub.f32 %v1963_v38, %v1970_v58 }
 0xb56   : > { %v1972_v60 = vmul.f32 1.442695, %v1971_v59 }
 0xb58   : > { %3330 = vpow2.f32 %v1972_v60 }
 0xb5f   : > { %v2080_v61 = vpop.xlane.xlu0 %2079 }
 0xb60   : > { %v2081_v62 = vsub.f32 %v2073_v43, %v2080_v61 }
 0xb62   : > { %v3331_v63 = vpop.eup %3330  ;;  %v2082_v0 = vmul.f32 1.442695, %v2081_v62 }
 0xb63   : > { %v1974_v2 = vsel %vm1115_vm5, %v3331_v63, 0.0 }
 0xb64   : > { %3332 = vpow2.f32 %v2082_v0  ;;  %1975 = vadd.xlane.f32.xlu1 %v1974_v2  ;;  %v2947_v0 = vld [vmem:[%s977_s7] ss:$0 sm:$0xff] }
 0xb67   : > { %v2190_v6 = vpop.xlane.xlu1 %2189 }
 0xb68   : > { %v2191_v7 = vsub.f32 %v2183_v48, %v2190_v6 }
 0xb6a   : > { %v2192_v8 = vmul.f32 1.442695, %v2191_v7 }
 0xb6c   : > { %3334 = vpow2.f32 %v2192_v8 }
 0xb6e   : > { %v3333_v3 = vpop.eup %3332 }
 0xb6f   : > { %v2084_v5 = vsel %vm1115_vm5, %v3333_v3, 0.0 }
 0xb70   : > { %2085 = vadd.xlane.f32.xlu0 %v2084_v5 }
 0xb75   : > { %1980 = vrot.lane.b32.xlu1 %v3922_v4, %s3454_s28 }
 0xb76   : > { %v3335_v10 = vpop.eup %3334 }
 0xb77   : > { %v2194_v11 = vsel %vm1115_vm5, %v3335_v10, 0.0 }
 0xb7f   : > { %v1864_v12 = vpop.xlane.xlu0 %1863 }
 0xb80   : > { %3336 = vrcp.f32 %v1864_v12 }
 0xb86   : > { %1869 = vrot.lane.b32.xlu0 %v3922_v4, %s3453_s3  ;;  %s4242_s3 = sld [smem:[#allocation21_spill]] }
 0xb8a   : > { %2200 = vrot.lane.b32.xlu0 %v3922_v4, %s3457_s24  ;;  %v3337_v14 = vpop.eup %3336 }
 0xb8b   : > { %v1866_v16 = vmul.f32 %v3337_v14, %v3329_v56 }
 0xb8c   : > { %v3296_v47 = vld [vmem:[%s4242_s3] sm:$0xff]   ;;  %v3297_v48 = vld [vmem:[%s4242_s3 + $0x8] sm:$0xff]  }
 0xb8d   : > { %v1867_v23 = vpack.c.bf16 %v1866_v16, %v1866_v16  ;;  %3164 = vmatpush3.bf16.msra.mxu0 %v3296_v47  ;;  %v3298_v16 = vld [vmem:[%s3740_s5] sm:$0xff]  }
 0xb8e   : > { %3165 = vmatprep.subr.bf16.mxu0 %v3450_v9 }
 0xb91   : > { %3166 = vmatpush3.bf16.msra.mxu0 %v3297_v48 }
 0xb92   : > { %3179 = vmatprep.subr.bf16.mxu0 %v3450_v9 }
 0xb99   : > { %2195 = vadd.xlane.f32.xlu1 %v2194_v11 }
 0xbaa   : > { %2090 = vrot.lane.b32.xlu1 %v3922_v4, %s3455_s20 }
 0xbf1   : > { %v1976_v13 = vpop.xlane.xlu1 %1975 }
 0xbf2   : > { %3338 = vrcp.f32 %v1976_v13 }
 0xbf5   : > { %v1981_v20 = vpop.permute.xlu1 %1980 }
 0xbf6   : > { %v1986_v26 = vsel %vm1179_vm6, %v1981_v20, 0 }
 0xbfc   : > { %v3339_v25 = vpop.eup %3338 }
 0xbfd   : > { %v2086_v15 = vpop.xlane.xlu0 %2085  ;;  %v1978_v4 = vmul.f32 %v3339_v25, %v3331_v63 }
 0xbfe   : > { %3340 = vrcp.f32 %v2086_v15 }
 0xbff   : > { %v1979_v27 = vpack.c.bf16 %v1978_v4, %v1978_v4 }
 0xc01   : > { %v1870_v17 = vpop.permute.xlu0 %1869 }
 0xc02   : > { %v1875_v19 = vsel %vm1179_vm6, %v1870_v17, 0  ;;  %v3299_v17 = vld [vmem:[%s3740_s5 + $0x8] sm:$0xff]  }
 0xc03   : > { %3122 = vmatpush3.bf16.msra.mxu1 %v1875_v19  ;;  %v3301_v19 = vld [vmem:[%s3754_s12 + $0x8] sm:$0xff]  }
 0xc04   : > { %3133 = vmatprep.subr.bf16.mxu1 %v3450_v9 }
 0xc05   : > { %v2201_v34 = vpop.permute.xlu0 %2200 }
 0xc06   : > { %3124 = vmatmul.mubr.msk.bf16.vlgmr.msra.gmra.mrb[28].mxu1 %vm1115_vm5, %v1867_v23  ;;  %v2206_v37 = vsel %vm1179_vm6, %v2201_v34, 0 }
 0xc07   : > { %3134 = vmatpush3.bf16.msra.mxu1 %v1986_v26  ;;  %3135 = vmatprep.mubr.msk.bf16.mxu1 %vm3451_vm2, %v3450_v9 }
 0xc08   : > { %3145 = vmatprep.subr.bf16.mxu1 %v3450_v9  ;;  %v3341_v28 = vpop.eup %3340 }
 0xc09   : > { %v2088_v30 = vmul.f32 %v3341_v28, %v3333_v3 }
 0xc0b   : > { %v2089_v35 = vpack.c.bf16 %v2088_v30, %v2088_v30  ;;  %v2345_v30 = vsub.s32 4, %v3774_v18 }
 0xc0e   : > { %3136 = vmatmul.mubr.msk.bf16.vlgmr.msra.gmra.mrb[32].mxu1 %vm1115_vm5, %v1979_v27 }
 0xc0f   : > { %3147 = vmatprep.mubr.msk.bf16.mxu1 %vm3451_vm2, %v3450_v9 }
 0xc26   : > { %v2196_v29 = vpop.xlane.xlu1 %2195 }
 0xc27   : > { %3342 = vrcp.f32 %v2196_v29 }
 0xc2a   : > { %v2091_v31 = vpop.permute.xlu1 %2090 }
 0xc2b   : > { %v2096_v33 = vsel %vm1179_vm6, %v2091_v31, 0  ;;  %v2346_v31 = vrot.slane %v3778_v22, %v2345_v30 }
 0xc2c   : > { %3146 = vmatpush3.bf16.msra.mxu1 %v2096_v33  ;;  %v2353_v33 = vsub.s32 5, %v3774_v18 }
 0xc2d   : > { %3157 = vmatprep.subr.bf16.mxu1 %v3450_v9 }
 0xc2f   : > { %3148 = vmatmul.mubr.msk.bf16.vlgmr.msra.gmra.mrb[36].mxu1 %vm1115_vm5, %v2089_v35  ;;  %v2354_v35 = vrot.slane %v3778_v22, %v2353_v33 }
 0xc30   : > { %3158 = vmatpush3.bf16.msra.mxu1 %v2206_v37  ;;  %3159 = vmatprep.mubr.msk.bf16.mxu1 %vm3451_vm2, %v3450_v9 }
 0xc31   : > { %v3343_v38 = vpop.eup %3342  ;;  %3171 = vmatprep.subr.bf16.mxu1 %v3450_v9 }
 0xc32   : > { %v2198_v39 = vmul.f32 %v3343_v38, %v3335_v10 }
 0xc34   : > { %v2199_v40 = vpack.c.bf16 %v2198_v39, %v2198_v39 }
 0xc37   : > { %3160 = vmatmul.mubr.msk.bf16.vlgmr.msra.gmra.mrb[40].mxu1 %vm1115_vm5, %v2199_v40 }
 0xc38   : > { %3175 = vmatprep.mubr.msk.bf16.mxu1 %vm3451_vm2, %v3450_v9  ;;  %3172 = vmatpush3.bf16.msra.mxu1 %v3298_v16 }
 0xc39   : > { %3173 = vmatprep.subr.bf16.mxu1 %v3450_v9 }
 0xc3c   : > { %3174 = vmatpush3.bf16.msra.mxu1 %v3299_v17 }
 0xcd9   : > { %v1911_v41 = vpop.f32.mrb[28].mxu1 }
 0xcda   : > { %v3125_v42 = vpop.f32.mrb[29].mxu1 }
 0xcdb   : > { %v1914_v1 = vpop.f32.mrb[30].mxu1  ;;  %v3303_v42 = vld [vmem:[%s3754_s12 + $0x18] sm:$0xff]  }
 0xcdc   : > { %v3126_v43 = vpop.f32.mrb[31].mxu1  ;;  %v2951_v1 = vld [vmem:[%s985_s11] ss:$0 sm:$0xff]  ;;  %s4245_s11 = sld [smem:[#allocation9_spill]] }
 0xce1   : > { %v2022_v36 = vpop.f32.mrb[32].mxu1 }
 0xce2   : > { %2249 = vrot.lane.b32.xlu1 %v2022_v36, %s3463_s22  ;;  %v3137_v44 = vpop.f32.mrb[33].mxu1  ;;  %p2961_p1 = scmp.ne.s32.totalorder %s4245_s11, 1 }
 0xce3   : > { %v2025_v45 = vpop.f32.mrb[34].mxu1  ;;  %vm3467_vm14 = vmmov (!%p2961_p1), 0   ;;  %s4247_s30 = sld [smem:[#allocation38_spill]] (!%p2961_p1)  ;;  %s4248_s9 = sld [smem:[#allocation40_spill]] (!%p2961_p1) }
 0xce4   : > { %v3138_v46 = vpop.f32.mrb[35].mxu1 }
 0xd02   : > { %v2132_v49 = vpop.f32.mrb[36].mxu1 }
 0xd03   : > { %2253 = vrot.lane.b32.xlu0 %v2132_v49, %s3464_s26  ;;  %v3149_v50 = vpop.f32.mrb[37].mxu1 }
 0xd04   : > { %v2135_v51 = vpop.f32.mrb[38].mxu1 }
 0xd05   : > { %v3150_v52 = vpop.f32.mrb[39].mxu1 }
 0xd0a   : > { %v2242_v53 = vpop.f32.mrb[40].mxu1 }
 0xd0b   : > { %2257 = vrot.lane.b32.xlu1 %v2242_v53, %s3465_s21  ;;  %v3161_v54 = vpop.f32.mrb[41].mxu1 }
 0xd0c   : > { %v2245_v55 = vpop.f32.mrb[42].mxu1 }
 0xd0d   : > { %v3162_v56 = vpop.f32.mrb[43].mxu1 }
 0xd54   : > { %v2250_v57 = vpop.permute.xlu1 %2249 }
 0xd55   : > { %v2260_v59 = vsel %vm1115_vm5, %v1911_v41, %v2250_v57  ;;  %v3302_v41 = vld [vmem:[%s3754_s12 + $0x10] sm:$0xff]  }
 0xd75   : > { %v2254_v58 = vpop.permute.xlu0 %2253 }
 0xd76   : > { %v2261_v60 = vsel %vm1566_vm7, %v2260_v59, %v2254_v58 }
 0xd7d   : > { %v2258_v61 = vpop.permute.xlu1 %2257 }
 0xd7e   : > { %v2262_v62 = vsel %vm1568_vm8, %v2261_v60, %v2258_v61  ;;  %v3466_v61 = vmov (!%p2961_p1), 0.0  }
 0xd7f   : > { %v2263_v63 = vpack.c.bf16 %v2262_v62, %v2262_v62 }
 0xd81   : > { %3168 = vmatmul.mubr.msk.bf16.vlgmr.msra.gmra.mrb[36].mxu0 %vm1007_vm1, %v2263_v63 }
 0xd82   : > { %3187 = vmatprep.mubr.msk.bf16.mxu0 %vm3451_vm2, %v3450_v9 }
 0xe54   : > { %v2319_v2 = vpop.f32.mrb[36].mxu0 }
 0xe55   : > { %v2320_v3 = vadd.f32 %v2947_v0, %v2319_v2  ;;  %v3169_v5 = vpop.f32.mrb[37].mxu0 }
 0xe56   : > { %v2322_v6 = vpop.f32.mrb[38].mxu0 }
 0xe57   : > { %v4019_v7 = vadd.f32 %v2320_v3, %v3888_v32  ;;  %v3170_v8 = vpop.f32.mrb[39].mxu0  ;;  %v3300_v32 = vld [vmem:[%s3754_s12] sm:$0xff]  }
 0xe58   : > { %3180 = vmatpush3.bf16.msra.mxu0 %v3300_v32  ;;  %v2962_v32 = vld [vmem:[%s4248_s9] ss:$0 sm:$0xff] (!%p2961_p1) }
 0xe59   : > { %v2326_v10 = vsel %vm1007_vm1, %v4019_v7, 0.0  ;;  %3181 = vmatprep.subr.bf16.mxu0 %v3450_v9 }
 0xe5a   : > { %2327 = vadd.xlane.f32.xlu0 %v2326_v10  ;;  %v2514_v10 = vld [vmem:[%s4247_s30] sm:$0x3] (!%p2961_p1) }
 0xe5c   : > { %3182 = vmatpush3.bf16.msra.mxu0 %v3301_v19 }
 0xe5d   : > { %3183 = vmatprep.subr.bf16.mxu0 %v3450_v9 }
 0xe60   : > { %3184 = vmatpush3.bf16.msra.mxu0 %v3302_v41 }
 0xe61   : > { %3185 = vmatprep.subr.bf16.mxu0 %v3450_v9  ;;  %v2955_v9 = vld [vmem:[%s993_s18] ss:$0 sm:$0xff]  ;;  %s4246_s18 = sld [smem:[#allocation39_spill]] (!%p2961_p1) }
 0xe64   : > { %3186 = vmatpush3.bf16.msra.mxu0 %v3303_v42 }
 0xe65   : > { %3191 = vmatprep.subr.bf16.mxu0 (!%p2961_p1), %v3466_v61 }
 0xe67   : > { %v3348_v60 = vld [vmem:[%s4246_s18] sm:$0xff] (!%p2961_p1)   ;;  %v3349_v62 = vld [vmem:[%s4246_s18 + $0x8] sm:$0xff] (!%p2961_p1)  }
 0xee7   : > { %v2328_v11 = vpop.xlane.xlu0 %2327 }
 0xee8   : > { %v2329_v12 = vmul.f32 0.03125, %v2328_v11  ;;  %v2535_v11 = vrot.slane (!%p2961_p1), %v2514_v10, %v1028_v21 }
 0xeea   : > { %v2330_v13 = vsub.f32 %v4019_v7, %v2329_v12 }
 0xeec   : > { %v2331_v14 = vmul.f32 %v2330_v13, %v2330_v13  ;;  %v2347_v34 = vmul.f32 %v2346_v31, %v2330_v13  ;;  %v2543_v13 = vrot.slane (!%p2961_p1), %v2514_v10, %v1036_v24 }
 0xeee   : > { %v2332_v15 = vsel %vm1007_vm1, %v2331_v14, 0.0 }
 0xeef   : > { %2333 = vadd.xlane.f32.xlu1 %v2332_v15 }
 0xf7c   : > { %v2334_v20 = vpop.xlane.xlu1 %2333 }
 0xf7d   : > { %v2335_v23 = vmul.f32 0.032258064, %v2334_v20 }
 0xf7f   : > { %3344 = vrsqrt.f32 %v2335_v23  ;;  %vm2338_vm11 = vcmp.eq.f32.partialorder %v2335_v23, inf  ;;  %v2341_v4 = vand.u32 2147483648, %v2335_v23  ;;  %vm2340_vm12 = vcmp.eq.f32.partialorder %v2335_v23, 0.0 }
 0xf89   : > { %v3345_v25 = vpop.eup %3344 }
 0xf8a   : > { %v2337_v26 = vmul.f32 %v3345_v25, %v2335_v23 }
 0xf8c   : > { %v2339_v27 = vsel %vm2338_vm11, %v2335_v23, %v2337_v26 }
 0xf8d   : > { %v2342_v28 = vsel %vm2340_vm12, %v2341_v4, %v2339_v27 }
 0xf8e   : > { %v2348_v29 = vadd.f32 1e-06, %v2342_v28 }
 0xf90   : > { %3346 = vrcp.f32 %v2348_v29 }
 0xf9a   : > { %v3347_v37 = vpop.eup %3346 }
 0xf9b   : > { %v2350_v38 = vmul.f32 %v3347_v37, %v2347_v34 }
 0xf9d   : > { %v2355_v39 = vadd.f32 %v2354_v35, %v2350_v38 }
 0xf9f   : > { %v2370_v40 = vpack.c.bf16 %v2355_v39, %v2355_v39 }
 0xfa1   : > { %3176 = vmatmul.mubr.msk.bf16.vlgmr.msra.gmra.mrb[44].mxu1 %vm1007_vm1, %v2370_v40 }
0x1074   : > { %v2426_v43 = vpop.f32.mrb[44].mxu1 }
0x1075   : > { %v2427_v22 = vadd.f32 %v2951_v1, %v2426_v43  ;;  %v3177_v36 = vpop.f32.mrb[45].mxu1 }
0x1076   : > { %v2429_v44 = vpop.f32.mrb[46].mxu1 }
0x1077   : > { %v2432_v45 = vmax.f32 %v2427_v22, 0.0  ;;  %v3178_v46 = vpop.f32.mrb[47].mxu1 }
0x1079   : > { %v2433_v47 = vpack.c.bf16 %v2432_v45, %v2432_v45 }
0x107b   : > { %3188 = vmatmul.mubr.msk.bf16.vlgmr.msra.gmra.mrb[40].mxu0 %vm2464_vm13, %v2433_v47 }
0x107c   : > { %3195 = vmatprep.mubr.msk.bf16.mxu0 (!%p2961_p1), %vm3467_vm14, %v3466_v61  ;;  %3192 = vmatpush3.bf16.msra.mxu0 (!%p2961_p1), %v3348_v60 }
0x107d   : > { %3193 = vmatprep.subr.bf16.mxu0 (!%p2961_p1), %v3466_v61 }
0x1080   : > { %3194 = vmatpush3.bf16.msra.mxu0 (!%p2961_p1), %v3349_v62 }
0x114d   : > { %2513 = sbr.rel (%p2961_p1) target bundleno = 4978 (0x1372), region = 116 }
0x114e   : > { %v2502_v48 = vpop.f32.mrb[40].mxu0 }
0x114f   : > { %v2503_v49 = vadd.f32 %v2955_v9, %v2502_v48  ;;  %v3189_v50 = vpop.f32.mrb[41].mxu0 }
0x1150   : > { %v2505_v51 = vpop.f32.mrb[42].mxu0 }
0x1151   : > { %v2508_v52 = vadd.f32 %v2503_v49, %v4019_v7  ;;  %v3190_v53 = vpop.f32.mrb[43].mxu0 }
0x1153   : > { %2509 = vst.msk [vmem:[#allocation2] sm:$0xff] %vm1007_vm1, %v2508_v52  ;;  %v2515_v54 = vsel (!%p2961_p1), %vm1007_vm1, %v2508_v52, 0.0 }
0x1154   : > { %2516 = vadd.xlane.f32.xlu0 %v2515_v54 }
0x11e1   : > { %v2517_v55 = vpop.xlane.xlu0 %2516 }
0x11e2   : > { %v2518_v56 = vmul.f32 0.03125, %v2517_v55 }
0x11e4   : > { %v2519_v57 = vsub.f32 %v2508_v52, %v2518_v56 }
0x11e6   : > { %v2520_v58 = vmul.f32 %v2519_v57, %v2519_v57  ;;  %v2536_v12 = vmul.f32 %v2535_v11, %v2519_v57 }
0x11e8   : > { %v2521_v59 = vsel %vm1007_vm1, %v2520_v58, 0.0 }
0x11e9   : > { %2522 = vadd.xlane.f32.xlu0 %v2521_v59 }
0x1276   : > { %v2523_v63 = vpop.xlane.xlu0 %2522 }
0x1277   : > { %v2524_v0 = vmul.f32 0.032258064, %v2523_v63 }
0x1279   : > { %3350 = vrsqrt.f32 %v2524_v0  ;;  %vm2527_vm15 = vcmp.eq.f32.partialorder %v2524_v0, inf  ;;  %v2530_v5 = vand.u32 2147483648, %v2524_v0  ;;  %vm2529_vm0 = vcmp.eq.f32.partialorder %v2524_v0, 0.0 }
0x1283   : > { %v3351_v2 = vpop.eup %3350 }
0x1284   : > { %v2526_v3 = vmul.f32 %v3351_v2, %v2524_v0 }
0x1286   : > { %v2528_v6 = vsel %vm2527_vm15, %v2524_v0, %v2526_v3 }
0x1287   : > { %v2531_v7 = vsel %vm2529_vm0, %v2530_v5, %v2528_v6 }
0x1288   : > { %v2537_v8 = vadd.f32 1e-06, %v2531_v7 }
0x128a   : > { %3352 = vrcp.f32 %v2537_v8 }
0x1294   : > { %v3353_v14 = vpop.eup %3352 }
0x1295   : > { %v2539_v15 = vmul.f32 %v3353_v14, %v2536_v12 }
0x1297   : > { %v2544_v16 = vadd.f32 %v2543_v13, %v2539_v15 }
0x1299   : > { %v2545_v17 = vpack.c.bf16 %v2544_v16, %v2544_v16 }
0x129b   : > { %3196 = vmatmul.mubr.msk.bf16.vlgmr.msra.gmra.mrb[0].mxu0 %vm1007_vm1, %v2545_v17 }
0x136e   : > { %v2606_v19 = vpop.f32.mrb[0].mxu0 }
0x136f   : > { %v2607_v20 = vadd.f32 %v2962_v32, %v2606_v19  ;;  %v3197_v23 = vpop.f32.mrb[1].mxu0 }
0x1370   : > { %v2609_v25 = vpop.f32.mrb[2].mxu0 }
0x1371   : > { %2612 = vst [vmem:[%s918_s2] sm:$0xff] %v2607_v20  ;;  %v3198_v21 = vpop.f32.mrb[3].mxu0 }
0x1372 PF: > { %s4249_s6 = sld [smem:[#allocation10_spill]]  ;;  %s4250_s16 = sld [smem:[#allocation7_spill]] }
0x1373   : > { %s4252_s28 = sld [smem:[#allocation41_spill]]  ;;  %s2627_s5 = sshll.u32 %s918_s2, 4  ;;  %s2628_s5 = int_to_ptr.vmem [resolvable:$true] %s2627_s5 }
0x1374   : > { %s3354_s26 = scalar_lea.vmem %s2628_s5, 128  ;;  %s3468_s21 = smov [#allocation3]  }
0x1375   : > { %p3355_p2 = scmp.ne.s32.totalorder %s2628_s5, %s3354_s26  ;;  %s3358_s11 = sshll.u32 %s3468_s21, 4  ;;  %s3359_s11 = int_to_ptr.vmem [resolvable:$false] %s3358_s11 }
0x1376   : > { %s3360_s12 = scalar_lea.vmem %s3359_s11, 256  ;;  %p3361_p6 = scmp.lt.s32.totalorder %s2628_s5, %s3359_s11 }
0x1377   : > { %p3356_p4 = pnand %p3355_p2, %p3633_p3  ;;  %p3362_p7 = scmp.lt.s32.totalorder %s3360_s12, %s3354_s26 }
0x1378   : > { %s2967_s10 = sshll.u32 %s4249_s6, 7  ;;  %s4254_s24 = sand.u32 1, %s4250_s16  }
0x1379   : > { %s4253_s20 = smov %s4252_s28  ;;  %s4078_s7 = scalar_lea.hbm %s4252_s28, %s2967_s10 }
0x137a   : > { %s2614_s22 = scalar_lea.sflag [#allocation4], %s4254_s24  ;;  %p3357_p5 = pneg %p3356_p4 }
0x137b   : > { %p3363_p8 = por %p3362_p7, %p3361_p6 }
0x137d   : > { %p3364_p10 = pnand %p3363_p8, %p3357_p5 }
0x137f   : > { %3367 = shalt.err (!%p3364_p10)
}
0x1380   : > { %s3368_s0 = scalar_lea.hbm %s4078_s7, 128  ;;  %s3372_s29 = scalar_lea.hbm %s4253_s20, 256 }
0x1381   : > { %p3369_p11 = scmp.ne.s32.totalorder %s4078_s7, %s3368_s0  ;;  %p3373_p0 = scmp.lt.u32.totalorder %s4078_s7, %s4253_s20 }
0x1382   : > { %p3374_p1 = scmp.lt.u32.totalorder %s3372_s29, %s3368_s0  ;;  %p3376_p4 = scmp.lt.u32.totalorder %s3368_s0, %s4078_s7 }
0x1383   : > { %p3370_p12 = pnand %p3369_p11, %p3633_p3 }
0x1384   : > { %p3375_p2 = por %p3374_p1, %p3373_p0 }
0x1385   : > { %p3371_p13 = pneg %p3370_p12 }
0x1386   : > { %p3377_p5 = por %p3376_p4, %p3375_p2 }
0x1388   : > { %p3378_p6 = pnand %p3377_p5, %p3371_p13 }
0x138a   : > { %3381 = shalt.err (!%p3378_p6)
}
0x138b   : > { %3199 = dma.vmem_to_hbm [thread:$0]  (%p3633_p3), %s2628_s5, 128, %s4078_s7, %s2614_s22  }
0x138c PF: > { %s4255_s17 = sld [smem:[#allocation13_spill]]  ;;  %s4256_s30 = sld [smem:[#allocation6_spill]] }
0x1392   : > { %p3205_p7 = scmp.ge.s32.totalorder %s4255_s17, 2  ;;  %s2639_s23 = sand.u32 1, %s4256_s30  }
0x1393   : > { %s2640_s9 = scalar_lea.sflag [#allocation4], %s2639_s23 }
0x1394   : > { %p3202_p8 = pnand %p3205_p7, %p3643_p9 }
0x1396   : > { %3415 = dma.done.wait (!%p3202_p8), %s2640_s9, 128  }
0x1397   : > { %3417 = vsyncadd (!%p3202_p8), %s2640_s9, 4294967168  ;;  %s35_s1 = sadd.s32 1, %s4255_s17   ;;  %s4258_s3 = sld [smem:[#allocation7_spill]] }
0x1398   : > { %p32_p10 = scmp.ge.s32.totalorder %s35_s1, 6   ;;  %s4259_s28 = sld [smem:[#allocation8_spill]] }
0x1399   : > { %s4260_s29 = sld [smem:[#allocation18_spill]]  ;;  %s4261_s30 = sld [smem:[#allocation11_spill]] }
0x139a   : > { %s4262_s4 = sld [smem:[#allocation12_spill]]  ;;  %s4263_s0 = sld [smem:[#allocation14_spill]] }
0x139b   : > { %s4264_s23 = sld [smem:[#allocation16_spill]]  ;;  %34 = sbr.rel (!%p32_p10) target bundleno = 26 (0x1a), region = 205 }
0x13a2   :  { %2645 = vsyncpa [#allocation4], 1 }
0x13a3   :  { %2647 = vsyncpa [#allocation4 + $0x1], 1 }

</bundles_post_ra>
